<compile_context>
chip_gen: v6e
topology: v6e:2x2x1
jax: 0.10.0
libtpu: 0.0.40
codegen_flags: <defaults>
</compile_context>

<pallas_src>
import math

import jax
import jax.numpy as jnp
from jax.experimental import pallas as pl
from jax.experimental.pallas import tpu as pltpu

DROPOUT_P = 0.3


def _attn_kernel(q_ref, k_ref, v_ref, mask_ref, drop_ref, o_ref):
    # q/k/v: (G, S, D)   mask: (S, S)   drop: (G, S, S)   o: (1, S, G*D)
    q = q_ref[...].astype(jnp.float32)
    k = k_ref[...].astype(jnp.float32)
    v = v_ref[...].astype(jnp.float32)
    mask = mask_ref[...]
    drop = drop_ref[...]

    g, s, d = q.shape
    scale = jnp.float32(1.0 / math.sqrt(d))

    # fold 1/sqrt(d) into q (G*S*D elems, not G*S*S) and contract on last dims
    # (no explicit K transpose); batched over heads in one einsum.
    qk = jnp.einsum("gqd,gkd->gqk", q * scale, k,
                    preferred_element_type=jnp.float32)
    qk = qk + mask[None, :, :]

    # numerically stable softmax over the key axis
    m = jnp.max(qk, axis=-1, keepdims=True)
    e = jnp.exp(qk - m)
    w = e / jnp.sum(e, axis=-1, keepdims=True)

    # dropout(p=0.3, train=True): keep-mask already scaled by 1/(1-p)
    w = w * drop

    # produce (q, g, d) so the stored block is lane-dense (S, G*D >= 128 lanes)
    out = jnp.einsum("gqk,gkd->qgd", w, v, preferred_element_type=jnp.float32)
    o_ref[0] = out.reshape(s, g * d)


def attention(query, key, value, attn_mask, seed=0):
    B, H, S, D = query.shape
    BH = B * H

    # largest head-block size dividing B*H (G=16 -> 4 grid steps, G*D=256 lanes)
    G = 1
    for cand in (16, 8, 4, 2):
        if BH % cand == 0:
            G = cand
            break
    nblk = BH // G

    qf = query.reshape(BH, S, D)
    kf = key.reshape(BH, S, D)
    vf = value.reshape(BH, S, D)
    # NOTE: assumes a single broadcastable (1,1,S,S) mask, as in the module.
    mask2d = attn_mask.reshape(S, S).astype(jnp.float32)

    # dropout keep-mask (P(keep)=1-p), pre-scaled by 1/(1-p); deterministic per seed.
    keep = jax.random.bernoulli(
        jax.random.PRNGKey(seed), p=1.0 - DROPOUT_P, shape=(BH, S, S))
    drop = keep.astype(jnp.float32) * jnp.float32(1.0 / (1.0 - DROPOUT_P))

    out = pl.pallas_call(
        _attn_kernel,
        out_shape=jax.ShapeDtypeStruct((nblk, S, G * D), jnp.float32),
        grid_spec=pltpu.PrefetchScalarGridSpec(
            num_scalar_prefetch=0,
            grid=(nblk,),
            in_specs=[
                pl.BlockSpec((G, S, D), lambda i: (i, 0, 0)),
                pl.BlockSpec((G, S, D), lambda i: (i, 0, 0)),
                pl.BlockSpec((G, S, D), lambda i: (i, 0, 0)),
                pl.BlockSpec((S, S), lambda i: (0, 0)),
                pl.BlockSpec((G, S, S), lambda i: (i, 0, 0)),
            ],
            out_specs=pl.BlockSpec((1, S, G * D), lambda i: (i, 0, 0)),
        ),
        compiler_params=pltpu.CompilerParams(
            dimension_semantics=("parallel",)
        ),
    )(qf, kf, vf, mask2d, drop)

    # (nblk, S, G*D) -> (nblk, S, G, D) -> (nblk, G, S, D) -> (B, H, S, D)
    return out.reshape(nblk, S, G, D).transpose(0, 2, 1, 3).reshape(B, H, S, D)


if __name__ == "__main__":
    # shapes implied by the module: q/k/v [1, 64, 32, 16], mask [1, 1, 32, 32]
    rng = jax.random.PRNGKey(0)
    kq, kk, kv, km = jax.random.split(rng, 4)
    query = jax.random.normal(kq, (1, 64, 32, 16), dtype=jnp.float32)
    key = jax.random.normal(kk, (1, 64, 32, 16), dtype=jnp.float32)
    value = jax.random.normal(kv, (1, 64, 32, 16), dtype=jnp.float32)
    attn_mask = jax.random.normal(km, (1, 1, 32, 32), dtype=jnp.float32)

    out = attention(query, key, value, attn_mask, seed=0)
    jax.block_until_ready(out)
    assert out.shape == (1, 64, 32, 16)
    print("KERNEL_OK")
</pallas_src>

<mosaic_0001>
module attributes {stable_mosaic.version = 11 : i64} {
  func.func @_attn_kernel(%arg0: i32, %arg1: memref<16x32x16xf32, #tpu.memory_space<vmem>>, %arg2: memref<16x32x16xf32, #tpu.memory_space<vmem>>, %arg3: memref<16x32x16xf32, #tpu.memory_space<vmem>>, %arg4: memref<32x32xf32, #tpu.memory_space<vmem>>, %arg5: memref<16x32x32xf32, #tpu.memory_space<vmem>>, %arg6: memref<1x32x256xf32, #tpu.memory_space<vmem>>) attributes {dimension_semantics = [#tpu.dimension_semantics<parallel>], iteration_bounds = array<i64: 4>, scalar_prefetch = 0 : i64, scratch_operands = 0 : i64, tpu.core_type = #tpu.core_type<tc>, window_params = [{transform_indices = @transform_0, window_bounds = array<i64: 16, 32, 16>}, {transform_indices = @transform_1, window_bounds = array<i64: 16, 32, 16>}, {transform_indices = @transform_2, window_bounds = array<i64: 16, 32, 16>}, {pipeline_mode = #tpu.pipeline_mode<synchronous>, transform_indices = @transform_3, window_bounds = array<i64: 32, 32>}, {transform_indices = @transform_4, window_bounds = array<i64: 16, 32, 32>}, {transform_indices = @transform_5, window_bounds = array<i64: 1, 32, 256>}]} {
    %c0 = arith.constant 0 : index
    %c0_0 = arith.constant 0 : index
    %c0_1 = arith.constant 0 : index
    %0 = vector.load %arg1[%c0, %c0_0, %c0_1] : memref<16x32x16xf32, #tpu.memory_space<vmem>>, vector<16x32x16xf32>
    %c0_2 = arith.constant 0 : index
    %c0_3 = arith.constant 0 : index
    %c0_4 = arith.constant 0 : index
    %1 = vector.load %arg2[%c0_2, %c0_3, %c0_4] : memref<16x32x16xf32, #tpu.memory_space<vmem>>, vector<16x32x16xf32>
    %c0_5 = arith.constant 0 : index
    %c0_6 = arith.constant 0 : index
    %c0_7 = arith.constant 0 : index
    %2 = vector.load %arg3[%c0_5, %c0_6, %c0_7] : memref<16x32x16xf32, #tpu.memory_space<vmem>>, vector<16x32x16xf32>
    %c0_8 = arith.constant 0 : index
    %c0_9 = arith.constant 0 : index
    %3 = vector.load %arg4[%c0_8, %c0_9] : memref<32x32xf32, #tpu.memory_space<vmem>>, vector<32x32xf32>
    %c0_10 = arith.constant 0 : index
    %c0_11 = arith.constant 0 : index
    %c0_12 = arith.constant 0 : index
    %4 = vector.load %arg5[%c0_10, %c0_11, %c0_12] : memref<16x32x32xf32, #tpu.memory_space<vmem>>, vector<16x32x32xf32>
    %cst = arith.constant 2.500000e-01 : f32
    %5 = vector.broadcast %cst : f32 to vector<16x32x16xf32>
    %6 = arith.mulf %0, %5 : vector<16x32x16xf32>
    "tpu.trace_start"() <{level = 10 : i32, message = "gqd,gkd->gqk"}> : () -> ()
    %cst_13 = arith.constant dense<0.000000e+00> : vector<16x32x32xf32>
    %7 = tpu.matmul %6, %1, %cst_13 {dimension_numbers = #tpu.dot_dimension_numbers<[2], [2], [1], [1], [0, 0, 0, 1, 1, 1], [0], [0]>} : vector<16x32x16xf32>, vector<16x32x16xf32>, vector<16x32x32xf32> -> vector<16x32x32xf32>
    "tpu.trace_stop"() : () -> ()
    %8 = vector.shape_cast %3 : vector<32x32xf32> to vector<1x32x32xf32>
    %9 = vector.broadcast %8 : vector<1x32x32xf32> to vector<16x32x32xf32>
    %10 = arith.addf %7, %9 : vector<16x32x32xf32>
    %cst_14 = arith.constant dense<0xFF800000> : vector<16x32xf32>
    %11 = vector.multi_reduction <maximumf>, %10, %cst_14 [2] : vector<16x32x32xf32> to vector<16x32xf32>
    %12 = vector.shape_cast %11 : vector<16x32xf32> to vector<16x32x1xf32>
    %13 = vector.broadcast %12 : vector<16x32x1xf32> to vector<16x32x32xf32>
    %14 = arith.subf %10, %13 : vector<16x32x32xf32>
    %15 = math.exp %14 : vector<16x32x32xf32>
    %cst_15 = arith.constant dense<0.000000e+00> : vector<16x32xf32>
    %16 = vector.multi_reduction <add>, %15, %cst_15 [2] : vector<16x32x32xf32> to vector<16x32xf32>
    %17 = vector.shape_cast %16 : vector<16x32xf32> to vector<16x32x1xf32>
    %18 = vector.broadcast %17 : vector<16x32x1xf32> to vector<16x32x32xf32>
    %19 = arith.divf %15, %18 : vector<16x32x32xf32>
    %20 = arith.mulf %19, %4 : vector<16x32x32xf32>
    "tpu.trace_start"() <{level = 10 : i32, message = "gqk,gkd->qgd"}> : () -> ()
    %cst_16 = arith.constant dense<0.000000e+00> : vector<16x16x32xf32>
    %21 = tpu.matmul %2, %20, %cst_16 {dimension_numbers = #tpu.dot_dimension_numbers<[1], [2], [2], [1], [0, 0, 0, 2, 1, 1], [0], [0]>} : vector<16x32x16xf32>, vector<16x32x32xf32>, vector<16x16x32xf32> -> vector<16x16x32xf32>
    %22 = tpu.transpose %21, [2, 0, 1] : vector<16x16x32xf32> -> vector<32x16x16xf32>
    "tpu.trace_stop"() : () -> ()
    %23 = vector.shape_cast %22 : vector<32x16x16xf32> to vector<32x256xf32>
    %c0_17 = arith.constant 0 : index
    %c0_18 = arith.constant 0 : index
    %c0_19 = arith.constant 0 : index
    %24 = vector.load %arg6[%c0_17, %c0_18, %c0_19] : memref<1x32x256xf32, #tpu.memory_space<vmem>>, vector<1x32x256xf32>
    %25 = vector.shape_cast %24 : vector<1x32x256xf32> to vector<32x256xf32>
    %26 = vector.shape_cast %23 : vector<32x256xf32> to vector<1x32x256xf32>
    tpu.vector_store %arg6[%c0_17, %c0_18, %c0_19], %26 {strides = array<i32>} : memref<1x32x256xf32, #tpu.memory_space<vmem>>, vector<1x32x256xf32>,
    return
  }
  func.func @transform_0(%arg0: i32) -> (i32, i32, i32) {
    %c0_i32 = arith.constant 0 : i32
    %c0_i32_0 = arith.constant 0 : i32
    %c0_i32_1 = arith.constant 0 : i32
    return %arg0, %c0_i32, %c0_i32_0 : i32, i32, i32
  }
  func.func @transform_1(%arg0: i32) -> (i32, i32, i32) {
    %c0_i32 = arith.constant 0 : i32
    %c0_i32_0 = arith.constant 0 : i32
    %c0_i32_1 = arith.constant 0 : i32
    return %arg0, %c0_i32, %c0_i32_0 : i32, i32, i32
  }
  func.func @transform_2(%arg0: i32) -> (i32, i32, i32) {
    %c0_i32 = arith.constant 0 : i32
    %c0_i32_0 = arith.constant 0 : i32
    %c0_i32_1 = arith.constant 0 : i32
    return %arg0, %c0_i32, %c0_i32_0 : i32, i32, i32
  }
  func.func @transform_3(%arg0: i32) -> (i32, i32) {
    %c0_i32 = arith.constant 0 : i32
    %c0_i32_0 = arith.constant 0 : i32
    %c0_i32_1 = arith.constant 0 : i32
    return %c0_i32, %c0_i32_0 : i32, i32
  }
  func.func @transform_4(%arg0: i32) -> (i32, i32, i32) {
    %c0_i32 = arith.constant 0 : i32
    %c0_i32_0 = arith.constant 0 : i32
    %c0_i32_1 = arith.constant 0 : i32
    return %arg0, %c0_i32, %c0_i32_0 : i32, i32, i32
  }
  func.func @transform_5(%arg0: i32) -> (i32, i32, i32) {
    %c0_i32 = arith.constant 0 : i32
    %c0_i32_0 = arith.constant 0 : i32
    %c0_i32_1 = arith.constant 0 : i32
    return %arg0, %c0_i32, %c0_i32_0 : i32, i32, i32
  }
}

</mosaic_0001>

<bundles_post_ra>
// kernel: tpu_custom_call.1
= control target key start
LH: loop header
LB: loop body
LE: loop exit
PB: predicated region body
PF: predicated region fallthrough
CT: control target
= control target key end

     0   :  { %10 = vsyncpa [#allocation3], 0  ;;  %s12184_s0 = inlined_call_operand.vmem [shape: f32[64,32,16], index: 0, kind: input, shape index: {}]   ;;  %s12185_s1 = inlined_call_operand.vmem [shape: f32[64,32,16], index: 1, kind: input, shape index: {}]   ;;  %s12186_s2 = inlined_call_operand.vmem [shape: f32[64,32,16], index: 2, kind: input, shape index: {}]   ;;  %s12187_s3 = inlined_call_operand.vmem [shape: f32[32,32], index: 3, kind: input, shape index: {}]   ;;  %s12188_s4 = inlined_call_operand.vmem [shape: f32[64,32,32], index: 4, kind: input, shape index: {}]   ;;  %s12189_s5 = inlined_call_operand.hbm [shape: f32[4,32,256], index: 5, kind: output, shape index: {}]  }
   0x1   :  { %12 = vsyncpa [#allocation3 + $0x1], 0  ;;  %s9582_s18 = smov 0   ;;  %s9584_s19 = smov 0  }
   0x2   :  { %s9586_s20 = smov 0   ;;  %s9588_s21 = smov 0  }
   0x3 LB: > { %s9603_s22 = sadd.s32 4294967295, %s9539_s21   ;;  %s8234_s23 = sadd.s32 4294967294, %s9539_s21   ;;  %s9539_s21 = sphi %s9588_s21, %s12417_s21   ;;  %s9535_s20 = sphi %s9586_s20, %s12416_s20   ;;  %s9531_s19 = sphi %s9584_s19, %s12415_s19   ;;  %s9527_s18 = sphi %s9582_s18, %s12414_s18  }
   0x4   : > { %s9607_s24 = sadd.s32 1, %s9539_s21   ;;  %s150_s25 = sadd.s32 1, %s9535_s20 }
   0x5   : > { %s147_s26 = ssub.s32 %s9539_s21, %s9607_s24  ;;  %p160_p0 = scmp.ne.s32.totalorder %s9535_s20, %s9531_s19 }
   0x6   : > { %p148_p1 = scmp.eq.s32.totalorder %s147_s26, 0  ;;  %p161_p2 = scmp.eq.s32.totalorder %s9603_s22, 3 }
   0x7   : > { %p166_p3 = scmp.ne.s32.totalorder %s9531_s19, %s9527_s18  ;;  %p167_p4 = scmp.eq.s32.totalorder %s8234_s23, 3 }
   0x8   : > { %s9618_s27 = scalar_select %p148_p1, %s9535_s20, %s150_s25  }
   0x9   : > { %p9620_p5 = por %p161_p2, %p160_p0  ;;  %p9624_p6 = por %p167_p4, %p166_p3 }
   0xa   : > { %p8237_p7 = scmp.ge.s32.totalorder %s9539_s21, 1  ;;  %p228_p8 = scmp.lt.s32.totalorder %s9539_s21, 5 }
   0xc   : > { %p229_p9 = pnand %p8237_p7, %p228_p8 }
   0xe   : > { %232 = sbr.rel (%p229_p9) target bundleno = 1349 (0x545), region = 40 }
  0x13   : > { %s8239_s30 = sshll.u32 %s9603_s22, 4  ;;  %vm627_vm0 = vcmask 130048   ;;  %vm2372_vm1 = vcmask 261120   ;;  %s9545_s13 = smov 48   ;;  %vm8061_vm2 = vcmask 392192   ;;  %vm8066_vm3 = vcmask 523264  }
  0x14   : > { %p276_p10 = scmp.lt.s32.totalorder %s8239_s30, 63  ;;  %s9546_s14 = smov 64   ;;  %vm8071_vm4 = vcmask 654336   ;;  %vm8076_vm5 = vcmask 785408   ;;  %vm8081_vm6 = vcmask 916480  }
  0x15   : > { %s9548_s16 = smov 96   ;;  %s9549_s17 = smov 112  }
  0x16   : > { %s12419_s30 = smov (!%p276_p10, %s8239_s30), 63  ;;  %s272_s23 = sand.u32 1, %s9531_s19  }
  0x17   : > { %s9631_s6 = sshll.u32 %s12419_s30, 5  ;;  %s8238_s25 = sshll.u32 %s272_s23, 6 }
  0x18   : > { %s9637_s9 = scalar_lea.vmem %s12185_s1, %s9631_s6  ;;  %s9643_s12 = scalar_lea.vmem %s12184_s0, %s9631_s6 }
  0x19   : > { %v370_v0 = vld [vmem:[%s9637_s9 + $0x18] sm:$0xff]  ;;  %v369_v2 = vld [vmem:[%s9637_s9 + $0x10] sm:$0xff]  ;;  %v303_v4 = vld [vmem:[%s9643_s12] sm:$0xff]  ;;  %s9747_s15 = scalar_lea.vmem %s12186_s2, %s9631_s6  ;;  %s10649_s11 = scalar_lea.vmem %s12188_s4, %s9631_s6 }
  0x1a   : > { %v374_v1 = vld [vmem:[%s9637_s9 + $0x38] sm:$0xff]  ;;  %8773 = vmatprep.subr.msk.mxu0 %vm627_vm0, %v370_v0  ;;  %v373_v3 = vld [vmem:[%s9637_s9 + $0x30] sm:$0xff]  ;;  %v563_v5 = vmul.f32 0.25, %v303_v4  ;;  %v307_v6 = vld [vmem:[%s9643_s12 + $0x20] sm:$0xff]  ;;  %s9543_s6 = smov 16   ;;  %s12077_s26 = scalar_lea.vmem [#allocation2], %s8238_s25 }
  0x1b   : > { %8787 = vmatprep.subr.msk.mxu1 %vm627_vm0, %v374_v1  ;;  %8774 = vmatpush3.xpose.msk.msra.mxu0 %vm627_vm0, %v370_v0  ;;  %v368_v7 = vld [vmem:[%s9637_s9 + $0x8] sm:$0xff]  ;;  %v567_v9 = vmul.f32 0.25, %v307_v6  ;;  %v367_v10 = vld [vmem:[%s9637_s9] sm:$0xff]  ;;  %v378_v14 = vld [vmem:[%s9637_s9 + $0x58] sm:$0xff]  ;;  %s8548_s30 = sshll.u32 %s9603_s22, 10  ;;  %s8136_s7 = sshll.u32 %s12077_s26, 4  ;;  %s12137_s7 = int_to_ptr.vmem [resolvable:$true] %s8136_s7 }
  0x1c   : > { %8788 = vmatpush3.xpose.msk.msra.mxu1 %vm627_vm0, %v374_v1  ;;  %8775 = vmatprep.subr.msk.mxu0 %vm627_vm0, %v369_v2  ;;  %v372_v8 = vld [vmem:[%s9637_s9 + $0x28] sm:$0xff]  ;;  %v371_v11 = vld [vmem:[%s9637_s9 + $0x20] sm:$0xff]  ;;  %v382_v15 = vld [vmem:[%s9637_s9 + $0x78] sm:$0xff]  ;;  %s12134_s10 = scalar_lea.hbm %s12189_s5, %s8548_s30  ;;  %s12143_s22 = scalar_lea.sflag [#allocation3], %s272_s23 }
  0x1d   : > { %8789 = vmatprep.subr.msk.mxu1 %vm627_vm0, %v373_v3  ;;  %8781 = vmatprep.mubr.msk.f32.mxu0 %vm627_vm0, %v563_v5  ;;  %v304_v12 = vld [vmem:[%s9643_s12 + $0x8] sm:$0xff]  ;;  %v305_v16 = vld [vmem:[%s9643_s12 + $0x10] sm:$0xff]  ;;  %v306_v20 = vld [vmem:[%s9643_s12 + $0x18] sm:$0xff] }
  0x1e   : > { %8795 = vmatprep.mubr.msk.f32.mxu1 %vm627_vm0, %v567_v9  ;;  %v308_v13 = vld [vmem:[%s9643_s12 + $0x28] sm:$0xff]  ;;  %v564_v17 = vmul.f32 0.25, %v304_v12  ;;  %v309_v19 = vld [vmem:[%s9643_s12 + $0x30] sm:$0xff]  ;;  %v310_v21 = vld [vmem:[%s9643_s12 + $0x38] sm:$0xff]  ;;  %v565_v22 = vmul.f32 0.25, %v305_v16  ;;  %v566_v25 = vmul.f32 0.25, %v306_v20 }
  0x1f   : > { %8776 = vmatpush3.xpose.msk.msra.mxu0 %vm627_vm0, %v369_v2  ;;  %v568_v18 = vmul.f32 0.25, %v308_v13  ;;  %v377_v23 = vld [vmem:[%s9637_s9 + $0x50] sm:$0xff]  ;;  %v569_v24 = vmul.f32 0.25, %v309_v19  ;;  %v570_v27 = vmul.f32 0.25, %v310_v21  ;;  %v311_v28 = vld [vmem:[%s9643_s12 + $0x40] sm:$0xff]  ;;  %v376_v30 = vld [vmem:[%s9637_s9 + $0x48] sm:$0xff] }
  0x20   : > { %8790 = vmatpush3.xpose.msk.msra.mxu1 %vm627_vm0, %v373_v3  ;;  %8777 = vmatprep.subr.msk.mxu0 %vm627_vm0, %v368_v7  ;;  %v381_v26 = vld [vmem:[%s9637_s9 + $0x70] sm:$0xff]  ;;  %v315_v29 = vld [vmem:[%s9643_s12 + $0x60] sm:$0xff]  ;;  %v380_v31 = vld [vmem:[%s9637_s9 + $0x68] sm:$0xff]  ;;  %v571_v32 = vmul.f32 0.25, %v311_v28 }
  0x21   : > { %8791 = vmatprep.subr.msk.mxu1 %vm627_vm0, %v372_v8  ;;  %v575_v33 = vmul.f32 0.25, %v315_v29  ;;  %v375_v34 = vld [vmem:[%s9637_s9 + $0x40] sm:$0xff]  ;;  %v312_v36 = vld [vmem:[%s9643_s12 + $0x48] sm:$0xff]  ;;  %v386_v38 = vld [vmem:[%s9637_s9 + $0x98] sm:$0xff] }
  0x22   : > { %v379_v35 = vld [vmem:[%s9637_s9 + $0x60] sm:$0xff]  ;;  %v316_v37 = vld [vmem:[%s9643_s12 + $0x68] sm:$0xff]  ;;  %v390_v39 = vld [vmem:[%s9637_s9 + $0xb8] sm:$0xff]  ;;  %v572_v40 = vmul.f32 0.25, %v312_v36 }
  0x23   : > { %8778 = vmatpush3.xpose.msk.msra.mxu0 %vm627_vm0, %v368_v7  ;;  %v576_v41 = vmul.f32 0.25, %v316_v37  ;;  %v313_v42 = vld [vmem:[%s9643_s12 + $0x50] sm:$0xff]  ;;  %v314_v44 = vld [vmem:[%s9643_s12 + $0x58] sm:$0xff]  ;;  %v319_v52 = vld [vmem:[%s9643_s12 + $0x80] sm:$0xff] }
  0x24   : > { %8792 = vmatpush3.xpose.msk.msra.mxu1 %vm627_vm0, %v372_v8  ;;  %8779 = vmatprep.subr.msk.mxu0 %vm627_vm0, %v367_v10  ;;  %v317_v43 = vld [vmem:[%s9643_s12 + $0x70] sm:$0xff]  ;;  %v318_v45 = vld [vmem:[%s9643_s12 + $0x78] sm:$0xff]  ;;  %v573_v48 = vmul.f32 0.25, %v313_v42  ;;  %v574_v50 = vmul.f32 0.25, %v314_v44  ;;  %v323_v53 = vld [vmem:[%s9643_s12 + $0xa0] sm:$0xff]  ;;  %v579_v56 = vmul.f32 0.25, %v319_v52 }
  0x25   : > { %8793 = vmatprep.subr.msk.mxu1 %vm627_vm0, %v371_v11  ;;  %v385_v46 = vld [vmem:[%s9637_s9 + $0x90] sm:$0xff]  ;;  %v577_v49 = vmul.f32 0.25, %v317_v43  ;;  %v578_v51 = vmul.f32 0.25, %v318_v45  ;;  %v384_v54 = vld [vmem:[%s9637_s9 + $0x88] sm:$0xff]  ;;  %v583_v57 = vmul.f32 0.25, %v323_v53  ;;  %v383_v58 = vld [vmem:[%s9637_s9 + $0x80] sm:$0xff] }
  0x26   : > { %v389_v47 = vld [vmem:[%s9637_s9 + $0xb0] sm:$0xff]  ;;  %v388_v55 = vld [vmem:[%s9637_s9 + $0xa8] sm:$0xff]  ;;  %v387_v59 = vld [vmem:[%s9637_s9 + $0xa0] sm:$0xff] }
  0x27   : > { %8780 = vmatpush3.xpose.msk.msra.mxu0 %vm627_vm0, %v367_v10  ;;  %v320_v60 = vld [vmem:[%s9643_s12 + $0x88] sm:$0xff]  ;;  %v431_v62 = vld [vmem:[%s9747_s15] sm:$0xff]  ;;  %v394_v0 = vld [vmem:[%s9637_s9 + $0xd8] sm:$0xff] }
  0x28   : > { %8794 = vmatpush3.xpose.msk.msra.mxu1 %vm627_vm0, %v371_v11  ;;  %8801 = vmatprep.subr.msk.mxu0 %vm627_vm0, %v378_v14  ;;  %v324_v61 = vld [vmem:[%s9643_s12 + $0xa8] sm:$0xff]  ;;  %v435_v63 = vld [vmem:[%s9747_s15 + $0x20] sm:$0xff]  ;;  %v398_v1 = vld [vmem:[%s9637_s9 + $0xf8] sm:$0xff]  ;;  %v580_v3 = vmul.f32 0.25, %v320_v60 }
  0x29   : > { %8815 = vmatprep.subr.msk.mxu1 %vm627_vm0, %v382_v15  ;;  %v321_v2 = vld [vmem:[%s9643_s12 + $0x90] sm:$0xff]  ;;  %3141 = vxpose.xlu0.b32.start [1/4] (short) (narrow) %v431_v62, 16  ;;  %v584_v4 = vmul.f32 0.25, %v324_v61  ;;  %v432_v6 = vld [vmem:[%s9747_s15 + $0x8] sm:$0xff]  ;;  %v322_v8 = vld [vmem:[%s9643_s12 + $0x98] sm:$0xff] }
  0x2a   : > { %8782 = vmatmul.mubr.msk.f32.vlgmr.msra.gmra.mxu0 %vm627_vm0, %v564_v17  ;;  %3266 = vxpose.xlu1.b32.start [1/4] (short) (narrow) %v435_v63, 16  ;;  %v325_v5 = vld [vmem:[%s9643_s12 + $0xb0] sm:$0xff]  ;;  %v436_v7 = vld [vmem:[%s9747_s15 + $0x28] sm:$0xff]  ;;  %v326_v9 = vld [vmem:[%s9643_s12 + $0xb8] sm:$0xff]  ;;  %v581_v12 = vmul.f32 0.25, %v321_v2 }
  0x2b   : > { %8796 = vmatmul.mubr.msk.f32.vlgmr.msra.gmra.mxu1 %vm627_vm0, %v568_v18  ;;  %8802 = vmatpush3.xpose.msk.msra.mxu0 %vm627_vm0, %v378_v14  ;;  %v393_v10 = vld [vmem:[%s9637_s9 + $0xd0] sm:$0xff]  ;;  %v585_v13 = vmul.f32 0.25, %v325_v5  ;;  %v582_v14 = vmul.f32 0.25, %v322_v8  ;;  %v327_v16 = vld [vmem:[%s9643_s12 + $0xc0] sm:$0xff]  ;;  %v392_v18 = vld [vmem:[%s9637_s9 + $0xc8] sm:$0xff] }
  0x2c   : > { %8816 = vmatpush3.xpose.msk.msra.mxu1 %vm627_vm0, %v382_v15  ;;  %8784 = vmatprep.mubr.msk.f32.mxu0 %vm627_vm0, %v565_v22  ;;  %v397_v11 = vld [vmem:[%s9637_s9 + $0xf0] sm:$0xff]  ;;  %v586_v15 = vmul.f32 0.25, %v326_v9  ;;  %v331_v17 = vld [vmem:[%s9643_s12 + $0xe0] sm:$0xff]  ;;  %v396_v19 = vld [vmem:[%s9637_s9 + $0xe8] sm:$0xff]  ;;  %v587_v20 = vmul.f32 0.25, %v327_v16 }
  0x2d   : > { %8803 = vmatprep.subr.msk.mxu0 %vm627_vm0, %v377_v23  ;;  %8817 = vmatprep.subr.msk.mxu1 %vm627_vm0, %v381_v26  ;;  %v591_v21 = vmul.f32 0.25, %v331_v17  ;;  %v433_v22 = vld [vmem:[%s9747_s15 + $0x10] sm:$0xff]  ;;  %v434_v28 = vld [vmem:[%s9747_s15 + $0x18] sm:$0xff]  ;;  %v335_v44 = vld [vmem:[%s9643_s12 + $0x100] sm:$0xff] }
  0x2e   : > { %8798 = vmatprep.mubr.msk.f32.mxu1 %vm627_vm0, %v569_v24  ;;  %8785 = vmatmul.mubr.msk.f32.gmra.mxu0 %vm627_vm0, %v566_v25  ;;  %v391_v24 = vld [vmem:[%s9637_s9 + $0xc0] sm:$0xff]  ;;  %v438_v29 = vld [vmem:[%s9747_s15 + $0x38] sm:$0xff]  ;;  %v336_v52 = vld [vmem:[%s9643_s12 + $0x108] sm:$0xff] }
  0x2f   : > { %8799 = vmatmul.mubr.msk.f32.gmra.mxu1 %vm627_vm0, %v570_v27  ;;  %8804 = vmatpush3.xpose.msk.msra.mxu0 %vm627_vm0, %v377_v23  ;;  %v437_v23 = vld [vmem:[%s9747_s15 + $0x30] sm:$0xff]  ;;  %v395_v25 = vld [vmem:[%s9637_s9 + $0xe0] sm:$0xff]  ;;  %v332_v27 = vld [vmem:[%s9643_s12 + $0xe8] sm:$0xff] }
  0x30   : > { %8818 = vmatpush3.xpose.msk.msra.mxu1 %vm627_vm0, %v381_v26  ;;  %8805 = vmatprep.subr.msk.mxu0 %vm627_vm0, %v376_v30  ;;  %v328_v26 = vld [vmem:[%s9643_s12 + $0xc8] sm:$0xff]  ;;  %v330_v36 = vld [vmem:[%s9643_s12 + $0xd8] sm:$0xff]  ;;  %v339_v45 = vld [vmem:[%s9643_s12 + $0x120] sm:$0xff] }
  0x31   : > { %8819 = vmatprep.subr.msk.mxu1 %vm627_vm0, %v380_v31  ;;  %8809 = vmatprep.mubr.msk.f32.mxu0 %vm627_vm0, %v571_v32  ;;  %v588_v32 = vmul.f32 0.25, %v328_v26  ;;  %v334_v37 = vld [vmem:[%s9643_s12 + $0xf8] sm:$0xff]  ;;  %v590_v42 = vmul.f32 0.25, %v330_v36  ;;  %v340_v53 = vld [vmem:[%s9643_s12 + $0x128] sm:$0xff]  ;;  %v409_v62 = vld [vmem:[%s9637_s9 + $0x150] sm:$0xff] }
  0x32   : > { %8823 = vmatprep.mubr.msk.f32.mxu1 %vm627_vm0, %v575_v33  ;;  %3142 = vxpose.xlu0.b32.cont [2/4] (short) (narrow) %v432_v6, 16  ;;  %v592_v33 = vmul.f32 0.25, %v332_v27  ;;  %v594_v43 = vmul.f32 0.25, %v334_v37  ;;  %v338_v60 = vld [vmem:[%s9643_s12 + $0x118] sm:$0xff]  ;;  %v413_v63 = vld [vmem:[%s9637_s9 + $0x170] sm:$0xff]  ;;  %v347_v5 = vld [vmem:[%s9643_s12 + $0x160] sm:$0xff] }
  0x33   : > { %8806 = vmatpush3.xpose.msk.msra.mxu0 %vm627_vm0, %v376_v30  ;;  %3267 = vxpose.xlu1.b32.cont [2/4] (short) (narrow) %v436_v7, 16  ;;  %v402_v30 = vld [vmem:[%s9637_s9 + $0x118] sm:$0xff]  ;;  %v598_v2 = vmul.f32 0.25, %v338_v60  ;;  %v408_v6 = vld [vmem:[%s9637_s9 + $0x148] sm:$0xff]  ;;  %v607_v9 = vmul.f32 0.25, %v347_v5 }
  0x34   : > { %8820 = vmatpush3.xpose.msk.msra.mxu1 %vm627_vm0, %v380_v31  ;;  %8807 = vmatprep.subr.msk.mxu0 %vm627_vm0, %v375_v34  ;;  %v406_v31 = vld [vmem:[%s9637_s9 + $0x138] sm:$0xff]  ;;  %v412_v7 = vld [vmem:[%s9637_s9 + $0x168] sm:$0xff] }
  0x35   : > { %8821 = vmatprep.subr.msk.mxu1 %vm627_vm0, %v379_v35  ;;  %v342_v61 = vld [vmem:[%s9643_s12 + $0x138] sm:$0xff]  ;;  %v352_v36 = vld [vmem:[%s9643_s12 + $0x188] sm:$0xff] }
  0x36   : > { %3143 = vxpose.xlu0.b32.cont [3/4] (short) (narrow) %v433_v22, 16  ;;  %v417_v22 = vld [vmem:[%s9637_s9 + $0x190] sm:$0xff]  ;;  %v356_v37 = vld [vmem:[%s9643_s12 + $0x1a8] sm:$0xff]  ;;  %v362_v5 = vld [vmem:[%s9643_s12 + $0x1d8] sm:$0xff] }
  0x37   : > { %8808 = vmatpush3.xpose.msk.msra.mxu0 %vm627_vm0, %v375_v34  ;;  %3268 = vxpose.xlu1.b32.cont [3/4] (short) (narrow) %v437_v23, 16  ;;  %v329_v34 = vld [vmem:[%s9643_s12 + $0xd0] sm:$0xff]  ;;  %v360_v60 = vld [vmem:[%s9643_s12 + $0x1c8] sm:$0xff] }
  0x38   : > { %8822 = vmatpush3.xpose.msk.msra.mxu1 %vm627_vm0, %v379_v35  ;;  %8829 = vmatprep.subr.msk.mxu0 %vm627_vm0, %v386_v38  ;;  %v333_v35 = vld [vmem:[%s9643_s12 + $0xf0] sm:$0xff] }
  0x39   : > { %8843 = vmatprep.subr.msk.mxu1 %vm627_vm0, %v390_v39  ;;  %v421_v23 = vld [vmem:[%s9637_s9 + $0x1b0] sm:$0xff] }
  0x3a   : > { %8810 = vmatmul.mubr.msk.f32.vlgmr.msra.gmra.mxu0 %vm627_vm0, %v572_v40  ;;  %3144 = vxpose.xlu0.b32.end [4/4] (short) (narrow) %v434_v28, 16  ;;  %v589_v40 = vmul.f32 0.25, %v329_v34  ;;  %v351_v28 = vld [vmem:[%s9643_s12 + $0x180] sm:$0xff] }
  0x3b   : > { %8824 = vmatmul.mubr.msk.f32.vlgmr.msra.gmra.mxu1 %vm627_vm0, %v576_v41  ;;  %8830 = vmatpush3.xpose.msk.msra.mxu0 %vm627_vm0, %v386_v38  ;;  %v401_v38 = vld [vmem:[%s9637_s9 + $0x110] sm:$0xff]  ;;  %v593_v41 = vmul.f32 0.25, %v333_v35  ;;  %v415_v34 = vld [vmem:[%s9637_s9 + $0x180] sm:$0xff] }
  0x3c   : > { %8844 = vmatpush3.xpose.msk.msra.mxu1 %vm627_vm0, %v390_v39  ;;  %8831 = vmatprep.subr.msk.mxu0 %vm627_vm0, %v385_v46  ;;  %v405_v39 = vld [vmem:[%s9637_s9 + $0x130] sm:$0xff]  ;;  %v419_v35 = vld [vmem:[%s9637_s9 + $0x1a0] sm:$0xff] }
  0x3d   : > { %8845 = vmatprep.subr.msk.mxu1 %vm627_vm0, %v389_v47  ;;  %8812 = vmatprep.mubr.msk.f32.mxu0 %vm627_vm0, %v573_v48  ;;  %v595_v48 = vmul.f32 0.25, %v335_v44  ;;  %v354_v44 = vld [vmem:[%s9643_s12 + $0x198] sm:$0xff] }
  0x3e   : > { %8826 = vmatprep.mubr.msk.f32.mxu1 %vm627_vm0, %v577_v49  ;;  %8813 = vmatmul.mubr.msk.f32.gmra.mxu0 %vm627_vm0, %v574_v50  ;;  %v599_v49 = vmul.f32 0.25, %v339_v45  ;;  %v399_v50 = vld [vmem:[%s9637_s9 + $0x100] sm:$0xff]  ;;  %v358_v45 = vld [vmem:[%s9643_s12 + $0x1b8] sm:$0xff] }
  0x3f   : > { %8827 = vmatmul.mubr.msk.f32.gmra.mxu1 %vm627_vm0, %v578_v51  ;;  %8832 = vmatpush3.xpose.msk.msra.mxu0 %vm627_vm0, %v385_v46  ;;  %v400_v46 = vld [vmem:[%s9637_s9 + $0x108] sm:$0xff]  ;;  %v403_v51 = vld [vmem:[%s9637_s9 + $0x120] sm:$0xff] }
  0x40   : > { %8846 = vmatpush3.xpose.msk.msra.mxu1 %vm627_vm0, %v389_v47  ;;  %8833 = vmatprep.subr.msk.mxu0 %vm627_vm0, %v384_v54  ;;  %v404_v47 = vld [vmem:[%s9637_s9 + $0x128] sm:$0xff] }
  0x41   : > { %8847 = vmatprep.subr.msk.mxu1 %vm627_vm0, %v388_v55  ;;  %8837 = vmatprep.mubr.msk.f32.mxu0 %vm627_vm0, %v579_v56  ;;  %v596_v56 = vmul.f32 0.25, %v336_v52  ;;  %v359_v52 = vld [vmem:[%s9643_s12 + $0x1c0] sm:$0xff] }
  0x42   : > { %8851 = vmatprep.mubr.msk.f32.mxu1 %vm627_vm0, %v583_v57  ;;  %3269 = vxpose.xlu1.b32.end [4/4] (short) (narrow) %v438_v29, 16  ;;  %v600_v57 = vmul.f32 0.25, %v340_v53  ;;  %v355_v29 = vld [vmem:[%s9643_s12 + $0x1a0] sm:$0xff] }
  0x43   : > { %8834 = vmatpush3.xpose.msk.msra.mxu0 %vm627_vm0, %v384_v54  ;;  %v410_v54 = vld [vmem:[%s9637_s9 + $0x158] sm:$0xff]  ;;  %v363_v53 = vld [vmem:[%s9643_s12 + $0x1e0] sm:$0xff] }
  0x44   : > { %8848 = vmatpush3.xpose.msk.msra.mxu1 %vm627_vm0, %v388_v55  ;;  %8835 = vmatprep.subr.msk.mxu0 %vm627_vm0, %v383_v58  ;;  %v414_v55 = vld [vmem:[%s9637_s9 + $0x178] sm:$0xff] }
  0x45   : > { %8849 = vmatprep.subr.msk.mxu1 %vm627_vm0, %v387_v59 }
  0x47   : > { %8836 = vmatpush3.xpose.msk.msra.mxu0 %vm627_vm0, %v383_v58  ;;  %v337_v58 = vld [vmem:[%s9643_s12 + $0x110] sm:$0xff] }
  0x48   : > { %8850 = vmatpush3.xpose.msk.msra.mxu1 %vm627_vm0, %v387_v59  ;;  %8857 = vmatprep.subr.msk.mxu0 %vm627_vm0, %v394_v0  ;;  %v341_v59 = vld [vmem:[%s9643_s12 + $0x130] sm:$0xff] }
  0x49   : > { %8871 = vmatprep.subr.msk.mxu1 %vm627_vm0, %v398_v1 }
  0x4a   : > { %8838 = vmatmul.mubr.msk.f32.vlgmr.msra.gmra.mxu0 %vm627_vm0, %v580_v3  ;;  %v602_v3 = vmul.f32 0.25, %v342_v61  ;;  %v364_v61 = vld [vmem:[%s9643_s12 + $0x1e8] sm:$0xff] }
  0x4b   : > { %8852 = vmatmul.mubr.msk.f32.vlgmr.msra.gmra.mxu1 %vm627_vm0, %v584_v4  ;;  %8858 = vmatpush3.xpose.msk.msra.mxu0 %vm627_vm0, %v394_v0  ;;  %v597_v0 = vmul.f32 0.25, %v337_v58  ;;  %v343_v4 = vld [vmem:[%s9643_s12 + $0x140] sm:$0xff] }
  0x4c   : > { %8872 = vmatpush3.xpose.msk.msra.mxu1 %vm627_vm0, %v398_v1  ;;  %8859 = vmatprep.subr.msk.mxu0 %vm627_vm0, %v393_v10  ;;  %v601_v1 = vmul.f32 0.25, %v341_v59  ;;  %v603_v8 = vmul.f32 0.25, %v343_v4  ;;  %v423_v58 = vld [vmem:[%s9637_s9 + $0x1c0] sm:$0xff] }
  0x4d   : > { %8873 = vmatprep.subr.msk.mxu1 %vm627_vm0, %v397_v11  ;;  %8840 = vmatprep.mubr.msk.f32.mxu0 %vm627_vm0, %v581_v12  ;;  %v344_v12 = vld [vmem:[%s9643_s12 + $0x148] sm:$0xff]  ;;  %v427_v59 = vld [vmem:[%s9637_s9 + $0x1e0] sm:$0xff] }
  0x4e   : > { %8854 = vmatprep.mubr.msk.f32.mxu1 %vm627_vm0, %v585_v13  ;;  %8841 = vmatmul.mubr.msk.f32.gmra.mxu0 %vm627_vm0, %v582_v14  ;;  %v348_v13 = vld [vmem:[%s9643_s12 + $0x168] sm:$0xff]  ;;  %v418_v14 = vld [vmem:[%s9637_s9 + $0x198] sm:$0xff]  ;;  %v604_v16 = vmul.f32 0.25, %v344_v12 }
  0x4f   : > { %8855 = vmatmul.mubr.msk.f32.gmra.mxu1 %vm627_vm0, %v586_v15  ;;  %8860 = vmatpush3.xpose.msk.msra.mxu0 %vm627_vm0, %v393_v10  ;;  %v407_v10 = vld [vmem:[%s9637_s9 + $0x140] sm:$0xff]  ;;  %v422_v15 = vld [vmem:[%s9637_s9 + $0x1b8] sm:$0xff]  ;;  %v608_v17 = vmul.f32 0.25, %v348_v13 }
  0x50   : > { %8874 = vmatpush3.xpose.msk.msra.mxu1 %vm627_vm0, %v397_v11  ;;  %8861 = vmatprep.subr.msk.mxu0 %vm627_vm0, %v392_v18  ;;  %v411_v11 = vld [vmem:[%s9637_s9 + $0x160] sm:$0xff] }
  0x51   : > { %8875 = vmatprep.subr.msk.mxu1 %vm627_vm0, %v396_v19  ;;  %8865 = vmatprep.mubr.msk.f32.mxu0 %vm627_vm0, %v587_v20  ;;  %v346_v20 = vld [vmem:[%s9643_s12 + $0x158] sm:$0xff] }
  0x52   : > { %8879 = vmatprep.mubr.msk.f32.mxu1 %vm627_vm0, %v591_v21  ;;  %v350_v21 = vld [vmem:[%s9643_s12 + $0x178] sm:$0xff]  ;;  %v606_v26 = vmul.f32 0.25, %v346_v20 }
  0x53   : > { %8862 = vmatpush3.xpose.msk.msra.mxu0 %vm627_vm0, %v392_v18  ;;  %v345_v18 = vld [vmem:[%s9643_s12 + $0x150] sm:$0xff]  ;;  %v610_v27 = vmul.f32 0.25, %v350_v21 }
  0x54   : > { %8876 = vmatpush3.xpose.msk.msra.mxu1 %vm627_vm0, %v396_v19  ;;  %8863 = vmatprep.subr.msk.mxu0 %vm627_vm0, %v391_v24  ;;  %v349_v19 = vld [vmem:[%s9643_s12 + $0x170] sm:$0xff] }
  0x55   : > { %8877 = vmatprep.subr.msk.mxu1 %vm627_vm0, %v395_v25 }
  0x57   : > { %8864 = vmatpush3.xpose.msk.msra.mxu0 %vm627_vm0, %v391_v24  ;;  %v605_v24 = vmul.f32 0.25, %v345_v18 }
  0x58   : > { %8878 = vmatpush3.xpose.msk.msra.mxu1 %vm627_vm0, %v395_v25  ;;  %8885 = vmatprep.subr.msk.mxu0 %vm627_vm0, %v402_v30  ;;  %v609_v25 = vmul.f32 0.25, %v349_v19 }
  0x59   : > { %8899 = vmatprep.subr.msk.mxu1 %vm627_vm0, %v406_v31 }
  0x5a   : > { %8866 = vmatmul.mubr.msk.f32.vlgmr.msra.gmra.mxu0 %vm627_vm0, %v588_v32  ;;  %v611_v32 = vmul.f32 0.25, %v351_v28 }
  0x5b   : > { %8880 = vmatmul.mubr.msk.f32.vlgmr.msra.gmra.mxu1 %vm627_vm0, %v592_v33  ;;  %8886 = vmatpush3.xpose.msk.msra.mxu0 %vm627_vm0, %v402_v30  ;;  %v416_v30 = vld [vmem:[%s9637_s9 + $0x188] sm:$0xff]  ;;  %v615_v33 = vmul.f32 0.25, %v355_v29 }
  0x5c   : > { %8900 = vmatpush3.xpose.msk.msra.mxu1 %vm627_vm0, %v406_v31  ;;  %8887 = vmatprep.subr.msk.mxu0 %vm627_vm0, %v401_v38  ;;  %v420_v31 = vld [vmem:[%s9637_s9 + $0x1a8] sm:$0xff] }
  0x5d   : > { %8901 = vmatprep.subr.msk.mxu1 %vm627_vm0, %v405_v39  ;;  %8868 = vmatprep.mubr.msk.f32.mxu0 %vm627_vm0, %v589_v40  ;;  %v612_v40 = vmul.f32 0.25, %v352_v36 }
  0x5e   : > { %8882 = vmatprep.mubr.msk.f32.mxu1 %vm627_vm0, %v593_v41  ;;  %8869 = vmatmul.mubr.msk.f32.gmra.mxu0 %vm627_vm0, %v590_v42  ;;  %v616_v41 = vmul.f32 0.25, %v356_v37  ;;  %v353_v42 = vld [vmem:[%s9643_s12 + $0x190] sm:$0xff] }
  0x5f   : > { %8883 = vmatmul.mubr.msk.f32.gmra.mxu1 %vm627_vm0, %v594_v43  ;;  %8888 = vmatpush3.xpose.msk.msra.mxu0 %vm627_vm0, %v401_v38  ;;  %v426_v38 = vld [vmem:[%s9637_s9 + $0x1d8] sm:$0xff]  ;;  %v357_v43 = vld [vmem:[%s9643_s12 + $0x1b0] sm:$0xff] }
  0x60   : > { %8902 = vmatpush3.xpose.msk.msra.mxu1 %vm627_vm0, %v405_v39  ;;  %8889 = vmatprep.subr.msk.mxu0 %vm627_vm0, %v400_v46  ;;  %v430_v39 = vld [vmem:[%s9637_s9 + $0x1f8] sm:$0xff] }
  0x61   : > { %8903 = vmatprep.subr.msk.mxu1 %vm627_vm0, %v404_v47  ;;  %8893 = vmatprep.mubr.msk.f32.mxu0 %vm627_vm0, %v595_v48  ;;  %v613_v48 = vmul.f32 0.25, %v353_v42 }
  0x62   : > { %8907 = vmatprep.mubr.msk.f32.mxu1 %vm627_vm0, %v599_v49  ;;  %v617_v49 = vmul.f32 0.25, %v357_v43 }
  0x63   : > { %8890 = vmatpush3.xpose.msk.msra.mxu0 %vm627_vm0, %v400_v46  ;;  %v425_v46 = vld [vmem:[%s9637_s9 + $0x1d0] sm:$0xff] }
  0x64   : > { %8904 = vmatpush3.xpose.msk.msra.mxu1 %vm627_vm0, %v404_v47  ;;  %8891 = vmatprep.subr.msk.mxu0 %vm627_vm0, %v399_v50  ;;  %v429_v47 = vld [vmem:[%s9637_s9 + $0x1f0] sm:$0xff] }
  0x65   : > { %8905 = vmatprep.subr.msk.mxu1 %vm627_vm0, %v403_v51 }
  0x67   : > { %8892 = vmatpush3.xpose.msk.msra.mxu0 %vm627_vm0, %v399_v50  ;;  %v614_v50 = vmul.f32 0.25, %v354_v44 }
  0x68   : > { %8906 = vmatpush3.xpose.msk.msra.mxu1 %vm627_vm0, %v403_v51  ;;  %8913 = vmatprep.subr.msk.mxu0 %vm627_vm0, %v410_v54  ;;  %v618_v51 = vmul.f32 0.25, %v358_v45 }
  0x69   : > { %8927 = vmatprep.subr.msk.mxu1 %vm627_vm0, %v414_v55 }
  0x6a   : > { %8894 = vmatmul.mubr.msk.f32.vlgmr.msra.gmra.mxu0 %vm627_vm0, %v596_v56  ;;  %v619_v56 = vmul.f32 0.25, %v359_v52 }
  0x6b   : > { %8908 = vmatmul.mubr.msk.f32.vlgmr.msra.gmra.mxu1 %vm627_vm0, %v600_v57  ;;  %8914 = vmatpush3.xpose.msk.msra.mxu0 %vm627_vm0, %v410_v54  ;;  %v424_v54 = vld [vmem:[%s9637_s9 + $0x1c8] sm:$0xff]  ;;  %v623_v57 = vmul.f32 0.25, %v363_v53 }
  0x6c   : > { %8928 = vmatpush3.xpose.msk.msra.mxu1 %vm627_vm0, %v414_v55  ;;  %8915 = vmatprep.subr.msk.mxu0 %vm627_vm0, %v409_v62  ;;  %v428_v55 = vld [vmem:[%s9637_s9 + $0x1e8] sm:$0xff] }
  0x6d   : > { %8929 = vmatprep.subr.msk.mxu1 %vm627_vm0, %v413_v63  ;;  %8896 = vmatprep.mubr.msk.f32.mxu0 %vm627_vm0, %v597_v0  ;;  %v620_v0 = vmul.f32 0.25, %v360_v60 }
  0x6e   : > { %8910 = vmatprep.mubr.msk.f32.mxu1 %vm627_vm0, %v601_v1  ;;  %8897 = vmatmul.mubr.msk.f32.gmra.mxu0 %vm627_vm0, %v598_v2  ;;  %v624_v1 = vmul.f32 0.25, %v364_v61 }
  0x6f   : > { %8911 = vmatmul.mubr.msk.f32.gmra.mxu1 %vm627_vm0, %v602_v3  ;;  %8916 = vmatpush3.xpose.msk.msra.mxu0 %vm627_vm0, %v409_v62  ;;  %v365_v62 = vld [vmem:[%s9643_s12 + $0x1f0] sm:$0xff]  ;;  %v366_v3 = vld [vmem:[%s9643_s12 + $0x1f8] sm:$0xff] }
  0x70   : > { %8930 = vmatpush3.xpose.msk.msra.mxu1 %vm627_vm0, %v413_v63  ;;  %8917 = vmatprep.subr.msk.mxu0 %vm627_vm0, %v408_v6  ;;  %v361_v63 = vld [vmem:[%s9643_s12 + $0x1d0] sm:$0xff]  ;;  %v625_v2 = vmul.f32 0.25, %v365_v62  ;;  %s9544_s12 = smov 32  }
  0x71   : > { %8931 = vmatprep.subr.msk.mxu1 %vm627_vm0, %v412_v7  ;;  %8921 = vmatprep.mubr.msk.f32.mxu0 %vm627_vm0, %v603_v8  ;;  %v621_v4 = vmul.f32 0.25, %v361_v63  ;;  %v9982_v8 = vld [vmem:[%s12187_s3 + $0x8] sm:$0xff] }
  0x72   : > { %8935 = vmatprep.mubr.msk.f32.mxu1 %vm627_vm0, %v607_v9 }
  0x73   : > { %8918 = vmatpush3.xpose.msk.msra.mxu0 %vm627_vm0, %v408_v6  ;;  %v626_v6 = vmul.f32 0.25, %v366_v3 }
  0x74   : > { %8932 = vmatpush3.xpose.msk.msra.mxu1 %vm627_vm0, %v412_v7  ;;  %8919 = vmatprep.subr.msk.mxu0 %vm627_vm0, %v407_v10  ;;  %v622_v7 = vmul.f32 0.25, %v362_v5 }
  0x75   : > { %8933 = vmatprep.subr.msk.mxu1 %vm627_vm0, %v411_v11 }
  0x77   : > { %8920 = vmatpush3.xpose.msk.msra.mxu0 %vm627_vm0, %v407_v10 }
  0x78   : > { %8934 = vmatpush3.xpose.msk.msra.mxu1 %vm627_vm0, %v411_v11  ;;  %8941 = vmatprep.subr.msk.mxu0 %vm627_vm0, %v418_v14  ;;  %v9987_v11 = vld [vmem:[%s12187_s3] sm:$0xff] }
  0x79   : > { %8955 = vmatprep.subr.msk.mxu1 %vm627_vm0, %v422_v15 }
  0x7a   : > { %8922 = vmatmul.mubr.msk.f32.vlgmr.msra.gmra.mxu0 %vm627_vm0, %v604_v16  ;;  %v9998_v16 = vld [vmem:[%s12187_s3 + $0x18] sm:$0xff] }
  0x7b   : > { %8936 = vmatmul.mubr.msk.f32.vlgmr.msra.gmra.mxu1 %vm627_vm0, %v608_v17  ;;  %8942 = vmatpush3.xpose.msk.msra.mxu0 %vm627_vm0, %v418_v14 }
  0x7c   : > { %8956 = vmatpush3.xpose.msk.msra.mxu1 %vm627_vm0, %v422_v15  ;;  %8943 = vmatprep.subr.msk.mxu0 %vm627_vm0, %v417_v22 }
  0x7d   : > { %8957 = vmatprep.subr.msk.mxu1 %vm627_vm0, %v421_v23  ;;  %8924 = vmatprep.mubr.msk.f32.mxu0 %vm627_vm0, %v605_v24 }
  0x7e   : > { %8938 = vmatprep.mubr.msk.f32.mxu1 %vm627_vm0, %v609_v25  ;;  %8925 = vmatmul.mubr.msk.f32.gmra.mxu0 %vm627_vm0, %v606_v26 }
  0x7f   : > { %8939 = vmatmul.mubr.msk.f32.gmra.mxu1 %vm627_vm0, %v610_v27  ;;  %8944 = vmatpush3.xpose.msk.msra.mxu0 %vm627_vm0, %v417_v22 }
  0x80   : > { %8958 = vmatpush3.xpose.msk.msra.mxu1 %vm627_vm0, %v421_v23  ;;  %8945 = vmatprep.subr.msk.mxu0 %vm627_vm0, %v416_v30 }
  0x81   : > { %8959 = vmatprep.subr.msk.mxu1 %vm627_vm0, %v420_v31  ;;  %8949 = vmatprep.mubr.msk.f32.mxu0 %vm627_vm0, %v611_v32 }
  0x82   : > { %8963 = vmatprep.mubr.msk.f32.mxu1 %vm627_vm0, %v615_v33 }
  0x83   : > { %8946 = vmatpush3.xpose.msk.msra.mxu0 %vm627_vm0, %v416_v30  ;;  %v10025_v30 = vld [vmem:[%s12187_s3 + $0x10] sm:$0xff] }
  0x84   : > { %8960 = vmatpush3.xpose.msk.msra.mxu1 %vm627_vm0, %v420_v31  ;;  %8947 = vmatprep.subr.msk.mxu0 %vm627_vm0, %v415_v34 }
  0x85   : > { %8961 = vmatprep.subr.msk.mxu1 %vm627_vm0, %v419_v35 }
  0x87   : > { %8948 = vmatpush3.xpose.msk.msra.mxu0 %vm627_vm0, %v415_v34 }
  0x88   : > { %8962 = vmatpush3.xpose.msk.msra.mxu1 %vm627_vm0, %v419_v35  ;;  %8969 = vmatprep.subr.msk.mxu0 %vm627_vm0, %v426_v38 }
  0x89   : > { %8983 = vmatprep.subr.msk.mxu1 %vm627_vm0, %v430_v39 }
  0x8a   : > { %8950 = vmatmul.mubr.msk.f32.vlgmr.msra.gmra.mxu0 %vm627_vm0, %v612_v40 }
  0x8b   : > { %8964 = vmatmul.mubr.msk.f32.vlgmr.msra.gmra.mxu1 %vm627_vm0, %v616_v41  ;;  %8970 = vmatpush3.xpose.msk.msra.mxu0 %vm627_vm0, %v426_v38 }
  0x8c   : > { %8984 = vmatpush3.xpose.msk.msra.mxu1 %vm627_vm0, %v430_v39  ;;  %8971 = vmatprep.subr.msk.mxu0 %vm627_vm0, %v425_v46 }
  0x8d   : > { %8985 = vmatprep.subr.msk.mxu1 %vm627_vm0, %v429_v47  ;;  %8952 = vmatprep.mubr.msk.f32.mxu0 %vm627_vm0, %v613_v48 }
  0x8e   : > { %8966 = vmatprep.mubr.msk.f32.mxu1 %vm627_vm0, %v617_v49  ;;  %8953 = vmatmul.mubr.msk.f32.gmra.mxu0 %vm627_vm0, %v614_v50 }
  0x8f   : > { %8967 = vmatmul.mubr.msk.f32.gmra.mxu1 %vm627_vm0, %v618_v51  ;;  %8972 = vmatpush3.xpose.msk.msra.mxu0 %vm627_vm0, %v425_v46 }
  0x90   : > { %8986 = vmatpush3.xpose.msk.msra.mxu1 %vm627_vm0, %v429_v47  ;;  %8973 = vmatprep.subr.msk.mxu0 %vm627_vm0, %v424_v54 }
  0x91   : > { %8987 = vmatprep.subr.msk.mxu1 %vm627_vm0, %v428_v55  ;;  %8977 = vmatprep.mubr.msk.f32.mxu0 %vm627_vm0, %v619_v56 }
  0x92   : > { %8991 = vmatprep.mubr.msk.f32.mxu1 %vm627_vm0, %v623_v57 }
  0x93   : > { %8974 = vmatpush3.xpose.msk.msra.mxu0 %vm627_vm0, %v424_v54 }
  0x94   : > { %8988 = vmatpush3.xpose.msk.msra.mxu1 %vm627_vm0, %v428_v55  ;;  %8975 = vmatprep.subr.msk.mxu0 %vm627_vm0, %v423_v58 }
  0x95   : > { %8989 = vmatprep.subr.msk.mxu1 %vm627_vm0, %v427_v59 }
  0x97   : > { %8976 = vmatpush3.xpose.msk.msra.mxu0 %vm627_vm0, %v423_v58 }
  0x98   : > { %8990 = vmatpush3.xpose.msk.msra.mxu1 %vm627_vm0, %v427_v59 }
  0x9a   : > { %8978 = vmatmul.mubr.msk.f32.vlgmr.msra.gmra.mxu0 %vm627_vm0, %v620_v0 }
  0x9b   : > { %8992 = vmatmul.mubr.msk.f32.vlgmr.msra.gmra.mxu1 %vm627_vm0, %v624_v1  ;;  %8980 = vmatprep.mubr.msk.f32.mxu0 %vm627_vm0, %v621_v4 }
  0x9c   : > { %8994 = vmatprep.mubr.msk.f32.mxu1 %vm627_vm0, %v625_v2 }
  0x9e   : > { %8981 = vmatmul.mubr.msk.f32.gmra.mxu0 %vm627_vm0, %v622_v7 }
  0x9f   : > { %8995 = vmatmul.mubr.msk.f32.gmra.mxu1 %vm627_vm0, %v626_v6 }
  0xaa   : > { %v3157_v21 = vpop.trf.xlu0 }
  0xab   : > { %9005 = vmatprep.mubr.msk.f32.mxu0 %vm2372_vm1, %v3157_v21 }
  0xb2   : > { %v3282_v20 = vpop.trf.xlu1 }
  0xb3   : > { %9016 = vmatprep.mubr.msk.f32.mxu1 %vm2372_vm1, %v3282_v20 }
  0xea   : > { %v8783_v9 = vpop.f32.mrf.mxu0 }
  0xeb   : > { %v8797_v10 = vpop.f32.mrf.mxu1  ;;  %v9990_v12 = vadd.f32 %v8783_v9, %v9982_v8 }
  0xec   : > { %v9993_v13 = vadd.f32 %v8797_v10, %v9982_v8  ;;  %v718_v14 = vpop.f32.mrf.mxu0 }
  0xed   : > { %v827_v15 = vpop.f32.mrf.mxu1  ;;  %v10001_v17 = vadd.f32 %v718_v14, %v9987_v11  ;;  %v2376_v19 = vsel %vm2372_vm1, %v9990_v12, -inf }
  0xee   : > { %v2388_v18 = vsel %vm2372_vm1, %v9993_v13, -inf  ;;  %2377 = vmax.xlane.f32.xlu0 %v2376_v19  ;;  %v8786_v22 = vpop.f32.mrf.mxu0  ;;  %v10016_v26 = vadd.f32 %v827_v15, %v9987_v11 }
  0xef   : > { %2389 = vmax.xlane.f32.xlu1 %v2388_v18  ;;  %v8800_v23 = vpop.f32.mrf.mxu1  ;;  %v10008_v24 = vadd.f32 %v8786_v22, %v9998_v16  ;;  %v2373_v28 = vsel %vm2372_vm1, %v10001_v17, -inf }
  0xf0   : > { %v10011_v25 = vadd.f32 %v8800_v23, %v9998_v16  ;;  %v728_v29 = vpop.f32.mrf.mxu0  ;;  %v2385_v35 = vsel %vm2372_vm1, %v10016_v26, -inf }
  0xf1   : > { %v2382_v27 = vsel %vm2372_vm1, %v10008_v24, -inf  ;;  %v837_v31 = vpop.f32.mrf.mxu1  ;;  %v10030_v33 = vadd.f32 %v728_v29, %v10025_v30 }
  0xf2   : > { %2374 = vmax.xlane.f32.xlu0 %v2373_v28  ;;  %v2394_v32 = vsel %vm2372_vm1, %v10011_v25, -inf  ;;  %v10033_v34 = vadd.f32 %v837_v31, %v10025_v30 }
  0xf3   : > { %2383 = vmax.xlane.f32.xlu1 %v2382_v27  ;;  %v2379_v36 = vsel %vm2372_vm1, %v10030_v33, -inf }
  0xf4   : > { %v2391_v37 = vsel %vm2372_vm1, %v10033_v34, -inf }
  0xf6   : > { %2386 = vmax.xlane.f32.xlu0 %v2385_v35 }
  0xf7   : > { %2395 = vmax.xlane.f32.xlu1 %v2394_v32 }
  0xfa   : > { %v8811_v38 = vpop.f32.mrf.mxu0  ;;  %2392 = vmax.xlane.f32.xlu0 %v2391_v37 }
  0xfb   : > { %2380 = vmax.xlane.f32.xlu1 %v2379_v36  ;;  %v8825_v39 = vpop.f32.mrf.mxu1  ;;  %v10042_v40 = vadd.f32 %v8811_v38, %v9982_v8 }
  0xfc   : > { %v10045_v41 = vadd.f32 %v8825_v39, %v9982_v8  ;;  %v936_v42 = vpop.f32.mrf.mxu0 }
  0xfd   : > { %v1045_v43 = vpop.f32.mrf.mxu1  ;;  %v10048_v44 = vadd.f32 %v936_v42, %v9987_v11  ;;  %v2400_v45 = vsel %vm2372_vm1, %v10042_v40, -inf }
  0xfe   : > { %v8814_v46 = vpop.f32.mrf.mxu0  ;;  %v10053_v47 = vadd.f32 %v1045_v43, %v9987_v11  ;;  %v2412_v50 = vsel %vm2372_vm1, %v10045_v41, -inf }
  0xff   : > { %2401 = vmax.xlane.f32.xlu1 %v2400_v45  ;;  %v10056_v48 = vadd.f32 %v8814_v46, %v9998_v16  ;;  %v2397_v49 = vsel %vm2372_vm1, %v10048_v44, -inf  ;;  %v8828_v52 = vpop.f32.mrf.mxu1 }
 0x100   : > { %2398 = vmax.xlane.f32.xlu0 %v2397_v49  ;;  %v946_v51 = vpop.f32.mrf.mxu0  ;;  %v10066_v54 = vadd.f32 %v8828_v52, %v9998_v16  ;;  %v2409_v55 = vsel %vm2372_vm1, %v10053_v47, -inf }
 0x101   : > { %v10063_v53 = vadd.f32 %v946_v51, %v10025_v30  ;;  %v2406_v56 = vsel %vm2372_vm1, %v10056_v48, -inf  ;;  %v1055_v57 = vpop.f32.mrf.mxu1 }
 0x102   : > { %v10073_v58 = vadd.f32 %v1055_v57, %v10025_v30  ;;  %v2418_v60 = vsel %vm2372_vm1, %v10066_v54, -inf }
 0x103   : > { %2413 = vmax.xlane.f32.xlu1 %v2412_v50  ;;  %v2403_v59 = vsel %vm2372_vm1, %v10063_v53, -inf }
 0x104   : > { %2410 = vmax.xlane.f32.xlu0 %v2409_v55  ;;  %v2415_v1 = vsel %vm2372_vm1, %v10073_v58, -inf }
 0x107   : > { %2407 = vmax.xlane.f32.xlu1 %v2406_v56 }
 0x108   : > { %2404 = vmax.xlane.f32.xlu0 %v2403_v59 }
 0x10a   : > { %v8839_v61 = vpop.f32.mrf.mxu0 }
 0x10b   : > { %2419 = vmax.xlane.f32.xlu1 %v2418_v60  ;;  %v8853_v62 = vpop.f32.mrf.mxu1  ;;  %v10080_v63 = vadd.f32 %v8839_v61, %v9982_v8 }
 0x10c   : > { %v10083_v0 = vadd.f32 %v8853_v62, %v9982_v8  ;;  %v1154_v2 = vpop.f32.mrf.mxu0  ;;  %2416 = vmax.xlane.f32.xlu0 %v2415_v1 }
 0x10d   : > { %v1263_v3 = vpop.f32.mrf.mxu1  ;;  %v10088_v4 = vadd.f32 %v1154_v2, %v9987_v11  ;;  %v2424_v5 = vsel %vm2372_vm1, %v10080_v63, -inf }
 0x10e   : > { %v8842_v6 = vpop.f32.mrf.mxu0  ;;  %v10093_v7 = vadd.f32 %v1263_v3, %v9987_v11  ;;  %v2436_v14 = vsel %vm2372_vm1, %v10083_v0, -inf }
 0x10f   : > { %2425 = vmax.xlane.f32.xlu1 %v2424_v5  ;;  %v10096_v9 = vadd.f32 %v8842_v6, %v9998_v16  ;;  %v2421_v10 = vsel %vm2372_vm1, %v10088_v4, -inf  ;;  %v8856_v18 = vpop.f32.mrf.mxu1 }
 0x110   : > { %2422 = vmax.xlane.f32.xlu0 %v2421_v10  ;;  %v1164_v15 = vpop.f32.mrf.mxu0  ;;  %v10106_v20 = vadd.f32 %v8856_v18, %v9998_v16  ;;  %v2433_v21 = vsel %vm2372_vm1, %v10093_v7, -inf }
 0x111   : > { %v10103_v19 = vadd.f32 %v1164_v15, %v10025_v30  ;;  %v2430_v22 = vsel %vm2372_vm1, %v10096_v9, -inf  ;;  %v1273_v23 = vpop.f32.mrf.mxu1 }
 0x112   : > { %v10113_v27 = vadd.f32 %v1273_v23, %v10025_v30  ;;  %v2442_v29 = vsel %vm2372_vm1, %v10106_v20, -inf }
 0x113   : > { %2437 = vmax.xlane.f32.xlu1 %v2436_v14  ;;  %v2427_v28 = vsel %vm2372_vm1, %v10103_v19, -inf }
 0x114   : > { %2434 = vmax.xlane.f32.xlu0 %v2433_v21  ;;  %v2439_v37 = vsel %vm2372_vm1, %v10113_v27, -inf }
 0x117   : > { %2431 = vmax.xlane.f32.xlu1 %v2430_v22 }
 0x118   : > { %2428 = vmax.xlane.f32.xlu0 %v2427_v28 }
 0x11a   : > { %v8867_v31 = vpop.f32.mrf.mxu0 }
 0x11b   : > { %2443 = vmax.xlane.f32.xlu1 %v2442_v29  ;;  %v8881_v32 = vpop.f32.mrf.mxu1  ;;  %v10120_v35 = vadd.f32 %v8867_v31, %v9982_v8 }
 0x11c   : > { %v10123_v36 = vadd.f32 %v8881_v32, %v9982_v8  ;;  %v1372_v38 = vpop.f32.mrf.mxu0  ;;  %2440 = vmax.xlane.f32.xlu0 %v2439_v37 }
 0x11d   : > { %v1481_v39 = vpop.f32.mrf.mxu1  ;;  %v10128_v42 = vadd.f32 %v1372_v38, %v9987_v11  ;;  %v2448_v43 = vsel %vm2372_vm1, %v10120_v35, -inf }
 0x11e   : > { %v8870_v45 = vpop.f32.mrf.mxu0  ;;  %v10133_v46 = vadd.f32 %v1481_v39, %v9987_v11  ;;  %v2460_v51 = vsel %vm2372_vm1, %v10123_v36, -inf }
 0x11f   : > { %2449 = vmax.xlane.f32.xlu1 %v2448_v43  ;;  %v10136_v49 = vadd.f32 %v8870_v45, %v9998_v16  ;;  %v2445_v50 = vsel %vm2372_vm1, %v10128_v42, -inf  ;;  %v8884_v55 = vpop.f32.mrf.mxu1 }
 0x120   : > { %2446 = vmax.xlane.f32.xlu0 %v2445_v50  ;;  %v1382_v52 = vpop.f32.mrf.mxu0  ;;  %v10146_v57 = vadd.f32 %v8884_v55, %v9998_v16  ;;  %v2457_v59 = vsel %vm2372_vm1, %v10133_v46, -inf }
 0x121   : > { %v10143_v56 = vadd.f32 %v1382_v52, %v10025_v30  ;;  %v2454_v60 = vsel %vm2372_vm1, %v10136_v49, -inf  ;;  %v1491_v61 = vpop.f32.mrf.mxu1 }
 0x122   : > { %v10153_v62 = vadd.f32 %v1491_v61, %v10025_v30  ;;  %v2466_v2 = vsel %vm2372_vm1, %v10146_v57, -inf }
 0x123   : > { %2461 = vmax.xlane.f32.xlu1 %v2460_v51  ;;  %v2451_v1 = vsel %vm2372_vm1, %v10143_v56, -inf }
 0x124   : > { %2458 = vmax.xlane.f32.xlu0 %v2457_v59  ;;  %v2463_v14 = vsel %vm2372_vm1, %v10153_v62, -inf }
 0x127   : > { %2455 = vmax.xlane.f32.xlu1 %v2454_v60 }
 0x128   : > { %2452 = vmax.xlane.f32.xlu0 %v2451_v1 }
 0x12a   : > { %v8895_v3 = vpop.f32.mrf.mxu0 }
 0x12b   : > { %2467 = vmax.xlane.f32.xlu1 %v2466_v2  ;;  %v8909_v5 = vpop.f32.mrf.mxu1  ;;  %v10160_v6 = vadd.f32 %v8895_v3, %v9982_v8 }
 0x12c   : > { %v10163_v10 = vadd.f32 %v8909_v5, %v9982_v8  ;;  %v1590_v15 = vpop.f32.mrf.mxu0  ;;  %2464 = vmax.xlane.f32.xlu0 %v2463_v14 }
 0x12d   : > { %v1699_v18 = vpop.f32.mrf.mxu1  ;;  %v10168_v21 = vadd.f32 %v1590_v15, %v9987_v11  ;;  %v2472_v22 = vsel %vm2372_vm1, %v10160_v6, -inf }
 0x12e   : > { %v8898_v23 = vpop.f32.mrf.mxu0  ;;  %v10173_v28 = vadd.f32 %v1699_v18, %v9987_v11  ;;  %v2484_v32 = vsel %vm2372_vm1, %v10163_v10, -inf }
 0x12f   : > { %2473 = vmax.xlane.f32.xlu1 %v2472_v22  ;;  %v10176_v29 = vadd.f32 %v8898_v23, %v9998_v16  ;;  %v2469_v31 = vsel %vm2372_vm1, %v10168_v21, -inf  ;;  %v8912_v38 = vpop.f32.mrf.mxu1 }
 0x130   : > { %2470 = vmax.xlane.f32.xlu0 %v2469_v31  ;;  %v1600_v37 = vpop.f32.mrf.mxu0  ;;  %v10186_v43 = vadd.f32 %v8912_v38, %v9998_v16  ;;  %v2481_v45 = vsel %vm2372_vm1, %v10173_v28, -inf }
 0x131   : > { %v10183_v39 = vadd.f32 %v1600_v37, %v10025_v30  ;;  %v2478_v50 = vsel %vm2372_vm1, %v10176_v29, -inf  ;;  %v1709_v51 = vpop.f32.mrf.mxu1 }
 0x132   : > { %v10193_v52 = vadd.f32 %v1709_v51, %v10025_v30  ;;  %v2490_v59 = vsel %vm2372_vm1, %v10186_v43, -inf }
 0x133   : > { %2485 = vmax.xlane.f32.xlu1 %v2484_v32  ;;  %v2475_v55 = vsel %vm2372_vm1, %v10183_v39, -inf }
 0x134   : > { %2482 = vmax.xlane.f32.xlu0 %v2481_v45  ;;  %v2487_v3 = vsel %vm2372_vm1, %v10193_v52, -inf }
 0x137   : > { %2479 = vmax.xlane.f32.xlu1 %v2478_v50 }
 0x138   : > { %2476 = vmax.xlane.f32.xlu0 %v2475_v55 }
 0x13a   : > { %v8923_v60 = vpop.f32.mrf.mxu0 }
 0x13b   : > { %2491 = vmax.xlane.f32.xlu1 %v2490_v59  ;;  %v8937_v61 = vpop.f32.mrf.mxu1  ;;  %v10200_v1 = vadd.f32 %v8923_v60, %v9982_v8 }
 0x13c   : > { %v10203_v2 = vadd.f32 %v8937_v61, %v9982_v8  ;;  %v1808_v5 = vpop.f32.mrf.mxu0  ;;  %2488 = vmax.xlane.f32.xlu0 %v2487_v3 }
 0x13d   : > { %v1917_v14 = vpop.f32.mrf.mxu1  ;;  %v10208_v15 = vadd.f32 %v1808_v5, %v9987_v11  ;;  %v2496_v18 = vsel %vm2372_vm1, %v10200_v1, -inf }
 0x13e   : > { %v8926_v22 = vpop.f32.mrf.mxu0  ;;  %v10213_v23 = vadd.f32 %v1917_v14, %v9987_v11  ;;  %v2508_v37 = vsel %vm2372_vm1, %v10203_v2, -inf }
 0x13f   : > { %2497 = vmax.xlane.f32.xlu1 %v2496_v18  ;;  %v10216_v31 = vadd.f32 %v8926_v22, %v9998_v16  ;;  %v2493_v32 = vsel %vm2372_vm1, %v10208_v15, -inf  ;;  %v8940_v45 = vpop.f32.mrf.mxu1 }
 0x140   : > { %2494 = vmax.xlane.f32.xlu0 %v2493_v32  ;;  %v1818_v38 = vpop.f32.mrf.mxu0  ;;  %v10226_v51 = vadd.f32 %v8940_v45, %v9998_v16  ;;  %v2505_v55 = vsel %vm2372_vm1, %v10213_v23, -inf }
 0x141   : > { %v10223_v50 = vadd.f32 %v1818_v38, %v10025_v30  ;;  %v2502_v59 = vsel %vm2372_vm1, %v10216_v31, -inf  ;;  %v1927_v60 = vpop.f32.mrf.mxu1 }
 0x142   : > { %v10233_v61 = vadd.f32 %v1927_v60, %v10025_v30  ;;  %v2514_v5 = vsel %vm2372_vm1, %v10226_v51, -inf }
 0x143   : > { %2509 = vmax.xlane.f32.xlu1 %v2508_v37  ;;  %v2499_v3 = vsel %vm2372_vm1, %v10223_v50, -inf }
 0x144   : > { %2506 = vmax.xlane.f32.xlu0 %v2505_v55  ;;  %v2511_v37 = vsel %vm2372_vm1, %v10233_v61, -inf }
 0x147   : > { %2503 = vmax.xlane.f32.xlu1 %v2502_v59 }
 0x148   : > { %2500 = vmax.xlane.f32.xlu0 %v2499_v3 }
 0x14a   : > { %v8951_v14 = vpop.f32.mrf.mxu0 }
 0x14b   : > { %2515 = vmax.xlane.f32.xlu1 %v2514_v5  ;;  %v8965_v18 = vpop.f32.mrf.mxu1  ;;  %v10240_v22 = vadd.f32 %v8951_v14, %v9982_v8 }
 0x14c   : > { %v10243_v32 = vadd.f32 %v8965_v18, %v9982_v8  ;;  %v2026_v38 = vpop.f32.mrf.mxu0  ;;  %2512 = vmax.xlane.f32.xlu0 %v2511_v37 }
 0x14d   : > { %12258 = vst [vmem:[#allocation5_spill] sm:$0xff] %v10240_v22  ;;  %v2135_v45 = vpop.f32.mrf.mxu1  ;;  %v10248_v55 = vadd.f32 %v2026_v38, %v9987_v11  ;;  %v2520_v59 = vsel %vm2372_vm1, %v10240_v22, -inf }
 0x14e   : > { %12259 = vst [vmem:[#allocation6_spill] sm:$0xff] %v10243_v32  ;;  %v8954_v60 = vpop.f32.mrf.mxu0  ;;  %v10253_v3 = vadd.f32 %v2135_v45, %v9987_v11  ;;  %v2532_v18 = vsel %vm2372_vm1, %v10243_v32, -inf }
 0x14f   : > { %12260 = vst [vmem:[#allocation7_spill] sm:$0xff] %v10248_v55  ;;  %2521 = vmax.xlane.f32.xlu1 %v2520_v59  ;;  %v10256_v5 = vadd.f32 %v8954_v60, %v9998_v16  ;;  %v2517_v14 = vsel %vm2372_vm1, %v10248_v55, -inf  ;;  %v8968_v38 = vpop.f32.mrf.mxu1 }
 0x150   : > { %12261 = vst [vmem:[#allocation8_spill] sm:$0xff] %v10253_v3  ;;  %2518 = vmax.xlane.f32.xlu0 %v2517_v14  ;;  %v2036_v37 = vpop.f32.mrf.mxu0  ;;  %v10266_v59 = vadd.f32 %v8968_v38, %v9998_v16  ;;  %v2529_v45 = vsel %vm2372_vm1, %v10253_v3, -inf }
 0x151   : > { %12262 = vst [vmem:[#allocation9_spill] sm:$0xff] %v10256_v5  ;;  %v10263_v22 = vadd.f32 %v2036_v37, %v10025_v30  ;;  %v2526_v60 = vsel %vm2372_vm1, %v10256_v5, -inf  ;;  %v2145_v55 = vpop.f32.mrf.mxu1 }
 0x152   : > { %12264 = vst [vmem:[#allocation11_spill] sm:$0xff] %v10266_v59  ;;  %v10273_v14 = vadd.f32 %v2145_v55, %v10025_v30  ;;  %v2538_v37 = vsel %vm2372_vm1, %v10266_v59, -inf }
 0x153   : > { %2533 = vmax.xlane.f32.xlu1 %v2532_v18  ;;  %12263 = vst [vmem:[#allocation10_spill] sm:$0xff] %v10263_v22  ;;  %v2523_v18 = vsel %vm2372_vm1, %v10263_v22, -inf }
 0x154   : > { %2530 = vmax.xlane.f32.xlu0 %v2529_v45  ;;  %12265 = vst [vmem:[#allocation12_spill] sm:$0xff] %v10273_v14  ;;  %v2535_v55 = vsel %vm2372_vm1, %v10273_v14, -inf }
 0x157   : > { %2527 = vmax.xlane.f32.xlu1 %v2526_v60 }
 0x158   : > { %2524 = vmax.xlane.f32.xlu0 %v2523_v18 }
 0x15a   : > { %v8979_v38 = vpop.f32.mrf.mxu0 }
 0x15b   : > { %v8993_v32 = vpop.f32.mrf.mxu1  ;;  %2539 = vmax.xlane.f32.xlu1 %v2538_v37  ;;  %v10280_v3 = vadd.f32 %v8979_v38, %v9982_v8 }
 0x15c   : > { %v10283_v45 = vadd.f32 %v8993_v32, %v9982_v8  ;;  %v2244_v60 = vpop.f32.mrf.mxu0  ;;  %2536 = vmax.xlane.f32.xlu0 %v2535_v55 }
 0x15d   : > { %12266 = vst [vmem:[#allocation13_spill] sm:$0xff] %v10280_v3  ;;  %v2353_v5 = vpop.f32.mrf.mxu1  ;;  %v2544_v18 = vsel %vm2372_vm1, %v10280_v3, -inf  ;;  %v10295_v8 = vadd.f32 %v2244_v60, %v9987_v11 }
 0x15e   : > { %v10288_v22 = vadd.f32 %v2353_v5, %v9987_v11  ;;  %v2556_v37 = vsel %vm2372_vm1, %v10283_v45, -inf  ;;  %v8982_v59 = vpop.f32.mrf.mxu0 }
 0x15f   : > { %2545 = vmax.xlane.f32.xlu1 %v2544_v18  ;;  %v8996_v38 = vpop.f32.mrf.mxu1  ;;  %12268 = vst [vmem:[#allocation15_spill] sm:$0xff] %v10295_v8  ;;  %v10303_v55 = vadd.f32 %v8982_v59, %v9998_v16  ;;  %v2541_v18 = vsel %vm2372_vm1, %v10295_v8, -inf }
 0x160   : > { %12267 = vst [vmem:[#allocation14_spill] sm:$0xff] %v10288_v22  ;;  %v10298_v32 = vadd.f32 %v8996_v38, %v9998_v16  ;;  %2557 = vmax.xlane.f32.xlu0 %v2556_v37  ;;  %v2553_v5 = vsel %vm2372_vm1, %v10288_v22, -inf  ;;  %v2254_v14 = vpop.f32.mrf.mxu0 }
 0x161   : > { %12270 = vst [vmem:[#allocation17_spill] sm:$0xff] %v10303_v55  ;;  %v2363_v3 = vpop.f32.mrf.mxu1  ;;  %v10313_v37 = vadd.f32 %v2254_v14, %v10025_v30  ;;  %v2550_v16 = vsel %vm2372_vm1, %v10303_v55, -inf }
 0x162   : > { %12269 = vst [vmem:[#allocation16_spill] sm:$0xff] %v10298_v32  ;;  %v2562_v11 = vsel %vm2372_vm1, %v10298_v32, -inf  ;;  %v10310_v60 = vadd.f32 %v2363_v3, %v10025_v30  ;;  %v10323_v3 = vpop.trf.xlu0 }
 0x163   : > { %2554 = vmax.xlane.f32.xlu1 %v2553_v5  ;;  %12272 = vst [vmem:[#allocation19_spill] sm:$0xff] %v10313_v37  ;;  %v2547_v38 = vsel %vm2372_vm1, %v10313_v37, -inf  ;;  %v10321_v5 = vpop.trf.xlu1  ;;  %12274 = vst [vmem:[#allocation21_spill] sm:$0xff] %v10323_v3 }
 0x164   : > { %2542 = vmax.xlane.f32.xlu0 %v2541_v18  ;;  %12271 = vst [vmem:[#allocation18_spill] sm:$0xff] %v10310_v60  ;;  %v2559_v59 = vsel %vm2372_vm1, %v10310_v60, -inf  ;;  %12273 = vst [vmem:[#allocation20_spill] sm:$0xff] %v10321_v5 }
 0x167   : > { %2563 = vmax.xlane.f32.xlu1 %v2562_v11 }
 0x168   : > { %2551 = vmax.xlane.f32.xlu0 %v2550_v16 }
 0x16b   : > { %2560 = vmax.xlane.f32.xlu1 %v2559_v59 }
 0x16c   : > { %2548 = vmax.xlane.f32.xlu0 %v2547_v38 }
 0x177   : > { %v2378_v30 = vpop.xlane.xlu0 %2377 }
 0x178   : > { %v2390_v18 = vpop.xlane.xlu1 %2389  ;;  %v2566_v55 = vsub.f32 %v9990_v12, %v2378_v30 }
 0x179   : > { %v2570_v14 = vsub.f32 %v9993_v13, %v2390_v18 }
 0x17a   : > { %v2631_v16 = vmul.f32 1.442695, %v2566_v55 }
 0x17b   : > { %v2639_v11 = vmul.f32 1.442695, %v2570_v14  ;;  %v2375_v22 = vpop.xlane.xlu0 %2374 }
 0x17c   : > { %v2384_v32 = vpop.xlane.xlu1 %2383  ;;  %v2565_v59 = vsub.f32 %v10001_v17, %v2375_v22 }
 0x17d   : > { %9223 = vpow2.f32 %v2639_v11  ;;  %v2568_v60 = vsub.f32 %v10008_v24, %v2384_v32 }
 0x17e   : > { %9225 = vpow2.f32 %v2631_v16  ;;  %v2629_v38 = vmul.f32 1.442695, %v2565_v59 }
 0x17f   : > { %v2635_v5 = vmul.f32 1.442695, %v2568_v60  ;;  %v2387_v3 = vpop.xlane.xlu0 %2386 }
 0x180   : > { %v2396_v37 = vpop.xlane.xlu1 %2395  ;;  %v2569_v13 = vsub.f32 %v10016_v26, %v2387_v3  ;;  %9227 = vpow2.f32 %v2629_v38 }
 0x181   : > { %v2572_v8 = vsub.f32 %v10011_v25, %v2396_v37  ;;  %9229 = vpow2.f32 %v2635_v5 }
 0x182   : > { %v2637_v12 = vmul.f32 1.442695, %v2569_v13 }
 0x183   : > { %v2643_v55 = vmul.f32 1.442695, %v2572_v8  ;;  %v2393_v30 = vpop.xlane.xlu0 %2392 }
 0x184   : > { %v2381_v18 = vpop.xlane.xlu1 %2380  ;;  %v2571_v24 = vsub.f32 %v10033_v34, %v2393_v30  ;;  %9231 = vpow2.f32 %v2637_v12 }
 0x185   : > { %v2567_v14 = vsub.f32 %v10030_v33, %v2381_v18  ;;  %9233 = vpow2.f32 %v2643_v55 }
 0x186   : > { %v2641_v22 = vmul.f32 1.442695, %v2571_v24 }
 0x187   : > { %v2633_v17 = vmul.f32 1.442695, %v2567_v14 }
 0x188   : > { %v2402_v32 = vpop.xlane.xlu1 %2401 }
 0x189   : > { %9235 = vpow2.f32 %v2633_v17  ;;  %v2574_v25 = vsub.f32 %v10042_v40, %v2402_v32  ;;  %v2399_v26 = vpop.xlane.xlu0 %2398 }
 0x18a   : > { %v10334_v60 = vpop.eup %9223  ;;  %v2573_v5 = vsub.f32 %v10048_v44, %v2399_v26  ;;  %9237 = vpow2.f32 %v2641_v22 }
 0x18b   : > { %v10336_v37 = vpop.eup %9225  ;;  %v2647_v8 = vmul.f32 1.442695, %v2574_v25  ;;  %v2772_v33 = vsel %vm2372_vm1, %v10334_v60, 0.0 }
 0x18c   : > { %2773 = vadd.xlane.f32.xlu1 %v2772_v33  ;;  %v2414_v34 = vpop.xlane.xlu1 %2413  ;;  %v2760_v3 = vsel %vm2372_vm1, %v10336_v37, 0.0  ;;  %v2645_v11 = vmul.f32 1.442695, %v2573_v5 }
 0x18d   : > { %9239 = vpow2.f32 %v2647_v8  ;;  %v2578_v40 = vsub.f32 %v10045_v41, %v2414_v34  ;;  %2761 = vadd.xlane.f32.xlu0 %v2760_v3  ;;  %v2411_v16 = vpop.xlane.xlu0 %2410  ;;  %v10344_v59 = vpop.eup %9227 }
 0x18e   : > { %v2577_v44 = vsub.f32 %v10053_v47, %v2411_v16  ;;  %9241 = vpow2.f32 %v2645_v11  ;;  %v2757_v12 = vsel %vm2372_vm1, %v10344_v59, 0.0  ;;  %v10349_v55 = vpop.eup %9229 }
 0x18f   : > { %v2655_v38 = vmul.f32 1.442695, %v2578_v40  ;;  %v2766_v22 = vsel %vm2372_vm1, %v10349_v55, 0.0 }
 0x190   : > { %v2408_v13 = vpop.xlane.xlu1 %2407  ;;  %v2653_v18 = vmul.f32 1.442695, %v2577_v44 }
 0x191   : > { %9243 = vpow2.f32 %v2655_v38  ;;  %v2576_v30 = vsub.f32 %v10056_v48, %v2408_v13  ;;  %2758 = vadd.xlane.f32.xlu0 %v2757_v12  ;;  %v2405_v41 = vpop.xlane.xlu0 %2404  ;;  %v10352_v14 = vpop.eup %9231 }
 0x192   : > { %v2575_v17 = vsub.f32 %v10063_v53, %v2405_v41  ;;  %9245 = vpow2.f32 %v2653_v18  ;;  %v2769_v32 = vsel %vm2372_vm1, %v10352_v14, 0.0  ;;  %v10359_v25 = vpop.eup %9233 }
 0x193   : > { %v2651_v24 = vmul.f32 1.442695, %v2576_v30  ;;  %2770 = vadd.xlane.f32.xlu1 %v2769_v32  ;;  %v2778_v11 = vsel %vm2372_vm1, %v10359_v25, 0.0 }
 0x194   : > { %v2420_v47 = vpop.xlane.xlu1 %2419  ;;  %v2649_v26 = vmul.f32 1.442695, %v2575_v17 }
 0x195   : > { %9247 = vpow2.f32 %v2651_v24  ;;  %v2580_v48 = vsub.f32 %v10066_v54, %v2420_v47  ;;  %2767 = vadd.xlane.f32.xlu0 %v2766_v22  ;;  %v2417_v5 = vpop.xlane.xlu0 %2416 }
 0x196   : > { %v10362_v8 = vpop.eup %9235  ;;  %v2579_v33 = vsub.f32 %v10073_v58, %v2417_v5  ;;  %9249 = vpow2.f32 %v2649_v26 }
 0x197   : > { %v2659_v53 = vmul.f32 1.442695, %v2580_v48  ;;  %v2763_v34 = vsel %vm2372_vm1, %v10362_v8, 0.0  ;;  %v10369_v40 = vpop.eup %9237  ;;  %2779 = vadd.xlane.f32.xlu1 %v2778_v11 }
 0x198   : > { %v2426_v3 = vpop.xlane.xlu1 %2425  ;;  %v2657_v54 = vmul.f32 1.442695, %v2579_v33  ;;  %v2775_v30 = vsel %vm2372_vm1, %v10369_v40, 0.0 }
 0x199   : > { %9251 = vpow2.f32 %v2659_v53  ;;  %v2582_v16 = vsub.f32 %v10080_v63, %v2426_v3  ;;  %2764 = vadd.xlane.f32.xlu0 %v2763_v34  ;;  %v2423_v44 = vpop.xlane.xlu0 %2422 }
 0x19a   : > { %v10372_v38 = vpop.eup %9239  ;;  %v2581_v13 = vsub.f32 %v10088_v4, %v2423_v44  ;;  %9253 = vpow2.f32 %v2657_v54 }
 0x19b   : > { %v2663_v58 = vmul.f32 1.442695, %v2582_v16  ;;  %v2784_v12 = vsel %vm2372_vm1, %v10372_v38, 0.0  ;;  %v10379_v41 = vpop.eup %9241  ;;  %2776 = vadd.xlane.f32.xlu1 %v2775_v30 }
 0x19c   : > { %v2438_v18 = vpop.xlane.xlu1 %2437  ;;  %v2661_v63 = vmul.f32 1.442695, %v2581_v13  ;;  %v2781_v48 = vsel %vm2372_vm1, %v10379_v41, 0.0 }
 0x19d   : > { %9255 = vpow2.f32 %v2663_v58  ;;  %v2586_v24 = vsub.f32 %v10083_v0, %v2438_v18  ;;  %2785 = vadd.xlane.f32.xlu0 %v2784_v12  ;;  %v2435_v47 = vpop.xlane.xlu0 %2434 }
 0x19e   : > { %v10382_v17 = vpop.eup %9243  ;;  %v2585_v22 = vsub.f32 %v10093_v7, %v2435_v47  ;;  %9257 = vpow2.f32 %v2661_v63 }
 0x19f   : > { %v2671_v4 = vmul.f32 1.442695, %v2586_v24  ;;  %v2796_v32 = vsel %vm2372_vm1, %v10382_v17, 0.0  ;;  %v10389_v5 = vpop.eup %9245 }
 0x1a0   : > { %v2432_v26 = vpop.xlane.xlu1 %2431  ;;  %v2669_v0 = vmul.f32 1.442695, %v2585_v22  ;;  %2797 = vadd.xlane.f32.xlu1 %v2796_v32  ;;  %v2793_v16 = vsel %vm2372_vm1, %v10389_v5, 0.0 }
 0x1a1   : > { %9259 = vpow2.f32 %v2671_v4  ;;  %v2584_v53 = vsub.f32 %v10096_v9, %v2432_v26  ;;  %2782 = vadd.xlane.f32.xlu0 %v2781_v48  ;;  %v2429_v34 = vpop.xlane.xlu0 %2428 }
 0x1a2   : > { %v10392_v33 = vpop.eup %9247  ;;  %v2583_v7 = vsub.f32 %v10103_v19, %v2429_v34  ;;  %9261 = vpow2.f32 %v2669_v0 }
 0x1a3   : > { %v2790_v3 = vsel %vm2372_vm1, %v10392_v33, 0.0  ;;  %v2667_v11 = vmul.f32 1.442695, %v2584_v53  ;;  %v10399_v44 = vpop.eup %9249 }
 0x1a4   : > { %v2444_v54 = vpop.xlane.xlu1 %2443  ;;  %2794 = vadd.xlane.f32.xlu1 %v2793_v16  ;;  %v2665_v12 = vmul.f32 1.442695, %v2583_v7  ;;  %v2787_v24 = vsel %vm2372_vm1, %v10399_v44, 0.0 }
 0x1a5   : > { %v2588_v9 = vsub.f32 %v10106_v20, %v2444_v54  ;;  %2791 = vadd.xlane.f32.xlu0 %v2790_v3  ;;  %v2441_v13 = vpop.xlane.xlu0 %2440  ;;  %9263 = vpow2.f32 %v2667_v11 }
 0x1a6   : > { %v10402_v58 = vpop.eup %9251  ;;  %v2587_v18 = vsub.f32 %v10113_v27, %v2441_v13 }
 0x1a7   : > { %v2675_v19 = vmul.f32 1.442695, %v2588_v9  ;;  %v2802_v30 = vsel %vm2372_vm1, %v10402_v58, 0.0  ;;  %v10409_v47 = vpop.eup %9253 }
 0x1a8   : > { %v2450_v63 = vpop.xlane.xlu1 %2449  ;;  %v2673_v20 = vmul.f32 1.442695, %v2587_v18  ;;  %2803 = vadd.xlane.f32.xlu1 %v2802_v30  ;;  %v2799_v53 = vsel %vm2372_vm1, %v10409_v47, 0.0 }
 0x1a9   : > { %9265 = vpow2.f32 %v2675_v19  ;;  %v2590_v4 = vsub.f32 %v10120_v35, %v2450_v63  ;;  %2788 = vadd.xlane.f32.xlu0 %v2787_v24  ;;  %v2447_v32 = vpop.xlane.xlu0 %2446 }
 0x1aa   : > { %v10412_v22 = vpop.eup %9255  ;;  %9267 = vpow2.f32 %v2665_v12  ;;  %v2589_v26 = vsub.f32 %v10128_v42, %v2447_v32 }
 0x1ab   : > { %v2679_v27 = vmul.f32 1.442695, %v2590_v4  ;;  %v2808_v48 = vsel %vm2372_vm1, %v10412_v22, 0.0  ;;  %9269 = vpow2.f32 %v2673_v20  ;;  %v10419_v34 = vpop.eup %9257 }
 0x1ac   : > { %v2462_v0 = vpop.xlane.xlu1 %2461  ;;  %2800 = vadd.xlane.f32.xlu1 %v2799_v53  ;;  %v2677_v11 = vmul.f32 1.442695, %v2589_v26  ;;  %v2805_v13 = vsel %vm2372_vm1, %v10419_v34, 0.0 }
 0x1ad   : > { %v2594_v35 = vsub.f32 %v10123_v36, %v2462_v0  ;;  %2809 = vadd.xlane.f32.xlu0 %v2808_v48  ;;  %9271 = vpow2.f32 %v2679_v27  ;;  %v2459_v3 = vpop.xlane.xlu0 %2458 }
 0x1ae   : > { %v10422_v7 = vpop.eup %9259  ;;  %v2593_v54 = vsub.f32 %v10133_v46, %v2459_v3 }
 0x1af   : > { %v2687_v42 = vmul.f32 1.442695, %v2594_v35  ;;  %v2820_v16 = vsel %vm2372_vm1, %v10422_v7, 0.0  ;;  %v10429_v12 = vpop.eup %9261 }
 0x1b0   : > { %v2456_v9 = vpop.xlane.xlu1 %2455  ;;  %v2685_v36 = vmul.f32 1.442695, %v2593_v54  ;;  %2821 = vadd.xlane.f32.xlu1 %v2820_v16  ;;  %v2817_v24 = vsel %vm2372_vm1, %v10429_v12, 0.0 }
 0x1b1   : > { %9273 = vpow2.f32 %v2687_v42  ;;  %v2592_v19 = vsub.f32 %v10136_v49, %v2456_v9  ;;  %2806 = vadd.xlane.f32.xlu0 %v2805_v13  ;;  %v2453_v18 = vpop.xlane.xlu0 %2452 }
 0x1b2   : > { %9275 = vpow2.f32 %v2677_v11  ;;  %v2591_v46 = vsub.f32 %v10143_v56, %v2453_v18  ;;  %v10435_v20 = vpop.eup %9263 }
 0x1b3   : > { %v2683_v30 = vmul.f32 1.442695, %v2592_v19  ;;  %9277 = vpow2.f32 %v2685_v36  ;;  %v2814_v35 = vsel %vm2372_vm1, %v10435_v20, 0.0 }
 0x1b4   : > { %v2468_v63 = vpop.xlane.xlu1 %2467  ;;  %2818 = vadd.xlane.f32.xlu1 %v2817_v24  ;;  %v2681_v27 = vmul.f32 1.442695, %v2591_v46 }
 0x1b5   : > { %v2596_v4 = vsub.f32 %v10146_v57, %v2468_v63  ;;  %9279 = vpow2.f32 %v2683_v30  ;;  %v2465_v49 = vpop.xlane.xlu0 %2464 }
 0x1b6   : > { %v10438_v32 = vpop.eup %9265  ;;  %v2595_v48 = vsub.f32 %v10153_v62, %v2465_v49 }
 0x1b7   : > { %v2691_v26 = vmul.f32 1.442695, %v2596_v4  ;;  %v2826_v56 = vsel %vm2372_vm1, %v10438_v32, 0.0  ;;  %v10443_v0 = vpop.eup %9267 }
 0x1b8   : > { %v2474_v53 = vpop.xlane.xlu1 %2473  ;;  %2827 = vadd.xlane.f32.xlu0 %v2826_v56  ;;  %v10447_v57 = vpop.eup %9269  ;;  %v2689_v3 = vmul.f32 1.442695, %v2595_v48  ;;  %2815 = vadd.xlane.f32.xlu1 %v2814_v35  ;;  %v2811_v9 = vsel %vm2372_vm1, %v10443_v0, 0.0 }
 0x1b9   : > { %9281 = vpow2.f32 %v2691_v26  ;;  %v2598_v11 = vsub.f32 %v10160_v6, %v2474_v53  ;;  %v2471_v42 = vpop.xlane.xlu0 %2470  ;;  %v2823_v36 = vsel %vm2372_vm1, %v10447_v57, 0.0 }
 0x1ba   : > { %v10450_v54 = vpop.eup %9271  ;;  %9283 = vpow2.f32 %v2681_v27  ;;  %v2597_v16 = vsub.f32 %v10168_v21, %v2471_v42 }
 0x1bb   : > { %v2695_v62 = vmul.f32 1.442695, %v2598_v11  ;;  %9285 = vpow2.f32 %v2689_v3  ;;  %v2832_v30 = vsel %vm2372_vm1, %v10450_v54, 0.0 }
 0x1bc   : > { %v2486_v13 = vpop.xlane.xlu1 %2485  ;;  %2812 = vadd.xlane.f32.xlu0 %v2811_v9  ;;  %2824 = vadd.xlane.f32.xlu1 %v2823_v36  ;;  %v2693_v21 = vmul.f32 1.442695, %v2597_v16 }
 0x1bd   : > { %v2602_v19 = vsub.f32 %v10163_v10, %v2486_v13  ;;  %9287 = vpow2.f32 %v2695_v62  ;;  %v2483_v18 = vpop.xlane.xlu0 %2482 }
 0x1be   : > { %v10458_v6 = vpop.eup %9273  ;;  %v2601_v63 = vsub.f32 %v10173_v28, %v2483_v18 }
 0x1bf   : > { %v2703_v46 = vmul.f32 1.442695, %v2602_v19  ;;  %v2844_v24 = vsel %vm2372_vm1, %v10458_v6, 0.0  ;;  %v10465_v4 = vpop.eup %9275 }
 0x1c0   : > { %v2480_v49 = vpop.xlane.xlu1 %2479  ;;  %2833 = vadd.xlane.f32.xlu0 %v2832_v30  ;;  %v10467_v10 = vpop.eup %9277  ;;  %v2701_v27 = vmul.f32 1.442695, %v2601_v63  ;;  %2845 = vadd.xlane.f32.xlu1 %v2844_v24  ;;  %v2829_v35 = vsel %vm2372_vm1, %v10465_v4, 0.0 }
 0x1c1   : > { %9289 = vpow2.f32 %v2703_v46  ;;  %v2600_v26 = vsub.f32 %v10176_v29, %v2480_v49  ;;  %v2477_v48 = vpop.xlane.xlu0 %2476  ;;  %v2841_v11 = vsel %vm2372_vm1, %v10467_v10, 0.0 }
 0x1c2   : > { %v10470_v56 = vpop.eup %9279  ;;  %9291 = vpow2.f32 %v2693_v21  ;;  %v2599_v28 = vsub.f32 %v10183_v39, %v2477_v48 }
 0x1c3   : > { %v2699_v53 = vmul.f32 1.442695, %v2600_v26  ;;  %9293 = vpow2.f32 %v2701_v27  ;;  %v2838_v16 = vsel %vm2372_vm1, %v10470_v56, 0.0 }
 0x1c4   : > { %v2492_v3 = vpop.xlane.xlu1 %2491  ;;  %2830 = vadd.xlane.f32.xlu0 %v2829_v35  ;;  %2842 = vadd.xlane.f32.xlu1 %v2841_v11  ;;  %v2697_v39 = vmul.f32 1.442695, %v2599_v28 }
 0x1c5   : > { %v2604_v42 = vsub.f32 %v10186_v43, %v2492_v3  ;;  %9295 = vpow2.f32 %v2699_v53  ;;  %v2489_v62 = vpop.xlane.xlu0 %2488 }
 0x1c6   : > { %v10478_v29 = vpop.eup %9281  ;;  %v2603_v13 = vsub.f32 %v10193_v52, %v2489_v62 }
 0x1c7   : > { %v2707_v9 = vmul.f32 1.442695, %v2604_v42  ;;  %v2850_v36 = vsel %vm2372_vm1, %v10478_v29, 0.0  ;;  %v10485_v19 = vpop.eup %9283 }
 0x1c8   : > { %v2498_v18 = vpop.xlane.xlu1 %2497  ;;  %2839 = vadd.xlane.f32.xlu0 %v2838_v16  ;;  %v10487_v43 = vpop.eup %9285  ;;  %v2705_v30 = vmul.f32 1.442695, %v2603_v13  ;;  %2851 = vadd.xlane.f32.xlu1 %v2850_v36  ;;  %v2835_v49 = vsel %vm2372_vm1, %v10485_v19, 0.0 }
 0x1c9   : > { %9297 = vpow2.f32 %v2707_v9  ;;  %v2606_v21 = vsub.f32 %v10200_v1, %v2498_v18  ;;  %v2495_v46 = vpop.xlane.xlu0 %2494  ;;  %v2847_v26 = vsel %vm2372_vm1, %v10487_v43, 0.0 }
 0x1ca   : > { %v10490_v63 = vpop.eup %9287  ;;  %9299 = vpow2.f32 %v2697_v39  ;;  %v2605_v52 = vsub.f32 %v10208_v15, %v2495_v46 }
 0x1cb   : > { %v2711_v24 = vmul.f32 1.442695, %v2606_v21  ;;  %9301 = vpow2.f32 %v2705_v30  ;;  %v2856_v28 = vsel %vm2372_vm1, %v10490_v63, 0.0 }
 0x1cc   : > { %v2510_v27 = vpop.xlane.xlu1 %2509  ;;  %2836 = vadd.xlane.f32.xlu0 %v2835_v49  ;;  %2848 = vadd.xlane.f32.xlu1 %v2847_v26  ;;  %v2709_v15 = vmul.f32 1.442695, %v2605_v52 }
 0x1cd   : > { %v2610_v48 = vsub.f32 %v10203_v2, %v2510_v27  ;;  %9303 = vpow2.f32 %v2711_v24  ;;  %v2507_v53 = vpop.xlane.xlu0 %2506 }
 0x1ce   : > { %v10498_v1 = vpop.eup %9289  ;;  %v2609_v3 = vsub.f32 %v10213_v23, %v2507_v53 }
 0x1cf   : > { %v2719_v35 = vmul.f32 1.442695, %v2610_v48  ;;  %v2868_v11 = vsel %vm2372_vm1, %v10498_v1, 0.0  ;;  %v10505_v42 = vpop.eup %9291 }
 0x1d0   : > { %v2504_v62 = vpop.xlane.xlu1 %2503  ;;  %2857 = vadd.xlane.f32.xlu0 %v2856_v28  ;;  %v10507_v2 = vpop.eup %9293  ;;  %v2717_v16 = vmul.f32 1.442695, %v2609_v3  ;;  %2869 = vadd.xlane.f32.xlu1 %v2868_v11  ;;  %v2853_v18 = vsel %vm2372_vm1, %v10505_v42, 0.0 }
 0x1d1   : > { %12275 = vst [vmem:[#allocation22_spill] sm:$0xff] %v10507_v2  ;;  %9305 = vpow2.f32 %v2719_v35  ;;  %v2608_v39 = vsub.f32 %v10216_v31, %v2504_v62  ;;  %v2501_v9 = vpop.xlane.xlu0 %2500  ;;  %v2865_v21 = vsel %vm2372_vm1, %v10507_v2, 0.0 }
 0x1d2   : > { %v10510_v13 = vpop.eup %9295  ;;  %9307 = vpow2.f32 %v2709_v15  ;;  %v2607_v23 = vsub.f32 %v10223_v50, %v2501_v9  ;;  %v12276_v15 = vld [vmem:[#allocation5_spill] sm:$0xff] }
 0x1d3   : > { %v2715_v36 = vmul.f32 1.442695, %v2608_v39  ;;  %9309 = vpow2.f32 %v2717_v16  ;;  %v2862_v52 = vsel %vm2372_vm1, %v10510_v13, 0.0 }
 0x1d4   : > { %v2516_v30 = vpop.xlane.xlu1 %2515  ;;  %2854 = vadd.xlane.f32.xlu0 %v2853_v18  ;;  %2866 = vadd.xlane.f32.xlu1 %v2865_v21  ;;  %v2713_v50 = vmul.f32 1.442695, %v2607_v23  ;;  %v12279_v23 = vld [vmem:[#allocation6_spill] sm:$0xff] }
 0x1d5   : > { %v2612_v46 = vsub.f32 %v10226_v51, %v2516_v30  ;;  %9311 = vpow2.f32 %v2715_v36  ;;  %v2513_v24 = vpop.xlane.xlu0 %2512 }
 0x1d6   : > { %v10518_v31 = vpop.eup %9297  ;;  %v2611_v27 = vsub.f32 %v10233_v61, %v2513_v24  ;;  %v12278_v61 = vld [vmem:[#allocation7_spill] sm:$0xff] }
 0x1d7   : > { %v2723_v49 = vmul.f32 1.442695, %v2612_v46  ;;  %v2874_v26 = vsel %vm2372_vm1, %v10518_v31, 0.0  ;;  %v10525_v48 = vpop.eup %9299 }
 0x1d8   : > { %v2522_v53 = vpop.xlane.xlu1 %2521  ;;  %2863 = vadd.xlane.f32.xlu0 %v2862_v52  ;;  %v10527_v51 = vpop.eup %9301  ;;  %v2721_v28 = vmul.f32 1.442695, %v2611_v27  ;;  %2875 = vadd.xlane.f32.xlu1 %v2874_v26  ;;  %v2859_v39 = vsel %vm2372_vm1, %v10525_v48, 0.0 }
 0x1d9   : > { %9313 = vpow2.f32 %v2723_v49  ;;  %v2614_v35 = vsub.f32 %v12276_v15, %v2522_v53  ;;  %v2519_v3 = vpop.xlane.xlu0 %2518  ;;  %v2871_v36 = vsel %vm2372_vm1, %v10527_v51, 0.0 }
 0x1da   : > { %v10530_v11 = vpop.eup %9303  ;;  %9315 = vpow2.f32 %v2713_v50  ;;  %v2613_v16 = vsub.f32 %v12278_v61, %v2519_v3  ;;  %v12281_v50 = vld [vmem:[#allocation8_spill] sm:$0xff] }
 0x1db   : > { %12277 = vst [vmem:[#allocation5_spill] sm:$0xff] %v10530_v11  ;;  %v2727_v62 = vmul.f32 1.442695, %v2614_v35  ;;  %9317 = vpow2.f32 %v2721_v28  ;;  %v2880_v46 = vsel %vm2372_vm1, %v10530_v11, 0.0  ;;  %v12284_v35 = vld [vmem:[#allocation9_spill] sm:$0xff] }
 0x1dc   : > { %v2534_v9 = vpop.xlane.xlu1 %2533  ;;  %2860 = vadd.xlane.f32.xlu0 %v2859_v39  ;;  %2872 = vadd.xlane.f32.xlu1 %v2871_v36  ;;  %v2725_v24 = vmul.f32 1.442695, %v2613_v16  ;;  %v12286_v39 = vld [vmem:[#allocation10_spill] sm:$0xff] }
 0x1dd   : > { %v2618_v18 = vsub.f32 %v12279_v23, %v2534_v9  ;;  %9319 = vpow2.f32 %v2727_v62  ;;  %v2531_v21 = vpop.xlane.xlu0 %2530 }
 0x1de   : > { %v10538_v30 = vpop.eup %9305  ;;  %v2617_v49 = vsub.f32 %v12281_v50, %v2531_v21  ;;  %v12287_v21 = vld [vmem:[#allocation11_spill] sm:$0xff] }
 0x1df   : > { %12280 = vst [vmem:[#allocation7_spill] sm:$0xff] %v10538_v30  ;;  %v2735_v52 = vmul.f32 1.442695, %v2618_v18  ;;  %v2892_v27 = vsel %vm2372_vm1, %v10538_v30, 0.0  ;;  %v10545_v26 = vpop.eup %9307  ;;  %v12301_v30 = vld [vmem:[#allocation17_spill] sm:$0xff] }
 0x1e0   : > { %12282 = vst [vmem:[#allocation6_spill] sm:$0xff] %v10545_v26  ;;  %v2528_v53 = vpop.xlane.xlu1 %2527  ;;  %2881 = vadd.xlane.f32.xlu0 %v2880_v46  ;;  %v10547_v28 = vpop.eup %9309  ;;  %v2733_v15 = vmul.f32 1.442695, %v2617_v49  ;;  %2893 = vadd.xlane.f32.xlu1 %v2892_v27  ;;  %v2877_v36 = vsel %vm2372_vm1, %v10545_v26, 0.0 }
 0x1e1   : > { %12283 = vst [vmem:[#allocation8_spill] sm:$0xff] %v10547_v28  ;;  %9321 = vpow2.f32 %v2735_v52  ;;  %v2616_v3 = vsub.f32 %v12284_v35, %v2528_v53  ;;  %v2525_v62 = vpop.xlane.xlu0 %2524  ;;  %v2889_v18 = vsel %vm2372_vm1, %v10547_v28, 0.0  ;;  %v12289_v53 = vld [vmem:[#allocation12_spill] sm:$0xff] }
 0x1e2   : > { %v10550_v61 = vpop.eup %9311  ;;  %9323 = vpow2.f32 %v2725_v24  ;;  %v2615_v9 = vsub.f32 %v12286_v39, %v2525_v62  ;;  %v12299_v28 = vld [vmem:[#allocation16_spill] sm:$0xff] }
 0x1e3   : > { %12285 = vst [vmem:[#allocation9_spill] sm:$0xff] %v10550_v61  ;;  %v2731_v16 = vmul.f32 1.442695, %v2616_v3  ;;  %9325 = vpow2.f32 %v2733_v15  ;;  %v2886_v24 = vsel %vm2372_vm1, %v10550_v61, 0.0  ;;  %v492_v61 = vld [vmem:[%s9747_s15 + $0x1e8] sm:$0xff] }
 0x1e4   : > { %v2540_v23 = vpop.xlane.xlu1 %2539  ;;  %2878 = vadd.xlane.f32.xlu0 %v2877_v36  ;;  %2890 = vadd.xlane.f32.xlu1 %v2889_v18  ;;  %v2729_v49 = vmul.f32 1.442695, %v2615_v9 }
 0x1e5   : > { %v2620_v46 = vsub.f32 %v12287_v21, %v2540_v23  ;;  %9327 = vpow2.f32 %v2731_v16  ;;  %v2537_v50 = vpop.xlane.xlu0 %2536  ;;  %v12292_v16 = vld [vmem:[#allocation13_spill] sm:$0xff] }
 0x1e6   : > { %v10558_v52 = vpop.eup %9313  ;;  %v2619_v35 = vsub.f32 %v12289_v53, %v2537_v50 }
 0x1e7   : > { %12288 = vst [vmem:[#allocation10_spill] sm:$0xff] %v10558_v52  ;;  %v2739_v27 = vmul.f32 1.442695, %v2620_v46  ;;  %v2898_v15 = vsel %vm2372_vm1, %v10558_v52, 0.0  ;;  %v10565_v3 = vpop.eup %9315 }
 0x1e8   : > { %12290 = vst [vmem:[#allocation11_spill] sm:$0xff] %v10565_v3  ;;  %v2546_v62 = vpop.xlane.xlu1 %2545  ;;  %2887 = vadd.xlane.f32.xlu0 %v2886_v24  ;;  %v10567_v39 = vpop.eup %9317  ;;  %v2737_v36 = vmul.f32 1.442695, %v2619_v35  ;;  %2899 = vadd.xlane.f32.xlu1 %v2898_v15  ;;  %v2883_v50 = vsel %vm2372_vm1, %v10565_v3, 0.0  ;;  %v481_v3 = vld [vmem:[%s9747_s15 + $0x190] sm:$0xff] }
 0x1e9   : > { %12291 = vst [vmem:[#allocation12_spill] sm:$0xff] %v10567_v39  ;;  %9329 = vpow2.f32 %v2739_v27  ;;  %v2622_v23 = vsub.f32 %v12292_v16, %v2546_v62  ;;  %v2558_v18 = vpop.xlane.xlu0 %2557  ;;  %v2895_v24 = vsel %vm2372_vm1, %v10567_v39, 0.0  ;;  %v12295_v62 = vld [vmem:[#allocation15_spill] sm:$0xff] }
 0x1ea   : > { %v10570_v21 = vpop.eup %9319  ;;  %9331 = vpow2.f32 %v2729_v49  ;;  %v2626_v46 = vsub.f32 %v10283_v45, %v2558_v18  ;;  %v477_v39 = vld [vmem:[%s9747_s15 + $0x170] sm:$0xff] }
 0x1eb   : > { %12293 = vst [vmem:[#allocation13_spill] sm:$0xff] %v10570_v21  ;;  %v2743_v9 = vmul.f32 1.442695, %v2622_v23  ;;  %9333 = vpow2.f32 %v2737_v36  ;;  %v2904_v45 = vsel %vm2372_vm1, %v10570_v21, 0.0  ;;  %v12297_v23 = vld [vmem:[#allocation14_spill] sm:$0xff] }
 0x1ec   : > { %v2555_v53 = vpop.xlane.xlu1 %2554  ;;  %2884 = vadd.xlane.f32.xlu0 %v2883_v50  ;;  %v2751_v27 = vmul.f32 1.442695, %v2626_v46  ;;  %2896 = vadd.xlane.f32.xlu1 %v2895_v24 }
 0x1ed   : > { %v2543_v15 = vpop.xlane.xlu0 %2542  ;;  %9335 = vpow2.f32 %v2743_v9  ;;  %v2625_v18 = vsub.f32 %v12297_v23, %v2555_v53 }
 0x1ee   : > { %v10577_v35 = vpop.eup %9321  ;;  %v2621_v49 = vsub.f32 %v12295_v62, %v2543_v15  ;;  %9337 = vpow2.f32 %v2751_v27 }
 0x1ef   : > { %12294 = vst [vmem:[#allocation23_spill] sm:$0xff] %v10577_v35  ;;  %v2916_v16 = vsel %vm2372_vm1, %v10577_v35, 0.0  ;;  %v10584_v36 = vpop.eup %9323  ;;  %v2749_v26 = vmul.f32 1.442695, %v2625_v18 }
 0x1f0   : > { %12296 = vst [vmem:[#allocation15_spill] sm:$0xff] %v10584_v36  ;;  %v2564_v50 = vpop.xlane.xlu1 %2563  ;;  %2905 = vadd.xlane.f32.xlu0 %v2904_v45  ;;  %v10587_v46 = vpop.eup %9325  ;;  %v2741_v24 = vmul.f32 1.442695, %v2621_v49  ;;  %2917 = vadd.xlane.f32.xlu1 %v2916_v16  ;;  %v2901_v27 = vsel %vm2372_vm1, %v10584_v36, 0.0 }
 0x1f1   : > { %12298 = vst [vmem:[#allocation14_spill] sm:$0xff] %v10587_v46  ;;  %v2628_v9 = vsub.f32 %v12299_v28, %v2564_v50  ;;  %v2552_v15 = vpop.xlane.xlu0 %2551  ;;  %v2913_v45 = vsel %vm2372_vm1, %v10587_v46, 0.0  ;;  %v12302_v28 = vld [vmem:[#allocation18_spill] sm:$0xff] }
 0x1f2   : > { %v10590_v62 = vpop.eup %9327  ;;  %9339 = vpow2.f32 %v2741_v24  ;;  %v2624_v35 = vsub.f32 %v12301_v30, %v2552_v15  ;;  %v12304_v24 = vld [vmem:[#allocation19_spill] sm:$0xff] }
 0x1f3   : > { %12300 = vst [vmem:[#allocation16_spill] sm:$0xff] %v10590_v62  ;;  %v2755_v21 = vmul.f32 1.442695, %v2628_v9  ;;  %v2910_v9 = vsel %vm2372_vm1, %v10590_v62, 0.0 }
 0x1f4   : > { %v2561_v53 = vpop.xlane.xlu1 %2560  ;;  %2902 = vadd.xlane.f32.xlu0 %v2901_v27  ;;  %v2747_v49 = vmul.f32 1.442695, %v2624_v35  ;;  %2914 = vadd.xlane.f32.xlu1 %v2913_v45 }
 0x1f5   : > { %9341 = vpow2.f32 %v2755_v21  ;;  %v2627_v16 = vsub.f32 %v12302_v28, %v2561_v53  ;;  %v2549_v50 = vpop.xlane.xlu0 %2548 }
 0x1f6   : > { %v10598_v23 = vpop.eup %9329  ;;  %9343 = vpow2.f32 %v2747_v49  ;;  %v2623_v30 = vsub.f32 %v12304_v24, %v2549_v50 }
 0x1f7   : > { %12303 = vst [vmem:[#allocation17_spill] sm:$0xff] %v10598_v23  ;;  %v2922_v18 = vsel %vm2372_vm1, %v10598_v23, 0.0  ;;  %v10605_v15 = vpop.eup %9331  ;;  %9345 = vpow2.f32 %v2749_v26  ;;  %v2753_v21 = vmul.f32 1.442695, %v2627_v16 }
 0x1f8   : > { %12305 = vst [vmem:[#allocation18_spill] sm:$0xff] %v10605_v15  ;;  %2911 = vadd.xlane.f32.xlu0 %v2910_v9  ;;  %v10607_v35 = vpop.eup %9333  ;;  %v2745_v27 = vmul.f32 1.442695, %v2623_v30  ;;  %2923 = vadd.xlane.f32.xlu1 %v2922_v18  ;;  %v2907_v53 = vsel %vm2372_vm1, %v10605_v15, 0.0 }
 0x1f9   : > { %12306 = vst [vmem:[#allocation19_spill] sm:$0xff] %v10607_v35  ;;  %v2919_v49 = vsel %vm2372_vm1, %v10607_v35, 0.0 }
 0x1fa   : > { %9347 = vpow2.f32 %v2745_v27  ;;  %v10611_v45 = vpop.eup %9335 }
 0x1fb   : > { %12307 = vst [vmem:[#allocation24_spill] sm:$0xff] %v10611_v45  ;;  %9349 = vpow2.f32 %v2753_v21  ;;  %v10615_v28 = vpop.eup %9337  ;;  %v2928_v26 = vsel %vm2372_vm1, %v10611_v45, 0.0 }
 0x1fc   : > { %2908 = vadd.xlane.f32.xlu0 %v2907_v53  ;;  %12308 = vst [vmem:[#allocation25_spill] sm:$0xff] %v10615_v28  ;;  %2920 = vadd.xlane.f32.xlu1 %v2919_v49  ;;  %v2940_v50 = vsel %vm2372_vm1, %v10615_v28, 0.0 }
 0x1ff   : > { %v10619_v16 = vpop.eup %9339 }
 0x200   : > { %12309 = vst [vmem:[#allocation26_spill] sm:$0xff] %v10619_v16  ;;  %2929 = vadd.xlane.f32.xlu0 %v2928_v26  ;;  %2941 = vadd.xlane.f32.xlu1 %v2940_v50  ;;  %v2925_v9 = vsel %vm2372_vm1, %v10619_v16, 0.0 }
 0x202   : > { %v10623_v24 = vpop.eup %9341 }
 0x203   : > { %12310 = vst [vmem:[#allocation27_spill] sm:$0xff] %v10623_v24  ;;  %v2946_v30 = vsel %vm2372_vm1, %v10623_v24, 0.0  ;;  %v10629_v18 = vpop.eup %9343 }
 0x204   : > { %12311 = vst [vmem:[#allocation28_spill] sm:$0xff] %v10629_v18  ;;  %2926 = vadd.xlane.f32.xlu0 %v2925_v9  ;;  %v10631_v21 = vpop.eup %9345  ;;  %2947 = vadd.xlane.f32.xlu1 %v2946_v30  ;;  %v2934_v27 = vsel %vm2372_vm1, %v10629_v18, 0.0  ;;  %v501_v18 = vld [vmem:[%s10649_s11 + $0x10] sm:$0xff] }
 0x205   : > { %12312 = vst [vmem:[#allocation29_spill] sm:$0xff] %v10631_v21  ;;  %v2937_v49 = vsel %vm2372_vm1, %v10631_v21, 0.0 }
 0x207   : > { %v10635_v53 = vpop.eup %9347 }
 0x208   : > { %12313 = vst [vmem:[#allocation30_spill] sm:$0xff] %v10635_v53  ;;  %2935 = vadd.xlane.f32.xlu0 %v2934_v27  ;;  %v10639_v26 = vpop.eup %9349  ;;  %2938 = vadd.xlane.f32.xlu1 %v2937_v49  ;;  %v2931_v50 = vsel %vm2372_vm1, %v10635_v53, 0.0 }
 0x209   : > { %12314 = vst [vmem:[#allocation31_spill] sm:$0xff] %v10639_v26  ;;  %v2943_v9 = vsel %vm2372_vm1, %v10639_v26, 0.0 }
 0x20c   : > { %2932 = vadd.xlane.f32.xlu0 %v2931_v50  ;;  %2944 = vadd.xlane.f32.xlu1 %v2943_v9 }
 0x215   : > { %v2774_v28 = vpop.xlane.xlu1 %2773 }
 0x216   : > { %v2762_v30 = vpop.xlane.xlu0 %2761 }
 0x21a   : > { %v2759_v16 = vpop.xlane.xlu0 %2758 }
 0x21c   : > { %v2771_v45 = vpop.xlane.xlu1 %2770 }
 0x21e   : > { %v2768_v24 = vpop.xlane.xlu0 %2767 }
 0x21f   : > { %9351 = vrcp.f32 %v2768_v24 }
 0x220   : > { %9353 = vrcp.f32 %v2762_v30  ;;  %v2780_v27 = vpop.xlane.xlu1 %2779  ;;  %v502_v30 = vld [vmem:[%s10649_s11 + $0x18] sm:$0xff] }
 0x221   : > { %9355 = vrcp.f32 %v2780_v27 }
 0x222   : > { %v2765_v21 = vpop.xlane.xlu0 %2764 }
 0x223   : > { %9357 = vrcp.f32 %v2765_v21 }
 0x224   : > { %9359 = vrcp.f32 %v2774_v28  ;;  %v2777_v49 = vpop.xlane.xlu1 %2776 }
 0x225   : > { %9361 = vrcp.f32 %v2759_v16 }
 0x226   : > { %v2786_v53 = vpop.xlane.xlu0 %2785  ;;  %9363 = vrcp.f32 %v2777_v49  ;;  %v506_v49 = vld [vmem:[%s10649_s11 + $0x38] sm:$0xff] }
 0x227   : > { %9365 = vrcp.f32 %v2771_v45 }
 0x229   : > { %v2798_v50 = vpop.xlane.xlu1 %2797 }
 0x22a   : > { %v2783_v9 = vpop.xlane.xlu0 %2782 }
 0x22c   : > { %v9352_v24 = vpop.eup %9351 }
 0x22d   : > { %v2795_v27 = vpop.xlane.xlu1 %2794  ;;  %v2956_v28 = vmul.f32 %v9352_v24, %v10349_v55  ;;  %v9354_v16 = vpop.eup %9353 }
 0x22e   : > { %v2792_v21 = vpop.xlane.xlu0 %2791  ;;  %v9356_v26 = vpop.eup %9355  ;;  %v2952_v55 = vmul.f32 %v9354_v16, %v10336_v37  ;;  %v440_v16 = vld [vmem:[%s9747_s15 + $0x48] sm:$0xff] }
 0x22f   : > { %9367 = vrcp.f32 %v2792_v21  ;;  %v3080_v45 = vmul.f32 %v2956_v28, %v502_v30  ;;  %v2964_v36 = vmul.f32 %v9356_v26, %v10359_v25  ;;  %v500_v21 = vld [vmem:[%s10649_s11 + $0x8] sm:$0xff]  ;;  %v439_v26 = vld [vmem:[%s9747_s15 + $0x40] sm:$0xff] }
 0x230   : > { %v9358_v46 = vpop.eup %9357  ;;  %9369 = vrcp.f32 %v2786_v53  ;;  %v505_v53 = vld [vmem:[%s10649_s11 + $0x30] sm:$0xff] }
 0x231   : > { %v9360_v35 = vpop.eup %9359  ;;  %8997 = vmatprep.subr.msk.mxu0 %vm2372_vm1, %v3080_v45  ;;  %v2804_v23 = vpop.xlane.xlu1 %2803  ;;  %v2954_v62 = vmul.f32 %v9358_v46, %v10362_v8  ;;  %v3084_v30 = vmul.f32 %v2964_v36, %v506_v49 }
 0x232   : > { %v2789_v15 = vpop.xlane.xlu0 %2788  ;;  %v9362_v24 = vpop.eup %9361  ;;  %9371 = vrcp.f32 %v2804_v23  ;;  %8998 = vmatpush3.xpose.msk.msra.mxu0 %vm2372_vm1, %v3080_v45  ;;  %v2960_v37 = vmul.f32 %v9360_v35, %v10334_v60  ;;  %v3078_v23 = vmul.f32 %v2952_v55, %v500_v21  ;;  %v499_v35 = vld [vmem:[%s10649_s11] sm:$0xff] }
 0x233   : > { %v9364_v28 = vpop.eup %9363  ;;  %9373 = vrcp.f32 %v2789_v15  ;;  %v3079_v25 = vmul.f32 %v2954_v62, %v501_v18  ;;  %9008 = vmatprep.subr.msk.mxu1 %vm2372_vm1, %v3084_v30  ;;  %v2950_v62 = vmul.f32 %v9362_v24, %v10344_v59  ;;  %v504_v15 = vld [vmem:[%s10649_s11 + $0x28] sm:$0xff]  ;;  %v503_v45 = vld [vmem:[%s10649_s11 + $0x20] sm:$0xff]  ;;  %v510_v24 = vld [vmem:[%s10649_s11 + $0x58] sm:$0xff] }
 0x234   : > { %9375 = vrcp.f32 %v2798_v50  ;;  %v2962_v8 = vmul.f32 %v9364_v28, %v10369_v40  ;;  %v9366_v46 = vpop.eup %9365  ;;  %9009 = vmatpush3.xpose.msk.msra.mxu1 %vm2372_vm1, %v3084_v30  ;;  %v3082_v18 = vmul.f32 %v2960_v37, %v504_v15  ;;  %v441_v28 = vld [vmem:[%s9747_s15 + $0x50] sm:$0xff]  ;;  %v514_v37 = vld [vmem:[%s10649_s11 + $0x78] sm:$0xff]  ;;  %v12315_v15 = vld [vmem:[#allocation21_spill] sm:$0xff] }
 0x235   : > { %9377 = vrcp.f32 %v2783_v9  ;;  %8999 = vmatprep.subr.msk.mxu0 %vm2372_vm1, %v3079_v25  ;;  %v2801_v36 = vpop.xlane.xlu1 %2800  ;;  %v2958_v59 = vmul.f32 %v9366_v46, %v10352_v14  ;;  %v3077_v9 = vmul.f32 %v2950_v62, %v499_v35 }
 0x236   : > { %9379 = vrcp.f32 %v2801_v36  ;;  %9000 = vmatpush3.xpose.msk.msra.mxu0 %vm2372_vm1, %v3079_v25  ;;  %v10671_v40 = vpop.xlane.xlu0 %2809  ;;  %v3083_v60 = vmul.f32 %v2962_v8, %v505_v53 }
 0x237   : > { %9001 = vmatprep.subr.msk.mxu0 %vm2372_vm1, %v3078_v23  ;;  %9381 = vrcp.f32 %v2795_v27  ;;  %v3081_v14 = vmul.f32 %v2958_v59, %v503_v45  ;;  %v443_v27 = vld [vmem:[%s9747_s15 + $0x60] sm:$0xff] }
 0x238   : > { %9010 = vmatprep.subr.msk.mxu1 %vm2372_vm1, %v3083_v60 }
 0x239   : > { %3391 = vxpose.xlu0.b32.start [1/4] (short) (narrow) %v439_v26, 16  ;;  %9011 = vmatpush3.xpose.msk.msra.mxu1 %vm2372_vm1, %v3083_v60  ;;  %v10678_v50 = vpop.xlane.xlu1 %2821  ;;  %v509_v26 = vld [vmem:[%s10649_s11 + $0x50] sm:$0xff] }
 0x23a   : > { %9002 = vmatpush3.xpose.msk.msra.mxu0 %vm2372_vm1, %v3078_v23  ;;  %9012 = vmatprep.subr.msk.mxu1 %vm2372_vm1, %v3082_v18  ;;  %v10685_v55 = vpop.xlane.xlu0 %2806  ;;  %v444_v23 = vld [vmem:[%s9747_s15 + $0x68] sm:$0xff] }
 0x23b   : > { %9003 = vmatprep.subr.msk.mxu0 %vm2372_vm1, %v3077_v9 }
 0x23c   : > { %v9368_v49 = vpop.eup %9367 }
 0x23d   : > { %3392 = vxpose.xlu0.b32.cont [2/4] (short) (narrow) %v440_v16, 16  ;;  %9013 = vmatpush3.xpose.msk.msra.mxu1 %vm2372_vm1, %v3082_v18  ;;  %v10690_v30 = vpop.xlane.xlu1 %2818  ;;  %v2972_v21 = vmul.f32 %v9368_v49, %v10392_v33  ;;  %v9370_v25 = vpop.eup %9369  ;;  %v442_v18 = vld [vmem:[%s9747_s15 + $0x58] sm:$0xff]  ;;  %v508_v16 = vld [vmem:[%s10649_s11 + $0x48] sm:$0xff] }
 0x23e   : > { %9004 = vmatpush3.xpose.msk.msra.mxu0 %vm2372_vm1, %v3077_v9  ;;  %9014 = vmatprep.subr.msk.mxu1 %vm2372_vm1, %v3081_v14  ;;  %v2968_v59 = vmul.f32 %v9370_v25, %v10372_v38  ;;  %v445_v38 = vld [vmem:[%s9747_s15 + $0x70] sm:$0xff]  ;;  %v447_v25 = vld [vmem:[%s9747_s15 + $0x80] sm:$0xff] }
 0x23f   : > { %v9372_v53 = vpop.eup %9371  ;;  %3516 = vxpose.xlu1.b32.start [1/4] (short) (narrow) %v443_v27, 16  ;;  %v3088_v8 = vmul.f32 %v2972_v21, %v510_v24  ;;  %v513_v27 = vld [vmem:[%s10649_s11 + $0x70] sm:$0xff]  ;;  %v12316_v24 = vld [vmem:[#allocation20_spill] sm:$0xff] }
 0x240   : > { %v9374_v46 = vpop.eup %9373  ;;  %v2980_v62 = vmul.f32 %v9372_v53, %v10402_v58 }
 0x241   : > { %3393 = vxpose.xlu0.b32.cont [3/4] (short) (narrow) %v441_v28, 16  ;;  %v2828_v36 = vpop.xlane.xlu0 %2827  ;;  %v9376_v33 = vpop.eup %9375  ;;  %9006 = vmatmul.mubr.msk.f32.vlgmr.msra.gmra.mxu0 %vm2372_vm1, %v12315_v15  ;;  %v2970_v35 = vmul.f32 %v9374_v46, %v10399_v44  ;;  %v3086_v28 = vmul.f32 %v2968_v59, %v508_v16  ;;  %v507_v46 = vld [vmem:[%s10649_s11 + $0x40] sm:$0xff]  ;;  %v522_v16 = vld [vmem:[%s10649_s11 + $0xb8] sm:$0xff] }
 0x242   : > { %9019 = vmatprep.subr.msk.mxu0 %vm2372_vm1, %v3088_v8  ;;  %v2816_v60 = vpop.xlane.xlu1 %2815  ;;  %9383 = vrcp.f32 %v2828_v36  ;;  %v9378_v9 = vpop.eup %9377  ;;  %9015 = vmatpush3.xpose.msk.msra.mxu1 %vm2372_vm1, %v3081_v14  ;;  %v3092_v58 = vmul.f32 %v2980_v62, %v514_v37  ;;  %v512_v36 = vld [vmem:[%s10649_s11 + $0x68] sm:$0xff]  ;;  %v446_v62 = vld [vmem:[%s9747_s15 + $0x78] sm:$0xff] }
 0x243   : > { %9385 = vrcp.f32 %v2816_v60  ;;  %9020 = vmatpush3.xpose.msk.msra.mxu0 %vm2372_vm1, %v3088_v8  ;;  %v9380_v45 = vpop.eup %9379  ;;  %3517 = vxpose.xlu1.b32.cont [2/4] (short) (narrow) %v444_v23, 16  ;;  %v3087_v49 = vmul.f32 %v2970_v35, %v509_v26  ;;  %v2966_v53 = vmul.f32 %v9378_v9, %v10379_v41  ;;  %v2976_v8 = vmul.f32 %v9376_v33, %v10382_v17  ;;  %v448_v33 = vld [vmem:[%s9747_s15 + $0x88] sm:$0xff]  ;;  %v511_v60 = vld [vmem:[%s10649_s11 + $0x60] sm:$0xff]  ;;  %v449_v9 = vld [vmem:[%s9747_s15 + $0x90] sm:$0xff] }
 0x244   : > { %9030 = vmatprep.subr.msk.mxu1 %vm2372_vm1, %v3092_v58  ;;  %v2978_v14 = vmul.f32 %v9380_v45, %v10409_v47  ;;  %v9382_v37 = vpop.eup %9381 }
 0x245   : > { %3394 = vxpose.xlu0.b32.end [4/4] (short) (narrow) %v442_v18, 16  ;;  %v10711_v44 = vpop.xlane.xlu0 %2812  ;;  %9017 = vmatmul.mubr.msk.f32.vlgmr.msra.gmra.mxu1 %vm2372_vm1, %v12316_v24  ;;  %v3085_v17 = vmul.f32 %v2966_v53, %v507_v46  ;;  %v3090_v26 = vmul.f32 %v2976_v8, %v512_v36  ;;  %v2974_v15 = vmul.f32 %v9382_v37, %v10389_v5  ;;  %v451_v5 = vld [vmem:[%s9747_s15 + $0xa0] sm:$0xff]  ;;  %v452_v24 = vld [vmem:[%s9747_s15 + $0xa8] sm:$0xff]  ;;  %v453_v8 = vld [vmem:[%s9747_s15 + $0xb0] sm:$0xff] }
 0x246   : > { %9021 = vmatprep.subr.msk.mxu0 %vm2372_vm1, %v3087_v49  ;;  %v10718_v21 = vpop.xlane.xlu1 %2824  ;;  %9031 = vmatpush3.xpose.msk.msra.mxu1 %vm2372_vm1, %v3092_v58  ;;  %v3091_v47 = vmul.f32 %v2978_v14, %v513_v27  ;;  %v455_v37 = vld [vmem:[%s9747_s15 + $0xc0] sm:$0xff]  ;;  %v454_v36 = vld [vmem:[%s9747_s15 + $0xb8] sm:$0xff]  ;;  %9387 = vrcp.f32 %v10711_v44 }
 0x247   : > { %9022 = vmatpush3.xpose.msk.msra.mxu0 %vm2372_vm1, %v3087_v49  ;;  %3518 = vxpose.xlu1.b32.cont [3/4] (short) (narrow) %v445_v38, 16  ;;  %v3089_v59 = vmul.f32 %v2974_v15, %v511_v60  ;;  %v518_v49 = vld [vmem:[%s10649_s11 + $0x98] sm:$0xff]  ;;  %v457_v15 = vld [vmem:[%s9747_s15 + $0xd0] sm:$0xff]  ;;  %v460_v60 = vld [vmem:[%s9747_s15 + $0xe8] sm:$0xff]  ;;  %9389 = vrcp.f32 %v10671_v40 }
 0x248   : > { %9023 = vmatprep.subr.msk.mxu0 %vm2372_vm1, %v3086_v28  ;;  %9032 = vmatprep.subr.msk.mxu1 %vm2372_vm1, %v3091_v47  ;;  %9391 = vrcp.f32 %v10685_v55 }
 0x249   : > { %3641 = vxpose.xlu0.b32.start [1/4] (short) (narrow) %v447_v25, 16  ;;  %v10729_v41 = vpop.xlane.xlu0 %2833  ;;  %9393 = vrcp.f32 %v10718_v21  ;;  %v517_v21 = vld [vmem:[%s10649_s11 + $0x90] sm:$0xff] }
 0x24a   : > { %v10731_v23 = vpop.xlane.xlu1 %2845  ;;  %9033 = vmatpush3.xpose.msk.msra.mxu1 %vm2372_vm1, %v3091_v47  ;;  %9395 = vrcp.f32 %v10678_v50 }
 0x24b   : > { %9024 = vmatpush3.xpose.msk.msra.mxu0 %vm2372_vm1, %v3086_v28  ;;  %9034 = vmatprep.subr.msk.mxu1 %vm2372_vm1, %v3090_v26 }
 0x24c   : > { %9025 = vmatprep.subr.msk.mxu0 %vm2372_vm1, %v3085_v17  ;;  %3519 = vxpose.xlu1.b32.end [4/4] (short) (narrow) %v446_v62, 16  ;;  %v459_v62 = vld [vmem:[%s9747_s15 + $0xe0] sm:$0xff] }
 0x24d   : > { %3642 = vxpose.xlu0.b32.cont [2/4] (short) (narrow) %v448_v33, 16  ;;  %v10741_v35 = vpop.xlane.xlu0 %2830 }
 0x24e   : > { %v10743_v18 = vpop.xlane.xlu1 %2842  ;;  %9035 = vmatpush3.xpose.msk.msra.mxu1 %vm2372_vm1, %v3090_v26 }
 0x24f   : > { %v9384_v58 = vpop.eup %9383  ;;  %9026 = vmatpush3.xpose.msk.msra.mxu0 %vm2372_vm1, %v3085_v17  ;;  %9036 = vmatprep.subr.msk.mxu1 %vm2372_vm1, %v3089_v59  ;;  %v456_v17 = vld [vmem:[%s9747_s15 + $0xc8] sm:$0xff] }
 0x250   : > { %v9386_v45 = vpop.eup %9385  ;;  %v2996_v27 = vmul.f32 %v9384_v58, %v10438_v32  ;;  %3766 = vxpose.xlu1.b32.start [1/4] (short) (narrow) %v451_v5, 16  ;;  %v450_v32 = vld [vmem:[%s9747_s15 + $0x98] sm:$0xff]  ;;  %v461_v58 = vld [vmem:[%s9747_s15 + $0xf0] sm:$0xff] }
 0x251   : > { %3643 = vxpose.xlu0.b32.cont [3/4] (short) (narrow) %v449_v9, 16  ;;  %v10753_v38 = vpop.xlane.xlu0 %2839  ;;  %v2988_v14 = vmul.f32 %v9386_v45, %v10435_v20  ;;  %v458_v5 = vld [vmem:[%s9747_s15 + $0xd8] sm:$0xff] }
 0x252   : > { %v10757_v28 = vmul.f32 %v2996_v27, %v522_v16  ;;  %9037 = vmatpush3.xpose.msk.msra.mxu1 %vm2372_vm1, %v3089_v59  ;;  %v10760_v25 = vpop.xlane.xlu1 %2851  ;;  %v463_v16 = vld [vmem:[%s9747_s15 + $0x100] sm:$0xff]  ;;  %9397 = vrcp.f32 %v10753_v38 }
 0x253   : > { %v10762_v53 = vmul.f32 %v2988_v14, %v518_v49  ;;  %v462_v49 = vld [vmem:[%s9747_s15 + $0xf8] sm:$0xff]  ;;  %v464_v14 = vld [vmem:[%s9747_s15 + $0x108] sm:$0xff]  ;;  %9399 = vrcp.f32 %v10690_v30 }
 0x254   : > { %9052 = vmatprep.subr.msk.mxu1 %vm2372_vm1, %v10757_v28  ;;  %3767 = vxpose.xlu1.b32.cont [2/4] (short) (narrow) %v452_v24, 16  ;;  %v467_v24 = vld [vmem:[%s9747_s15 + $0x120] sm:$0xff] }
 0x255   : > { %9041 = vmatprep.subr.msk.mxu0 %vm2372_vm1, %v10762_v53  ;;  %v10769_v20 = vpop.xlane.xlu0 %2836  ;;  %3644 = vxpose.xlu0.b32.end [4/4] (short) (narrow) %v450_v32, 16 }
 0x256   : > { %v10773_v47 = vpop.xlane.xlu1 %2848  ;;  %9401 = vrcp.f32 %v10769_v20 }
 0x257   : > { %9403 = vrcp.f32 %v10760_v25 }
 0x258   : > { %3768 = vxpose.xlu1.b32.cont [3/4] (short) (narrow) %v453_v8, 16  ;;  %v465_v8 = vld [vmem:[%s9747_s15 + $0x110] sm:$0xff]  ;;  %9405 = vrcp.f32 %v10729_v41 }
 0x259   : > { %v10775_v46 = vpop.xlane.xlu0 %2857  ;;  %3891 = vxpose.xlu0.b32.start [1/4] (short) (narrow) %v455_v37, 16  ;;  %9407 = vrcp.f32 %v10773_v47  ;;  %v521_v41 = vld [vmem:[%s10649_s11 + $0xb0] sm:$0xff] }
 0x25a   : > { %v10782_v33 = vpop.xlane.xlu1 %2869  ;;  %9409 = vrcp.f32 %v10741_v35 }
 0x25b   : > { %9411 = vrcp.f32 %v10731_v23 }
 0x25c   : > { %3769 = vxpose.xlu1.b32.end [4/4] (short) (narrow) %v454_v36, 16  ;;  %v468_v36 = vld [vmem:[%s9747_s15 + $0x128] sm:$0xff] }
 0x25d   : > { %v10779_v26 = vpop.xlane.xlu0 %2854  ;;  %3892 = vxpose.xlu0.b32.cont [2/4] (short) (narrow) %v456_v17, 16  ;;  %v466_v17 = vld [vmem:[%s9747_s15 + $0x118] sm:$0xff] }
 0x25e   : > { %v10789_v9 = vpop.xlane.xlu1 %2866 }
 0x260   : > { %4016 = vxpose.xlu1.b32.start [1/4] (short) (narrow) %v459_v62, 16 }
 0x261   : > { %3893 = vxpose.xlu0.b32.cont [3/4] (short) (narrow) %v457_v15, 16  ;;  %v10786_v59 = vpop.xlane.xlu0 %2863  ;;  %v469_v15 = vld [vmem:[%s9747_s15 + $0x130] sm:$0xff] }
 0x262   : > { %v10796_v27 = vpop.xlane.xlu1 %2875  ;;  %9413 = vrcp.f32 %v10786_v59 }
 0x263   : > { %9415 = vrcp.f32 %v10743_v18  ;;  %v525_v18 = vld [vmem:[%s10649_s11 + $0xd0] sm:$0xff] }
 0x264   : > { %4017 = vxpose.xlu1.b32.cont [2/4] (short) (narrow) %v460_v60, 16 }
 0x265   : > { %3894 = vxpose.xlu0.b32.end [4/4] (short) (narrow) %v458_v5, 16  ;;  %v10793_v45 = vpop.xlane.xlu0 %2860  ;;  %v471_v5 = vld [vmem:[%s9747_s15 + $0x140] sm:$0xff] }
 0x266   : > { %v10803_v37 = vpop.xlane.xlu1 %2872  ;;  %9417 = vrcp.f32 %v10793_v45 }
 0x268   : > { %4018 = vxpose.xlu1.b32.cont [3/4] (short) (narrow) %v461_v58, 16  ;;  %v470_v58 = vld [vmem:[%s9747_s15 + $0x138] sm:$0xff] }
 0x269   : > { %4141 = vxpose.xlu0.b32.start [1/4] (short) (narrow) %v463_v16, 16  ;;  %v10800_v32 = vpop.xlane.xlu0 %2881 }
 0x26a   : > { %v10810_v60 = vpop.xlane.xlu1 %2893 }
 0x26c   : > { %4019 = vxpose.xlu1.b32.end [4/4] (short) (narrow) %v462_v49, 16  ;;  %v472_v49 = vld [vmem:[%s9747_s15 + $0x148] sm:$0xff] }
 0x26d   : > { %4142 = vxpose.xlu0.b32.cont [2/4] (short) (narrow) %v464_v14, 16  ;;  %v10807_v62 = vpop.xlane.xlu0 %2878 }
 0x26e   : > { %v10817_v14 = vpop.xlane.xlu1 %2890 }
 0x26f   : > { %12317 = vst [vmem:[#allocation21_spill] sm:$0xff] %v10817_v14  ;;  %v491_v14 = vld [vmem:[%s9747_s15 + $0x1e0] sm:$0xff] }
 0x270   : > { %4266 = vxpose.xlu1.b32.start [1/4] (short) (narrow) %v467_v24, 16  ;;  %v475_v24 = vld [vmem:[%s9747_s15 + $0x160] sm:$0xff] }
 0x271   : > { %4143 = vxpose.xlu0.b32.cont [3/4] (short) (narrow) %v465_v8, 16  ;;  %v10814_v16 = vpop.xlane.xlu0 %2887  ;;  %v473_v8 = vld [vmem:[%s9747_s15 + $0x150] sm:$0xff] }
 0x274   : > { %4267 = vxpose.xlu1.b32.cont [2/4] (short) (narrow) %v468_v36, 16 }
 0x275   : > { %4144 = vxpose.xlu0.b32.end [4/4] (short) (narrow) %v466_v17, 16  ;;  %v10821_v36 = vpop.xlane.xlu0 %2884  ;;  %v476_v17 = vld [vmem:[%s9747_s15 + $0x168] sm:$0xff] }
 0x278   : > { %4268 = vxpose.xlu1.b32.cont [3/4] (short) (narrow) %v469_v15, 16  ;;  %v10824_v15 = vpop.xlane.xlu1 %2899 }
 0x279   : > { %4391 = vxpose.xlu0.b32.start [1/4] (short) (narrow) %v471_v5, 16  ;;  %v474_v5 = vld [vmem:[%s9747_s15 + $0x158] sm:$0xff] }
 0x27c   : > { %4269 = vxpose.xlu1.b32.end [4/4] (short) (narrow) %v470_v58, 16  ;;  %v10828_v58 = vpop.xlane.xlu0 %2905  ;;  %v10831_v11 = vpop.xlane.xlu1 %2896 }
 0x27d   : > { %4392 = vxpose.xlu0.b32.cont [2/4] (short) (narrow) %v472_v49, 16  ;;  %12318 = vst [vmem:[#allocation20_spill] sm:$0xff] %v10828_v58  ;;  %v479_v49 = vld [vmem:[%s9747_s15 + $0x180] sm:$0xff]  ;;  %v484_v58 = vld [vmem:[%s9747_s15 + $0x1a8] sm:$0xff] }
 0x280   : > { %4516 = vxpose.xlu1.b32.start [1/4] (short) (narrow) %v475_v24, 16  ;;  %v478_v24 = vld [vmem:[%s9747_s15 + $0x178] sm:$0xff]  ;;  %v10835_v52 = vpop.xlane.xlu0 %2902 }
 0x281   : > { %4393 = vxpose.xlu0.b32.cont [3/4] (short) (narrow) %v473_v8, 16  ;;  %v480_v8 = vld [vmem:[%s9747_s15 + $0x188] sm:$0xff]  ;;  %12319 = vst [vmem:[#allocation32_spill] sm:$0xff] %v10835_v52 }
 0x284   : > { %4517 = vxpose.xlu1.b32.cont [2/4] (short) (narrow) %v476_v17, 16  ;;  %v483_v17 = vld [vmem:[%s9747_s15 + $0x1a0] sm:$0xff] }
 0x285   : > { %4394 = vxpose.xlu0.b32.end [4/4] (short) (narrow) %v474_v5, 16  ;;  %v10838_v5 = vpop.xlane.xlu1 %2917 }
 0x286   : > { %12320 = vst [vmem:[#allocation33_spill] sm:$0xff] %v10838_v5  ;;  %v488_v5 = vld [vmem:[%s9747_s15 + $0x1c8] sm:$0xff] }
 0x288   : > { %4518 = vxpose.xlu1.b32.cont [3/4] (short) (narrow) %v477_v39, 16  ;;  %v10842_v39 = vpop.xlane.xlu0 %2911 }
 0x289   : > { %4641 = vxpose.xlu0.b32.start [1/4] (short) (narrow) %v479_v49, 16  ;;  %v482_v49 = vld [vmem:[%s9747_s15 + $0x198] sm:$0xff]  ;;  %v10845_v2 = vpop.xlane.xlu1 %2914 }
 0x28a   : > { %12321 = vst [vmem:[#allocation34_spill] sm:$0xff] %v10845_v2 }
 0x28c   : > { %4519 = vxpose.xlu1.b32.end [4/4] (short) (narrow) %v478_v24, 16  ;;  %v485_v24 = vld [vmem:[%s9747_s15 + $0x1b0] sm:$0xff]  ;;  %v10849_v52 = vpop.xlane.xlu0 %2908 }
 0x28d   : > { %4642 = vxpose.xlu0.b32.cont [2/4] (short) (narrow) %v480_v8, 16  ;;  %v487_v8 = vld [vmem:[%s9747_s15 + $0x1c0] sm:$0xff]  ;;  %12322 = vst [vmem:[#allocation35_spill] sm:$0xff] %v10849_v52  ;;  %v490_v52 = vld [vmem:[%s9747_s15 + $0x1d8] sm:$0xff] }
 0x290   : > { %4766 = vxpose.xlu1.b32.start [1/4] (short) (narrow) %v483_v17, 16  ;;  %v486_v17 = vld [vmem:[%s9747_s15 + $0x1b8] sm:$0xff]  ;;  %v10856_v2 = vpop.xlane.xlu0 %2929 }
 0x291   : > { %4643 = vxpose.xlu0.b32.cont [3/4] (short) (narrow) %v481_v3, 16  ;;  %v10852_v3 = vpop.xlane.xlu1 %2923  ;;  %12323 = vst [vmem:[#allocation36_spill] sm:$0xff] %v10856_v2 }
 0x294   : > { %4767 = vxpose.xlu1.b32.cont [2/4] (short) (narrow) %v484_v58, 16  ;;  %v489_v58 = vld [vmem:[%s9747_s15 + $0x1d0] sm:$0xff] }
 0x295   : > { %4644 = vxpose.xlu0.b32.end [4/4] (short) (narrow) %v482_v49, 16  ;;  %v10859_v49 = vpop.xlane.xlu1 %2920 }
 0x298   : > { %4768 = vxpose.xlu1.b32.cont [3/4] (short) (narrow) %v485_v24, 16  ;;  %v10863_v24 = vpop.xlane.xlu0 %2926 }
 0x299   : > { %4891 = vxpose.xlu0.b32.start [1/4] (short) (narrow) %v487_v8, 16  ;;  %v493_v8 = vld [vmem:[%s9747_s15 + $0x1f0] sm:$0xff] }
 0x29c   : > { %4769 = vxpose.xlu1.b32.end [4/4] (short) (narrow) %v486_v17, 16  ;;  %v10867_v17 = vpop.xlane.xlu1 %2941  ;;  %v10871_v2 = vpop.xlane.xlu0 %2935 }
 0x29d   : > { %4892 = vxpose.xlu0.b32.cont [2/4] (short) (narrow) %v488_v5, 16  ;;  %v494_v5 = vld [vmem:[%s9747_s15 + $0x1f8] sm:$0xff]  ;;  %s9547_s15 = smov 80  }
 0x2a0   : > { %5016 = vxpose.xlu1.b32.start [1/4] (short) (narrow) %v491_v14, 16  ;;  %v10874_v14 = vpop.xlane.xlu1 %2947 }
 0x2a1   : > { %4893 = vxpose.xlu0.b32.cont [3/4] (short) (narrow) %v489_v58, 16 }
 0x2a4   : > { %5017 = vxpose.xlu1.b32.cont [2/4] (short) (narrow) %v492_v61, 16  ;;  %v10878_v61 = vpop.xlane.xlu0 %2932  ;;  %v10881_v44 = vpop.xlane.xlu1 %2938 }
 0x2a5   : > { %4894 = vxpose.xlu0.b32.end [4/4] (short) (narrow) %v490_v52, 16  ;;  %v9388_v52 = vpop.eup %9387  ;;  %12324 = vst [vmem:[#allocation37_spill] sm:$0xff] %v10881_v44  ;;  %9419 = vrcp.f32 %v10796_v27  ;;  %v524_v27 = vld [vmem:[%s10649_s11 + $0xc8] sm:$0xff] }
 0x2a6   : > { %v2986_v55 = vmul.f32 %v9388_v52, %v10443_v0  ;;  %v9390_v58 = vpop.eup %9389  ;;  %v516_v0 = vld [vmem:[%s10649_s11 + $0x88] sm:$0xff]  ;;  %9421 = vrcp.f32 %v10775_v46 }
 0x2a7   : > { %v2984_v30 = vmul.f32 %v9390_v58, %v10412_v22 }
 0x2a8   : > { %5018 = vxpose.xlu1.b32.cont [3/4] (short) (narrow) %v493_v8, 16  ;;  %v10888_v50 = vpop.xlane.xlu1 %2944  ;;  %v3095_v38 = vmul.f32 %v2986_v55, %v517_v21  ;;  %v520_v21 = vld [vmem:[%s10649_s11 + $0xa8] sm:$0xff] }
 0x2a9   : > { %v3094_v25 = vmul.f32 %v2984_v30, %v516_v0 }
 0x2ac   : > { %5019 = vxpose.xlu1.b32.end [4/4] (short) (narrow) %v494_v5, 16  ;;  %v9392_v5 = vpop.eup %9391  ;;  %9423 = vrcp.f32 %v10803_v37  ;;  %v523_v37 = vld [vmem:[%s10649_s11 + $0xc0] sm:$0xff] }
 0x2ad   : > { %v9394_v44 = vpop.eup %9393  ;;  %9425 = vrcp.f32 %v10779_v26 }
 0x2ae   : > { %v9396_v52 = vpop.eup %9395  ;;  %v2994_v22 = vmul.f32 %v9394_v44, %v10447_v57  ;;  %9427 = vrcp.f32 %v10782_v33  ;;  %v534_v33 = vld [vmem:[%s10649_s11 + $0x118] sm:$0xff] }
 0x2af   : > { %v9398_v55 = vpop.eup %9397  ;;  %v2992_v47 = vmul.f32 %v9396_v52, %v10422_v7  ;;  %9429 = vrcp.f32 %v10814_v16 }
 0x2b0   : > { %v3099_v57 = vmul.f32 %v2994_v22, %v521_v41  ;;  %v3004_v44 = vmul.f32 %v9398_v55, %v10470_v56  ;;  %v9400_v35 = vpop.eup %9399  ;;  %9431 = vrcp.f32 %v10789_v9  ;;  %v533_v9 = vld [vmem:[%s10649_s11 + $0x110] sm:$0xff] }
 0x2b1   : > { %v9402_v7 = vpop.eup %9401  ;;  %v3098_v56 = vmul.f32 %v2992_v47, %v520_v21  ;;  %v2990_v59 = vmul.f32 %v9400_v35, %v10429_v12  ;;  %9433 = vrcp.f32 %v10821_v36 }
 0x2b2   : > { %v3002_v30 = vmul.f32 %v9402_v7, %v10485_v19 }
 0x2b4   : > { %v3103_v19 = vmul.f32 %v3002_v30, %v525_v18 }
 0x2b5   : > { %v3407_v40 = vpop.trf.xlu0 }
 0x2b6   : > { %9027 = vmatprep.mubr.msk.f32.mxu0 %vm2372_vm1, %v3407_v40  ;;  %v2982_v40 = vmul.f32 %v9392_v5, %v10419_v34 }
 0x2b9   : > { %v3408_v8 = vpop.trf.xlu0 }
 0x2ba   : > { %9028 = vmatmul.mubr.msk.f32.vlgmr.msra.gmra.mxu0 %vm2372_vm1, %v3408_v8  ;;  %v526_v8 = vld [vmem:[%s10649_s11 + $0xd8] sm:$0xff] }
 0x2bb   : > { %9042 = vmatpush3.xpose.msk.msra.mxu0 %vm2372_vm1, %v10762_v53  ;;  %v515_v53 = vld [vmem:[%s10649_s11 + $0x80] sm:$0xff]  ;;  %v3104_v5 = vmul.f32 %v3004_v44, %v526_v8  ;;  %v528_v44 = vld [vmem:[%s10649_s11 + $0xe8] sm:$0xff] }
 0x2bc   : > { %9043 = vmatprep.subr.msk.mxu0 %vm2372_vm1, %v3095_v38  ;;  %v3532_v20 = vpop.trf.xlu1  ;;  %v3093_v34 = vmul.f32 %v2982_v40, %v515_v53  ;;  %v529_v53 = vld [vmem:[%s10649_s11 + $0xf0] sm:$0xff] }
 0x2bd   : > { %9038 = vmatprep.mubr.msk.f32.mxu1 %vm2372_vm1, %v3532_v20 }
 0x2bf   : > { %9044 = vmatpush3.xpose.msk.msra.mxu0 %vm2372_vm1, %v3095_v38  ;;  %v9404_v38 = vpop.eup %9403  ;;  %9435 = vrcp.f32 %v10824_v15  ;;  %v532_v15 = vld [vmem:[%s10649_s11 + $0x108] sm:$0xff] }
 0x2c0   : > { %9045 = vmatprep.subr.msk.mxu0 %vm2372_vm1, %v3094_v25  ;;  %v3533_v58 = vpop.trf.xlu1  ;;  %v9406_v0 = vpop.eup %9405  ;;  %v3012_v20 = vmul.f32 %v9404_v38, %v10478_v29  ;;  %9437 = vrcp.f32 %v10800_v32 }
 0x2c1   : > { %9039 = vmatmul.mubr.msk.f32.vlgmr.msra.gmra.mxu1 %vm2372_vm1, %v3533_v58  ;;  %v9408_v52 = vpop.eup %9407  ;;  %v3000_v22 = vmul.f32 %v9406_v0, %v10450_v54  ;;  %9439 = vrcp.f32 %v10831_v11  ;;  %v531_v11 = vld [vmem:[%s10649_s11 + $0x100] sm:$0xff] }
 0x2c2   : > { %9053 = vmatpush3.xpose.msk.msra.mxu1 %vm2372_vm1, %v10757_v28  ;;  %v519_v28 = vld [vmem:[%s10649_s11 + $0xa0] sm:$0xff]  ;;  %v9410_v40 = vpop.eup %9409  ;;  %v3010_v55 = vmul.f32 %v9408_v52, %v10487_v43  ;;  %9441 = vrcp.f32 %v10807_v62 }
 0x2c3   : > { %9046 = vmatpush3.xpose.msk.msra.mxu0 %vm2372_vm1, %v3094_v25  ;;  %9054 = vmatprep.subr.msk.mxu1 %vm2372_vm1, %v3099_v57  ;;  %v3097_v12 = vmul.f32 %v2990_v59, %v519_v28  ;;  %v530_v25 = vld [vmem:[%s10649_s11 + $0xf8] sm:$0xff]  ;;  %v9412_v41 = vpop.eup %9411  ;;  %v3102_v54 = vmul.f32 %v3000_v22, %v524_v27  ;;  %v2998_v58 = vmul.f32 %v9410_v40, %v10465_v4  ;;  %9443 = vrcp.f32 %v10810_v60  ;;  %v536_v22 = vld [vmem:[%s10649_s11 + $0x128] sm:$0xff]  ;;  %v12325_v40 = vld [vmem:[#allocation9_spill] sm:$0xff] }
 0x2c4   : > { %9047 = vmatprep.subr.msk.mxu0 %vm2372_vm1, %v3093_v34  ;;  %v3108_v46 = vmul.f32 %v3012_v20, %v530_v25  ;;  %v9414_v47 = vpop.eup %9413  ;;  %v3107_v43 = vmul.f32 %v3010_v55, %v529_v53  ;;  %v3008_v26 = vmul.f32 %v9412_v41, %v10458_v6  ;;  %v538_v28 = vld [vmem:[%s10649_s11 + $0x138] sm:$0xff]  ;;  %9445 = vrcp.f32 %v10842_v39  ;;  %v12327_v55 = vld [vmem:[#allocation22_spill] sm:$0xff]  ;;  %v12328_v53 = vld [vmem:[#allocation35_spill] sm:$0xff] }
 0x2c5   : > { %v3657_v23 = vpop.trf.xlu0  ;;  %v3101_v4 = vmul.f32 %v2998_v58, %v523_v37  ;;  %v3020_v35 = vmul.f32 %v9414_v47, %v10510_v13  ;;  %v542_v60 = vld [vmem:[%s10649_s11 + $0x158] sm:$0xff]  ;;  %v535_v47 = vld [vmem:[%s10649_s11 + $0x120] sm:$0xff]  ;;  %v12329_v37 = vld [vmem:[#allocation11_spill] sm:$0xff] }
 0x2c6   : > { %9055 = vmatpush3.xpose.msk.msra.mxu1 %vm2372_vm1, %v3099_v57  ;;  %9049 = vmatprep.mubr.msk.f32.mxu0 %vm2372_vm1, %v3657_v23  ;;  %v3106_v6 = vmul.f32 %v3008_v26, %v528_v44  ;;  %v541_v26 = vld [vmem:[%s10649_s11 + $0x150] sm:$0xff]  ;;  %v12330_v44 = vld [vmem:[#allocation10_spill] sm:$0xff] }
 0x2c7   : > { %9048 = vmatpush3.xpose.msk.msra.mxu0 %vm2372_vm1, %v3093_v34  ;;  %9056 = vmatprep.subr.msk.mxu1 %vm2372_vm1, %v3098_v56  ;;  %v9416_v34 = vpop.eup %9415  ;;  %v3112_v13 = vmul.f32 %v3020_v35, %v534_v33  ;;  %v12331_v33 = vld [vmem:[#allocation20_spill] sm:$0xff] }
 0x2c8   : > { %9063 = vmatprep.subr.msk.mxu0 %vm2372_vm1, %v3104_v5  ;;  %v9418_v21 = vpop.eup %9417  ;;  %v3006_v8 = vmul.f32 %v9416_v34, %v10467_v10 }
 0x2c9   : > { %v3658_v45 = vpop.trf.xlu0  ;;  %v9420_v7 = vpop.eup %9419  ;;  %v3018_v23 = vmul.f32 %v9418_v21, %v10525_v48 }
 0x2ca   : > { %9057 = vmatpush3.xpose.msk.msra.mxu1 %vm2372_vm1, %v3098_v56  ;;  %9050 = vmatmul.mubr.msk.f32.vlgmr.msra.gmra.mxu0 %vm2372_vm1, %v3658_v45  ;;  %v527_v56 = vld [vmem:[%s10649_s11 + $0xe0] sm:$0xff]  ;;  %v3028_v59 = vmul.f32 %v9420_v7, %v10518_v31  ;;  %v537_v45 = vld [vmem:[%s10649_s11 + $0x130] sm:$0xff] }
 0x2cb   : > { %9058 = vmatprep.subr.msk.mxu1 %vm2372_vm1, %v3097_v12  ;;  %9064 = vmatpush3.xpose.msk.msra.mxu0 %vm2372_vm1, %v3104_v5  ;;  %v9422_v5 = vpop.eup %9421  ;;  %v3105_v10 = vmul.f32 %v3006_v8, %v527_v56  ;;  %v3111_v48 = vmul.f32 %v3018_v23, %v533_v9  ;;  %v12332_v8 = vld [vmem:[#allocation5_spill] sm:$0xff] }
 0x2cc   : > { %v3782_v29 = vpop.trf.xlu1  ;;  %9065 = vmatprep.subr.msk.mxu0 %vm2372_vm1, %v3103_v19  ;;  %v9424_v38 = vpop.eup %9423  ;;  %v3016_v30 = vmul.f32 %v9422_v5, %v10490_v63  ;;  %v3116_v32 = vmul.f32 %v3028_v59, %v538_v28  ;;  %v12333_v5 = vld [vmem:[#allocation12_spill] sm:$0xff] }
 0x2cd   : > { %9060 = vmatprep.mubr.msk.f32.mxu1 %vm2372_vm1, %v3782_v29  ;;  %v9426_v0 = vpop.eup %9425  ;;  %v3026_v18 = vmul.f32 %v9424_v38, %v10527_v51  ;;  %v545_v38 = vld [vmem:[%s10649_s11 + $0x170] sm:$0xff] }
 0x2ce   : > { %9059 = vmatpush3.xpose.msk.msra.mxu1 %vm2372_vm1, %v3097_v12  ;;  %v9428_v12 = vpop.eup %9427  ;;  %v3110_v63 = vmul.f32 %v3016_v30, %v532_v15  ;;  %v3014_v20 = vmul.f32 %v9426_v0, %v10505_v42  ;;  %v12336_v15 = vld [vmem:[#allocation33_spill] sm:$0xff] }
 0x2cf   : > { %9074 = vmatprep.subr.msk.mxu1 %vm2372_vm1, %v3108_v46  ;;  %9066 = vmatpush3.xpose.msk.msra.mxu0 %vm2372_vm1, %v3103_v19  ;;  %v9430_v52 = vpop.eup %9429  ;;  %v3115_v51 = vmul.f32 %v3026_v18, %v537_v45  ;;  %v3024_v62 = vmul.f32 %v9428_v12, %v10498_v1  ;;  %v12326_v1 = vld [vmem:[#allocation21_spill] sm:$0xff]  ;;  %v544_v45 = vld [vmem:[%s10649_s11 + $0x168] sm:$0xff] }
 0x2d0   : > { %v3783_v57 = vpop.trf.xlu1  ;;  %9067 = vmatprep.subr.msk.mxu0 %vm2372_vm1, %v3102_v54  ;;  %v9432_v25 = vpop.eup %9431  ;;  %v3109_v42 = vmul.f32 %v3014_v20, %v531_v11  ;;  %v3036_v27 = vmul.f32 %v9430_v52, %v12325_v40  ;;  %9447 = vrcp.f32 %v12326_v1  ;;  %v12338_v20 = vld [vmem:[#allocation16_spill] sm:$0xff] }
 0x2d1   : > { %9061 = vmatmul.mubr.msk.f32.vlgmr.msra.gmra.mxu1 %vm2372_vm1, %v3783_v57  ;;  %v9434_v29 = vpop.eup %9433  ;;  %v3022_v41 = vmul.f32 %v9432_v25, %v12327_v55  ;;  %9449 = vrcp.f32 %v12328_v53  ;;  %v12342_v55 = vld [vmem:[#allocation17_spill] sm:$0xff]  ;;  %v12343_v53 = vld [vmem:[#allocation36_spill] sm:$0xff] }
 0x2d2   : > { %9075 = vmatpush3.xpose.msk.msra.mxu1 %vm2372_vm1, %v3108_v46  ;;  %v3114_v46 = vmul.f32 %v3024_v62, %v536_v22  ;;  %v3120_v58 = vmul.f32 %v3036_v27, %v542_v60  ;;  %v3034_v57 = vmul.f32 %v9434_v29, %v12329_v37  ;;  %9451 = vrcp.f32 %v10852_v3  ;;  %v540_v3 = vld [vmem:[%s10649_s11 + $0x148] sm:$0xff]  ;;  %v543_v27 = vld [vmem:[%s10649_s11 + $0x160] sm:$0xff] }
 0x2d3   : > { %9076 = vmatprep.subr.msk.mxu1 %vm2372_vm1, %v3107_v43  ;;  %9068 = vmatpush3.xpose.msk.msra.mxu0 %vm2372_vm1, %v3102_v54  ;;  %v9436_v54 = vpop.eup %9435  ;;  %v3113_v34 = vmul.f32 %v3022_v41, %v535_v47  ;;  %9453 = vrcp.f32 %v12331_v33  ;;  %v12341_v29 = vld [vmem:[#allocation18_spill] sm:$0xff]  ;;  %v554_v47 = vld [vmem:[%s10649_s11 + $0x1b8] sm:$0xff]  ;;  %v12344_v37 = vld [vmem:[#allocation13_spill] sm:$0xff] }
 0x2d4   : > { %9069 = vmatprep.subr.msk.mxu0 %vm2372_vm1, %v3101_v4  ;;  %v3044_v35 = vmul.f32 %v9436_v54, %v12330_v44  ;;  %9455 = vrcp.f32 %v10859_v49  ;;  %v539_v49 = vld [vmem:[%s10649_s11 + $0x140] sm:$0xff]  ;;  %v553_v33 = vld [vmem:[%s10649_s11 + $0x1b0] sm:$0xff] }
 0x2d5   : > { %v3907_v16 = vpop.trf.xlu0 }
 0x2d6   : > { %9077 = vmatpush3.xpose.msk.msra.mxu1 %vm2372_vm1, %v3107_v43  ;;  %9071 = vmatprep.mubr.msk.f32.mxu0 %vm2372_vm1, %v3907_v16  ;;  %v9438_v43 = vpop.eup %9437  ;;  %v546_v16 = vld [vmem:[%s10649_s11 + $0x178] sm:$0xff] }
 0x2d7   : > { %9078 = vmatprep.subr.msk.mxu1 %vm2372_vm1, %v3106_v6  ;;  %9070 = vmatpush3.xpose.msk.msra.mxu0 %vm2372_vm1, %v3101_v4  ;;  %v9440_v21 = vpop.eup %9439  ;;  %v3032_v7 = vmul.f32 %v9438_v43, %v12332_v8  ;;  %v3124_v23 = vmul.f32 %v3044_v35, %v546_v16 }
 0x2d8   : > { %9085 = vmatprep.subr.msk.mxu0 %vm2372_vm1, %v3112_v13  ;;  %v3042_v9 = vmul.f32 %v9440_v21, %v12333_v5 }
 0x2d9   : > { %v3908_v36 = vpop.trf.xlu0  ;;  %v3118_v59 = vmul.f32 %v3032_v7, %v540_v3  ;;  %v12347_v3 = vld [vmem:[#allocation23_spill] sm:$0xff] }
 0x2da   : > { %9079 = vmatpush3.xpose.msk.msra.mxu1 %vm2372_vm1, %v3106_v6  ;;  %9072 = vmatmul.mubr.msk.f32.vlgmr.msra.gmra.mxu0 %vm2372_vm1, %v3908_v36  ;;  %v3119_v6 = vmul.f32 %v3034_v57, %v541_v26  ;;  %v12334_v36 = vld [vmem:[#allocation32_spill] sm:$0xff] }
 0x2db   : > { %9080 = vmatprep.subr.msk.mxu1 %vm2372_vm1, %v3105_v10  ;;  %9086 = vmatpush3.xpose.msk.msra.mxu0 %vm2372_vm1, %v3112_v13  ;;  %v9442_v13 = vpop.eup %9441  ;;  %9457 = vrcp.f32 %v12334_v36 }
 0x2dc   : > { %v4032_v31 = vpop.trf.xlu1  ;;  %9087 = vmatprep.subr.msk.mxu0 %vm2372_vm1, %v3111_v48  ;;  %9459 = vrcp.f32 %v12336_v15 }
 0x2dd   : > { %9082 = vmatprep.mubr.msk.f32.mxu1 %vm2372_vm1, %v4032_v31  ;;  %v3123_v31 = vmul.f32 %v3042_v9, %v545_v38  ;;  %9461 = vrcp.f32 %v10871_v2  ;;  %v552_v9 = vld [vmem:[%s10649_s11 + $0x1a8] sm:$0xff]  ;;  %v558_v38 = vld [vmem:[%s10649_s11 + $0x1d8] sm:$0xff] }
 0x2de   : > { %9081 = vmatpush3.xpose.msk.msra.mxu1 %vm2372_vm1, %v3105_v10  ;;  %v9444_v10 = vpop.eup %9443 }
 0x2df   : > { %9096 = vmatprep.subr.msk.mxu1 %vm2372_vm1, %v3116_v32  ;;  %9088 = vmatpush3.xpose.msk.msra.mxu0 %vm2372_vm1, %v3111_v48  ;;  %v12335_v48 = vld [vmem:[#allocation6_spill] sm:$0xff]  ;;  %v9446_v30 = vpop.eup %9445 }
 0x2e0   : > { %v4033_v19 = vpop.trf.xlu1  ;;  %9089 = vmatprep.subr.msk.mxu0 %vm2372_vm1, %v3110_v63  ;;  %v3030_v28 = vmul.f32 %v9442_v13, %v12335_v48  ;;  %v9448_v12 = vpop.eup %9447  ;;  %v3052_v52 = vmul.f32 %v9446_v30, %v12338_v20  ;;  %v12349_v48 = vld [vmem:[#allocation37_spill] sm:$0xff] }
 0x2e1   : > { %9083 = vmatmul.mubr.msk.f32.vlgmr.msra.gmra.mxu1 %vm2372_vm1, %v4033_v19  ;;  %v9450_v11 = vpop.eup %9449  ;;  %v550_v19 = vld [vmem:[%s10649_s11 + $0x198] sm:$0xff] }
 0x2e2   : > { %9097 = vmatpush3.xpose.msk.msra.mxu1 %vm2372_vm1, %v3116_v32  ;;  %v12337_v32 = vld [vmem:[#allocation7_spill] sm:$0xff]  ;;  %v9452_v40 = vpop.eup %9451  ;;  %v3128_v2 = vmul.f32 %v3052_v52, %v550_v19  ;;  %v3050_v60 = vmul.f32 %v9450_v11, %v12341_v29  ;;  %v556_v29 = vld [vmem:[%s10649_s11 + $0x1c8] sm:$0xff] }
 0x2e3   : > { %9098 = vmatprep.subr.msk.mxu1 %vm2372_vm1, %v3115_v51  ;;  %9090 = vmatpush3.xpose.msk.msra.mxu0 %vm2372_vm1, %v3110_v63  ;;  %v3040_v18 = vmul.f32 %v9444_v10, %v12337_v32  ;;  %v3117_v63 = vmul.f32 %v3030_v28, %v539_v49  ;;  %v9454_v1 = vpop.eup %9453  ;;  %v3060_v41 = vmul.f32 %v9452_v40, %v12342_v55  ;;  %v551_v32 = vld [vmem:[%s10649_s11 + $0x1a0] sm:$0xff]  ;;  %v557_v52 = vld [vmem:[%s10649_s11 + $0x1d0] sm:$0xff]  ;;  %v12353_v40 = vld [vmem:[#allocation24_spill] sm:$0xff] }
 0x2e4   : > { %9091 = vmatprep.subr.msk.mxu0 %vm2372_vm1, %v3109_v42  ;;  %v9456_v54 = vpop.eup %9455  ;;  %v3048_v57 = vmul.f32 %v9454_v1, %v12344_v37 }
 0x2e5   : > { %v4157_v39 = vpop.trf.xlu0  ;;  %v3122_v62 = vmul.f32 %v3040_v18, %v544_v45  ;;  %v12351_v18 = vld [vmem:[#allocation30_spill] sm:$0xff] }
 0x2e6   : > { %9099 = vmatpush3.xpose.msk.msra.mxu1 %vm2372_vm1, %v3115_v51  ;;  %9093 = vmatprep.mubr.msk.f32.mxu0 %vm2372_vm1, %v4157_v39  ;;  %v12339_v51 = vld [vmem:[#allocation34_spill] sm:$0xff] }
 0x2e7   : > { %9100 = vmatprep.subr.msk.mxu1 %vm2372_vm1, %v3114_v46  ;;  %9092 = vmatpush3.xpose.msk.msra.mxu0 %vm2372_vm1, %v3109_v42  ;;  %9463 = vrcp.f32 %v12339_v51  ;;  %v12340_v42 = vld [vmem:[#allocation8_spill] sm:$0xff]  ;;  %v12352_v51 = vld [vmem:[#allocation27_spill] sm:$0xff] }
 0x2e8   : > { %9107 = vmatprep.subr.msk.mxu0 %vm2372_vm1, %v3120_v58  ;;  %v3038_v22 = vmul.f32 %v9448_v12, %v12340_v42  ;;  %9465 = vrcp.f32 %v10878_v61  ;;  %v9458_v43 = vpop.eup %9457 }
 0x2e9   : > { %v4158_v4 = vpop.trf.xlu0  ;;  %9467 = vrcp.f32 %v10874_v14  ;;  %v548_v14 = vld [vmem:[%s10649_s11 + $0x188] sm:$0xff]  ;;  %v9460_v35 = vpop.eup %9459 }
 0x2ea   : > { %9101 = vmatpush3.xpose.msk.msra.mxu1 %vm2372_vm1, %v3114_v46  ;;  %9094 = vmatmul.mubr.msk.f32.vlgmr.msra.gmra.mxu0 %vm2372_vm1, %v4158_v4  ;;  %v549_v46 = vld [vmem:[%s10649_s11 + $0x190] sm:$0xff]  ;;  %v3121_v61 = vmul.f32 %v3038_v22, %v543_v27  ;;  %9469 = vrcp.f32 %v12343_v53  ;;  %v3126_v21 = vmul.f32 %v3048_v57, %v548_v14  ;;  %v9462_v8 = vpop.eup %9461  ;;  %v562_v22 = vld [vmem:[%s10649_s11 + $0x1f8] sm:$0xff]  ;;  %v12356_v57 = vld [vmem:[#allocation25_spill] sm:$0xff] }
 0x2eb   : > { %9102 = vmatprep.subr.msk.mxu1 %vm2372_vm1, %v3113_v34  ;;  %9108 = vmatpush3.xpose.msk.msra.mxu0 %vm2372_vm1, %v3120_v58  ;;  %v3127_v58 = vmul.f32 %v3050_v60, %v549_v46  ;;  %9471 = vrcp.f32 %v10888_v50  ;;  %v12345_v4 = vld [vmem:[#allocation19_spill] sm:$0xff]  ;;  %v547_v50 = vld [vmem:[%s10649_s11 + $0x180] sm:$0xff] }
 0x2ec   : > { %v4282_v56 = vpop.trf.xlu1  ;;  %9109 = vmatprep.subr.msk.mxu0 %vm2372_vm1, %v3119_v6  ;;  %v3058_v44 = vmul.f32 %v9456_v54, %v12345_v4  ;;  %9473 = vrcp.f32 %v10863_v24  ;;  %v12354_v46 = vld [vmem:[#allocation31_spill] sm:$0xff]  ;;  %v12355_v54 = vld [vmem:[#allocation26_spill] sm:$0xff] }
 0x2ed   : > { %9104 = vmatprep.mubr.msk.f32.mxu1 %vm2372_vm1, %v4282_v56  ;;  %9475 = vrcp.f32 %v10867_v17  ;;  %v3056_v56 = vmul.f32 %v9460_v35, %v12347_v3  ;;  %v12348_v17 = vld [vmem:[#allocation28_spill] sm:$0xff]  ;;  %v12357_v35 = vld [vmem:[#allocation29_spill] sm:$0xff] }
 0x2ee   : > { %9103 = vmatpush3.xpose.msk.msra.mxu1 %vm2372_vm1, %v3113_v34  ;;  %v3132_v34 = vmul.f32 %v3060_v41, %v554_v47  ;;  %v3131_v13 = vmul.f32 %v3058_v44, %v553_v33  ;;  %9477 = vrcp.f32 %v12349_v48  ;;  %v561_v41 = vld [vmem:[%s10649_s11 + $0x1f0] sm:$0xff]  ;;  %v559_v33 = vld [vmem:[%s10649_s11 + $0x1e0] sm:$0xff] }
 0x2ef   : > { %9118 = vmatprep.subr.msk.mxu1 %vm2372_vm1, %v3124_v23  ;;  %9110 = vmatpush3.xpose.msk.msra.mxu0 %vm2372_vm1, %v3119_v6  ;;  %v12346_v6 = vld [vmem:[#allocation15_spill] sm:$0xff]  ;;  %v3130_v30 = vmul.f32 %v3056_v56, %v552_v9 }
 0x2f0   : > { %v4283_v0 = vpop.trf.xlu1  ;;  %9111 = vmatprep.subr.msk.mxu0 %vm2372_vm1, %v3118_v59  ;;  %v3046_v16 = vmul.f32 %v9458_v43, %v12346_v6 }
 0x2f1   : > { %9105 = vmatmul.mubr.msk.f32.vlgmr.msra.gmra.mxu1 %vm2372_vm1, %v4283_v0  ;;  %v12350_v0 = vld [vmem:[#allocation14_spill] sm:$0xff] }
 0x2f2   : > { %9119 = vmatpush3.xpose.msk.msra.mxu1 %vm2372_vm1, %v3124_v23  ;;  %v3125_v5 = vmul.f32 %v3046_v16, %v547_v50 }
 0x2f3   : > { %9120 = vmatprep.subr.msk.mxu1 %vm2372_vm1, %v3123_v31  ;;  %9112 = vmatpush3.xpose.msk.msra.mxu0 %vm2372_vm1, %v3118_v59  ;;  %v3068_v59 = vmul.f32 %v9462_v8, %v12348_v17 }
 0x2f4   : > { %9113 = vmatprep.subr.msk.mxu0 %vm2372_vm1, %v3117_v63  ;;  %v9464_v23 = vpop.eup %9463 }
 0x2f5   : > { %v4407_v25 = vpop.trf.xlu0  ;;  %v9466_v10 = vpop.eup %9465  ;;  %v3054_v15 = vmul.f32 %v9464_v23, %v12350_v0  ;;  %v3136_v20 = vmul.f32 %v3068_v59, %v558_v38 }
 0x2f6   : > { %9121 = vmatpush3.xpose.msk.msra.mxu1 %vm2372_vm1, %v3123_v31  ;;  %9115 = vmatprep.mubr.msk.f32.mxu0 %vm2372_vm1, %v4407_v25  ;;  %v9468_v31 = vpop.eup %9467  ;;  %v3066_v12 = vmul.f32 %v9466_v10, %v12351_v18 }
 0x2f7   : > { %9122 = vmatprep.subr.msk.mxu1 %vm2372_vm1, %v3122_v62  ;;  %9114 = vmatpush3.xpose.msk.msra.mxu0 %vm2372_vm1, %v3117_v63  ;;  %v9470_v63 = vpop.eup %9469  ;;  %v3129_v11 = vmul.f32 %v3054_v15, %v551_v32 }
 0x2f8   : > { %9129 = vmatprep.subr.msk.mxu0 %vm2372_vm1, %v3128_v2  ;;  %v9472_v25 = vpop.eup %9471  ;;  %v3135_v42 = vmul.f32 %v3066_v12, %v557_v52 }
 0x2f9   : > { %v4408_v39 = vpop.trf.xlu0  ;;  %v9474_v27 = vpop.eup %9473 }
 0x2fa   : > { %9123 = vmatpush3.xpose.msk.msra.mxu1 %vm2372_vm1, %v3122_v62  ;;  %9116 = vmatmul.mubr.msk.f32.vlgmr.msra.gmra.mxu0 %vm2372_vm1, %v4408_v39  ;;  %v3076_v62 = vmul.f32 %v9468_v31, %v12352_v51  ;;  %v9476_v39 = vpop.eup %9475  ;;  %v3062_v53 = vmul.f32 %v9474_v27, %v12355_v54 }
 0x2fb   : > { %9124 = vmatprep.subr.msk.mxu1 %vm2372_vm1, %v3121_v61  ;;  %9130 = vmatpush3.xpose.msk.msra.mxu0 %vm2372_vm1, %v3128_v2  ;;  %v3064_v2 = vmul.f32 %v9470_v63, %v12353_v40  ;;  %v3072_v43 = vmul.f32 %v9476_v39, %v12356_v57  ;;  %v9478_v14 = vpop.eup %9477 }
 0x2fc   : > { %v4532_v26 = vpop.trf.xlu1  ;;  %9131 = vmatprep.subr.msk.mxu0 %vm2372_vm1, %v3127_v58  ;;  %v3140_v1 = vmul.f32 %v3076_v62, %v562_v22 }
 0x2fd   : > { %9126 = vmatprep.mubr.msk.f32.mxu1 %vm2372_vm1, %v4532_v26  ;;  %v3134_v55 = vmul.f32 %v3064_v2, %v556_v29  ;;  %v9541_v2 = vmov 1983009808   ;;  %v5658_v29 = vlaneseq }
 0x2fe   : > { %9125 = vmatpush3.xpose.msk.msra.mxu1 %vm2372_vm1, %v3121_v61  ;;  %v3074_v61 = vmul.f32 %v9472_v25, %v12354_v46  ;;  %v5656_v27 = vunpack.c.l.s4 %v9541_v2  ;;  %v9542_v46 = vmov 1934713408  }
 0x2ff   : > { %9140 = vmatprep.subr.msk.mxu1 %vm2372_vm1, %v3132_v34  ;;  %9132 = vmatpush3.xpose.msk.msra.mxu0 %vm2372_vm1, %v3127_v58  ;;  %v555_v58 = vld [vmem:[%s10649_s11 + $0x1c0] sm:$0xff] }
 0x300   : > { %v4533_v7 = vpop.trf.xlu1  ;;  %9133 = vmatprep.subr.msk.mxu0 %vm2372_vm1, %v3126_v21  ;;  %v3139_v37 = vmul.f32 %v3074_v61, %v561_v41  ;;  %v3133_v26 = vmul.f32 %v3062_v53, %v555_v58  ;;  %v5720_v61 = vunpack.c.l.s4 %v9542_v46  ;;  %v5657_v39 = vunpack.c.0.s8 %v5656_v27 }
 0x301   : > { %v9007_v24 = vpop.f32.mrf.mxu0  ;;  %9127 = vmatmul.mubr.msk.f32.vlgmr.msra.gmra.mxu1 %vm2372_vm1, %v4533_v7 }
 0x302   : > { %9141 = vmatpush3.xpose.msk.msra.mxu1 %vm2372_vm1, %v3132_v34  ;;  %v560_v34 = vld [vmem:[%s10649_s11 + $0x1e8] sm:$0xff]  ;;  %v5721_v54 = vunpack.c.0.s8 %v5720_v61  ;;  %s9479_s11 = scalar_lea.vmem %s12137_s7, 1024 }
 0x303   : > { %9142 = vmatprep.subr.msk.mxu1 %vm2372_vm1, %v3131_v13  ;;  %v3257_v36 = vpop.f32.mrf.mxu0  ;;  %9134 = vmatpush3.xpose.msk.msra.mxu0 %vm2372_vm1, %v3126_v21  ;;  %v3138_v4 = vmul.f32 %v3072_v43, %v560_v34  ;;  %v3070_v21 = vmul.f32 %v9478_v14, %v12357_v35  ;;  %p9480_p11 = scmp.ne.s32.totalorder %s12137_s7, %s9479_s11 }
 0x304   : > { %5141 = vxpose.xlu0.b32.start [1/2] (short) (narrow) %v3257_v36, 32  ;;  %9135 = vmatprep.subr.msk.mxu0 %vm2372_vm1, %v3125_v5 }
 0x305   : > { %v9018_v28 = vpop.f32.mrf.mxu1  ;;  %v4657_v49 = vpop.trf.xlu0  ;;  %v3137_v6 = vmul.f32 %v3070_v21, %v559_v33  ;;  %p9481_p12 = pnand %p9480_p11, %p9620_p5 }
 0x306   : > { %9143 = vmatpush3.xpose.msk.msra.mxu1 %vm2372_vm1, %v3131_v13  ;;  %9137 = vmatprep.mubr.msk.f32.mxu0 %vm2372_vm1, %v4657_v49 }
 0x307   : > { %9144 = vmatprep.subr.msk.mxu1 %vm2372_vm1, %v3130_v30  ;;  %v3382_v45 = vpop.f32.mrf.mxu1  ;;  %9136 = vmatpush3.xpose.msk.msra.mxu0 %vm2372_vm1, %v3125_v5  ;;  %p9482_p13 = pneg %p9481_p12 }
 0x308   : > { %5173 = vxpose.xlu1.b32.start [1/2] (short) (narrow) %v3382_v45, 32  ;;  %5142 = vxpose.xlu0.b32.end [2/2] (short) (narrow) %v9007_v24, 32 }
 0x309   : > { %9151 = vmatprep.subr.msk.mxu0 %vm2372_vm1, %v3136_v20  ;;  %v4658_v19 = vpop.trf.xlu0 }
 0x30a   : > { %9145 = vmatpush3.xpose.msk.msra.mxu1 %vm2372_vm1, %v3130_v30  ;;  %9138 = vmatmul.mubr.msk.f32.vlgmr.msra.gmra.mxu0 %vm2372_vm1, %v4658_v19 }
 0x30b   : > { %9146 = vmatprep.subr.msk.mxu1 %vm2372_vm1, %v3129_v11  ;;  %9152 = vmatpush3.xpose.msk.msra.mxu0 %vm2372_vm1, %v3136_v20 }
 0x30c   : > { %5174 = vxpose.xlu1.b32.end [2/2] (short) (narrow) %v9018_v28, 32  ;;  %v4782_v60 = vpop.trf.xlu1  ;;  %9153 = vmatprep.subr.msk.mxu0 %vm2372_vm1, %v3135_v42 }
 0x30d   : > { %9148 = vmatprep.mubr.msk.f32.mxu1 %vm2372_vm1, %v4782_v60 }
 0x30e   : > { %9147 = vmatpush3.xpose.msk.msra.mxu1 %vm2372_vm1, %v3129_v11 }
 0x30f   : > { %9162 = vmatprep.subr.msk.mxu1 %vm2372_vm1, %v3140_v1  ;;  %9154 = vmatpush3.xpose.msk.msra.mxu0 %vm2372_vm1, %v3135_v42 }
 0x310   : > { %v4783_v47 = vpop.trf.xlu1  ;;  %9155 = vmatprep.subr.msk.mxu0 %vm2372_vm1, %v3134_v55 }
 0x311   : > { %9149 = vmatmul.mubr.msk.f32.vlgmr.msra.gmra.mxu1 %vm2372_vm1, %v4783_v47 }
 0x312   : > { %9163 = vmatpush3.xpose.msk.msra.mxu1 %vm2372_vm1, %v3140_v1 }
 0x313   : > { %9164 = vmatprep.subr.msk.mxu1 %vm2372_vm1, %v3139_v37  ;;  %9156 = vmatpush3.xpose.msk.msra.mxu0 %vm2372_vm1, %v3134_v55  ;;  %v5659_v55 = vshrl.u32 %v5658_v29, 7 }
 0x314   : > { %9157 = vmatprep.subr.msk.mxu0 %vm2372_vm1, %v3133_v26 }
 0x315   : > { %v4907_v44 = vpop.trf.xlu0  ;;  %v11145_v53 = vsub.s32 %v5657_v39, %v5659_v55  ;;  %v11147_v34 = vsub.s32 %v5721_v54, %v5659_v55 }
 0x316   : > { %9165 = vmatpush3.xpose.msk.msra.mxu1 %vm2372_vm1, %v3139_v37  ;;  %9159 = vmatprep.mubr.msk.f32.mxu0 %vm2372_vm1, %v4907_v44 }
 0x317   : > { %9166 = vmatprep.subr.msk.mxu1 %vm2372_vm1, %v3138_v4  ;;  %9158 = vmatpush3.xpose.msk.msra.mxu0 %vm2372_vm1, %v3133_v26 }
 0x319   : > { %v4908_v16 = vpop.trf.xlu0 }
 0x31a   : > { %9167 = vmatpush3.xpose.msk.msra.mxu1 %vm2372_vm1, %v3138_v4  ;;  %9160 = vmatmul.mubr.msk.f32.vlgmr.msra.gmra.mxu0 %vm2372_vm1, %v4908_v16 }
 0x31b   : > { %9168 = vmatprep.subr.msk.mxu1 %vm2372_vm1, %v3137_v6 }
 0x31c   : > { %v5032_v50 = vpop.trf.xlu1 }
 0x31d   : > { %9170 = vmatprep.mubr.msk.f32.mxu1 %vm2372_vm1, %v5032_v50 }
 0x31e   : > { %9169 = vmatpush3.xpose.msk.msra.mxu1 %vm2372_vm1, %v3137_v6 }
 0x320   : > { %v5033_v8 = vpop.trf.xlu1 }
 0x321   : > { %9171 = vmatmul.mubr.msk.f32.vlgmr.msra.gmra.mxu1 %vm2372_vm1, %v5033_v8 }
 0x37a   : > { %v9029_v7 = vpop.f32.mrf.mxu0 }
 0x37c   : > { %v3507_v24 = vpop.f32.mrf.mxu0 }
 0x37d   : > { %5205 = vxpose.xlu0.b32.start [1/2] (short) (narrow) %v3507_v24, 32 }
 0x380   : > { %v5157_v52 = vpop.trf.xlu0 }
 0x381   : > { %5206 = vxpose.xlu0.b32.end [2/2] (short) (narrow) %v9029_v7, 32  ;;  %v9040_v13 = vpop.f32.mrf.mxu1 }
 0x383   : > { %v3632_v3 = vpop.f32.mrf.mxu1 }
 0x384   : > { %5237 = vxpose.xlu1.b32.start [1/2] (short) (narrow) %v3632_v3, 32  ;;  %v5158_v51 = vpop.trf.xlu0  ;;  %v5189_v62 = vpop.trf.xlu1 }
 0x388   : > { %5238 = vxpose.xlu1.b32.end [2/2] (short) (narrow) %v9040_v13, 32  ;;  %v5159_v25 = vpop.trf.xlu0  ;;  %v5190_v42 = vpop.trf.xlu1 }
 0x38a   : > { %v9051_v56 = vpop.f32.mrf.mxu0 }
 0x38c   : > { %v3757_v23 = vpop.f32.mrf.mxu0  ;;  %v5160_v22 = vpop.trf.xlu0 }
 0x38d   : > { %5269 = vxpose.xlu0.b32.start [1/2] (short) (narrow) %v3757_v23, 32  ;;  %v11141_v40 = vpop.trf.xlu1 }
 0x391   : > { %v9062_v5 = vpop.f32.mrf.mxu1  ;;  %5270 = vxpose.xlu0.b32.end [2/2] (short) (narrow) %v9051_v56, 32  ;;  %v11143_v1 = vpop.trf.xlu1 }
 0x393   : > { %v3882_v9 = vpop.f32.mrf.mxu1 }
 0x394   : > { %5301 = vxpose.xlu1.b32.start [1/2] (short) (narrow) %v3882_v9, 32 }
 0x398   : > { %5302 = vxpose.xlu1.b32.end [2/2] (short) (narrow) %v9062_v5, 32 }
 0x39a   : > { %v9073_v10 = vpop.f32.mrf.mxu0 }
 0x39c   : > { %v4007_v36 = vpop.f32.mrf.mxu0 }
 0x39d   : > { %5333 = vxpose.xlu0.b32.start [1/2] (short) (narrow) %v4007_v36, 32 }
 0x3a1   : > { %v9084_v17 = vpop.f32.mrf.mxu1  ;;  %5334 = vxpose.xlu0.b32.end [2/2] (short) (narrow) %v9073_v10, 32 }
 0x3a3   : > { %v4132_v59 = vpop.f32.mrf.mxu1 }
 0x3a4   : > { %5365 = vxpose.xlu1.b32.start [1/2] (short) (narrow) %v4132_v59, 32 }
 0x3a8   : > { %5366 = vxpose.xlu1.b32.end [2/2] (short) (narrow) %v9084_v17, 32 }
 0x3aa   : > { %v9095_v38 = vpop.f32.mrf.mxu0 }
 0x3ac   : > { %v4257_v48 = vpop.f32.mrf.mxu0 }
 0x3ad   : > { %5397 = vxpose.xlu0.b32.start [1/2] (short) (narrow) %v4257_v48, 32 }
 0x3b1   : > { %v9106_v28 = vpop.f32.mrf.mxu1  ;;  %5398 = vxpose.xlu0.b32.end [2/2] (short) (narrow) %v9095_v38, 32 }
 0x3b3   : > { %v4382_v30 = vpop.f32.mrf.mxu1 }
 0x3b4   : > { %5429 = vxpose.xlu1.b32.start [1/2] (short) (narrow) %v4382_v30, 32 }
 0x3b8   : > { %5430 = vxpose.xlu1.b32.end [2/2] (short) (narrow) %v9106_v28, 32 }
 0x3ba   : > { %v9117_v49 = vpop.f32.mrf.mxu0 }
 0x3bc   : > { %v4507_v0 = vpop.f32.mrf.mxu0 }
 0x3bd   : > { %5461 = vxpose.xlu0.b32.start [1/2] (short) (narrow) %v4507_v0, 32 }
 0x3c1   : > { %v9128_v15 = vpop.f32.mrf.mxu1  ;;  %5462 = vxpose.xlu0.b32.end [2/2] (short) (narrow) %v9117_v49, 32 }
 0x3c3   : > { %v4632_v31 = vpop.f32.mrf.mxu1 }
 0x3c4   : > { %5493 = vxpose.xlu1.b32.start [1/2] (short) (narrow) %v4632_v31, 32 }
 0x3c8   : > { %5494 = vxpose.xlu1.b32.end [2/2] (short) (narrow) %v9128_v15, 32 }
 0x3ca   : > { %v9139_v32 = vpop.f32.mrf.mxu0 }
 0x3cc   : > { %v4757_v18 = vpop.f32.mrf.mxu0 }
 0x3cd   : > { %5525 = vxpose.xlu0.b32.start [1/2] (short) (narrow) %v4757_v18, 32 }
 0x3d1   : > { %v9150_v12 = vpop.f32.mrf.mxu1  ;;  %5526 = vxpose.xlu0.b32.end [2/2] (short) (narrow) %v9139_v32, 32 }
 0x3d3   : > { %v4882_v63 = vpop.f32.mrf.mxu1 }
 0x3d4   : > { %5557 = vxpose.xlu1.b32.start [1/2] (short) (narrow) %v4882_v63, 32 }
 0x3d8   : > { %5558 = vxpose.xlu1.b32.end [2/2] (short) (narrow) %v9150_v12, 32 }
 0x3da   : > { %v9161_v45 = vpop.f32.mrf.mxu0 }
 0x3dc   : > { %v5007_v20 = vpop.f32.mrf.mxu0 }
 0x3dd   : > { %5589 = vxpose.xlu0.b32.start [1/2] (short) (narrow) %v5007_v20, 32 }
 0x3e1   : > { %v9172_v11 = vpop.f32.mrf.mxu1  ;;  %5590 = vxpose.xlu0.b32.end [2/2] (short) (narrow) %v9161_v45, 32 }
 0x3e3   : > { %v5132_v19 = vpop.f32.mrf.mxu1 }
 0x3e4   : > { %5621 = vxpose.xlu1.b32.start [1/2] (short) (narrow) %v5132_v19, 32 }
 0x3e8   : > { %5622 = vxpose.xlu1.b32.end [2/2] (short) (narrow) %v9172_v11, 32 }
 0x3f9   : > { %v5221_v60 = vpop.trf.xlu0 }
 0x3fa   : > { %v5653_v58 = vcombine.low %v5157_v52, %v5221_v60  ;;  %v5654_v47 = vcombine.high %v5157_v52, %v5221_v60 }
 0x3fc   : > { %v5661_v4 = vrot.slane %v5653_v58, %v11145_v53  ;;  %v5668_v44 = vrot.slane %v5654_v47, %v11145_v53 }
 0x3fd   : > { %v5222_v41 = vpop.trf.xlu0 }
 0x3fe   : > { %v5925_v37 = vcombine.low %v5158_v51, %v5222_v41  ;;  %v5926_v33 = vcombine.high %v5158_v51, %v5222_v41 }
 0x400   : > { %v5253_v57 = vpop.trf.xlu1  ;;  %v5933_v6 = vrot.slane %v5925_v37, %v11145_v53  ;;  %v5940_v48 = vrot.slane %v5926_v33, %v11145_v53 }
 0x401   : > { %v5223_v43 = vpop.trf.xlu0  ;;  %v5669_v14 = vcombine.low %v5189_v62, %v5253_v57  ;;  %v5670_v26 = vcombine.high %v5189_v62, %v5253_v57 }
 0x402   : > { %v6197_v16 = vcombine.low %v5159_v25, %v5223_v43  ;;  %v6198_v50 = vcombine.high %v5159_v25, %v5223_v43 }
 0x403   : > { %v5677_v35 = vrot.slane %v5669_v14, %v11145_v53  ;;  %v5684_v21 = vrot.slane %v5670_v26, %v11145_v53 }
 0x404   : > { %v5254_v8 = vpop.trf.xlu1  ;;  %v6205_v28 = vrot.slane %v6197_v16, %v11145_v53  ;;  %v6212_v32 = vrot.slane %v6198_v50, %v11145_v53 }
 0x405   : > { %v5224_v7 = vpop.trf.xlu0  ;;  %v5717_v24 = vcombine.low %v5661_v4, %v5677_v35  ;;  %v5718_v13 = vcombine.high %v5661_v4, %v5677_v35  ;;  %v5733_v3 = vcombine.low %v5668_v44, %v5684_v21  ;;  %v5734_v56 = vcombine.high %v5668_v44, %v5684_v21 }
 0x406   : > { %v5941_v23 = vcombine.low %v5190_v42, %v5254_v8  ;;  %v5942_v5 = vcombine.high %v5190_v42, %v5254_v8  ;;  %v6469_v9 = vcombine.low %v5160_v22, %v5224_v7  ;;  %v6470_v10 = vcombine.high %v5160_v22, %v5224_v7 }
 0x407   : > { %v5725_v36 = vrot.slane %v5717_v24, %v11147_v34  ;;  %v5732_v17 = vrot.slane %v5718_v13, %v11147_v34  ;;  %v5741_v59 = vrot.slane %v5733_v3, %v11147_v34  ;;  %v5748_v38 = vrot.slane %v5734_v56, %v11147_v34 }
 0x408   : > { %v5949_v30 = vrot.slane %v5941_v23, %v11145_v53  ;;  %v5956_v49 = vrot.slane %v5942_v5, %v11145_v53  ;;  %v5255_v0 = vpop.trf.xlu1  ;;  %v6477_v18 = vrot.slane %v6469_v9, %v11145_v53  ;;  %v6484_v19 = vrot.slane %v6470_v10, %v11145_v53 }
 0x409   : > { %v8475_v15 = vcombine.low %v5725_v36, %v5732_v17  ;;  %v8477_v31 = vcombine.high %v5725_v36, %v5732_v17  ;;  %v11164_v12 = vpop.trf.xlu0  ;;  %v8479_v11 = vcombine.low %v5741_v59, %v5748_v38  ;;  %v6213_v51 = vcombine.low %v11141_v40, %v5255_v0 }
 0x40a   : > { %v5989_v63 = vcombine.low %v5933_v6, %v5949_v30  ;;  %v5990_v45 = vcombine.high %v5933_v6, %v5949_v30  ;;  %v6005_v20 = vcombine.low %v5940_v48, %v5956_v49  ;;  %v6006_v52 = vcombine.high %v5940_v48, %v5956_v49 }
 0x40b   : > { %v6214_v62 = vcombine.high %v11141_v40, %v5255_v0  ;;  %v8481_v25 = vcombine.high %v5741_v59, %v5748_v38  ;;  %v6749_v27 = vrot.slane %v8475_v15, %v11145_v53  ;;  %v6221_v29 = vrot.slane %v6213_v51, %v11145_v53 }
 0x40c   : > { %v5997_v42 = vrot.slane %v5989_v63, %v11147_v34  ;;  %v6004_v22 = vrot.slane %v5990_v45, %v11147_v34  ;;  %v5256_v2 = vpop.trf.xlu1  ;;  %v6013_v40 = vrot.slane %v6005_v20, %v11147_v34  ;;  %v6020_v55 = vrot.slane %v6006_v52, %v11147_v34 }
 0x40d   : > { %v6228_v60 = vrot.slane %v6214_v62, %v11145_v53  ;;  %v6485_v46 = vcombine.low %v11143_v1, %v5256_v2  ;;  %v6486_v61 = vcombine.high %v11143_v1, %v5256_v2  ;;  %v11176_v39 = vpop.trf.xlu0  ;;  %v6765_v54 = vrot.slane %v8477_v31, %v11145_v53 }
 0x40e   : > { %v8483_v41 = vcombine.low %v5997_v42, %v6004_v22  ;;  %v6261_v58 = vcombine.low %v6205_v28, %v6221_v29  ;;  %v6262_v47 = vcombine.high %v6205_v28, %v6221_v29  ;;  %v6781_v1 = vrot.slane %v8479_v11, %v11145_v53 }
 0x40f   : > { %v6277_v37 = vcombine.low %v6212_v32, %v6228_v60  ;;  %v6278_v57 = vcombine.high %v6212_v32, %v6228_v60  ;;  %v6493_v43 = vrot.slane %v6485_v46, %v11145_v53  ;;  %v6500_v14 = vrot.slane %v6486_v61, %v11145_v53 }
 0x410   : > { %v11183_v26 = vpop.trf.xlu1  ;;  %v6797_v4 = vrot.slane %v8481_v25, %v11145_v53  ;;  %v6269_v44 = vrot.slane %v6261_v58, %v11147_v34  ;;  %v6276_v35 = vrot.slane %v6262_v47, %v11147_v34  ;;  %v8485_v24 = vcombine.high %v5997_v42, %v6004_v22 }
 0x411   : > { %v6285_v21 = vrot.slane %v6277_v37, %v11147_v34  ;;  %v6292_v33 = vrot.slane %v6278_v57, %v11147_v34  ;;  %v11191_v6 = vpop.trf.xlu0  ;;  %v6533_v16 = vcombine.low %v6477_v18, %v6493_v43  ;;  %v6534_v50 = vcombine.high %v6477_v18, %v6493_v43 }
 0x412   : > { %v6549_v8 = vcombine.low %v6484_v19, %v6500_v14  ;;  %v6550_v7 = vcombine.high %v6484_v19, %v6500_v14  ;;  %v8487_v13 = vcombine.low %v6013_v40, %v6020_v55  ;;  %v8489_v3 = vcombine.high %v6013_v40, %v6020_v55 }
 0x413   : > { %v8491_v56 = vcombine.low %v6269_v44, %v6276_v35  ;;  %v8493_v23 = vcombine.high %v6269_v44, %v6276_v35  ;;  %v8495_v5 = vcombine.low %v6285_v21, %v6292_v33  ;;  %v6541_v9 = vrot.slane %v6533_v16, %v11147_v34 }
 0x414   : > { %v6548_v10 = vrot.slane %v6534_v50, %v11147_v34  ;;  %v11195_v36 = vpop.trf.xlu1  ;;  %v6805_v17 = vcombine.low %v6749_v27, %v6765_v54  ;;  %v6837_v59 = vcombine.low %v6781_v1, %v6797_v4  ;;  %v6806_v48 = vcombine.high %v6749_v27, %v6765_v54 }
 0x415   : > { %v11197_v38 = vpop.trf.xlu0  ;;  %v6838_v28 = vcombine.high %v6781_v1, %v6797_v4  ;;  %v8497_v30 = vcombine.high %v6285_v21, %v6292_v33  ;;  %v6557_v49 = vrot.slane %v6549_v8, %v11147_v34  ;;  %v6564_v0 = vrot.slane %v6550_v7, %v11147_v34 }
 0x416   : > { %v8499_v15 = vcombine.low %v6541_v9, %v6548_v10  ;;  %v11202_v31 = vrot.slane %v6805_v17, %v11147_v34  ;;  %v11205_v32 = vrot.slane %v6837_v59, %v11147_v34  ;;  %v11208_v18 = vrot.slane %v6806_v48, %v11147_v34 }
 0x417   : > { %v11211_v63 = vrot.slane %v6838_v28, %v11147_v34  ;;  %v6885_v45 = vrot.slane %v8483_v41, %v11145_v53  ;;  %v6901_v20 = vrot.slane %v8485_v24, %v11145_v53  ;;  %v11216_v52 = vrot.slane %v8487_v13, %v11145_v53 }
 0x418   : > { %12358 = vst [vmem:[#allocation9_spill] sm:$0xff] %v11202_v31  ;;  %12359 = vst [vmem:[#allocation21_spill] sm:$0xff] %v11205_v32  ;;  %v11219_v11 = vrot.slane %v8489_v3, %v11145_v53  ;;  %v11221_v19 = vpop.trf.xlu1  ;;  %v8501_v51 = vcombine.high %v6541_v9, %v6548_v10  ;;  %v6870_v62 = vcombine.high %v11202_v31, %v11205_v32 }
 0x419   : > { %v5349_v25 = vpop.trf.xlu0  ;;  %v7021_v42 = vrot.slane %v8491_v56, %v11145_v53  ;;  %v7037_v22 = vrot.slane %v8493_v23, %v11145_v53  ;;  %v8503_v2 = vcombine.low %v6557_v49, %v6564_v0  ;;  %v8505_v27 = vcombine.high %v6557_v49, %v6564_v0 }
 0x41a   : > { %v6941_v29 = vcombine.low %v6885_v45, %v6901_v20  ;;  %v6973_v60 = vcombine.low %v11216_v52, %v11219_v11  ;;  %7833 = vrot.lane.b32.xlu0 %v6870_v62, %s9543_s6  ;;  %v7053_v46 = vrot.slane %v8495_v5, %v11145_v53  ;;  %v7069_v61 = vrot.slane %v8497_v30, %v11145_v53 }
 0x41b   : > { %v7078_v40 = vcombine.high %v7021_v42, %v7037_v22  ;;  %v7077_v55 = vcombine.low %v7021_v42, %v7037_v22  ;;  %v6871_v41 = vcombine.low %v11208_v18, %v11211_v63  ;;  %v5685_v47 = vcombine.low %v11164_v12, %v5349_v25 }
 0x41c   : > { %v11235_v54 = vrot.slane %v6941_v29, %v11147_v34  ;;  %v11238_v58 = vrot.slane %v6973_v60, %v11147_v34  ;;  %v11241_v37 = vpop.trf.xlu1  ;;  %v7110_v43 = vcombine.high %v7053_v46, %v7069_v61  ;;  %v7109_v1 = vcombine.low %v7053_v46, %v7069_v61 }
 0x41d   : > { %v11244_v57 = vrot.slane %v7078_v40, %v11147_v34  ;;  %v11247_v14 = vrot.slane %v7077_v55, %v11147_v34  ;;  %v5350_v4 = vpop.trf.xlu0  ;;  %v5686_v35 = vcombine.high %v11164_v12, %v5349_v25  ;;  %v11254_v33 = vrot.slane %v8499_v15, %v11145_v53 }
 0x41e   : > { %12360 = vst [vmem:[#allocation22_spill] sm:$0xff] %v11235_v54  ;;  %12361 = vst [vmem:[#allocation35_spill] sm:$0xff] %v11238_v58  ;;  %v7006_v44 = vcombine.high %v11235_v54, %v11238_v58  ;;  %v5957_v21 = vcombine.low %v11176_v39, %v5350_v4  ;;  %7849 = vrot.lane.b32.xlu0 %v6871_v41, %s9544_s12  ;;  %v11258_v16 = vrot.slane %v7110_v43, %v11147_v34 }
 0x41f   : > { %12362 = vst [vmem:[#allocation11_spill] sm:$0xff] %v11247_v14  ;;  %v11261_v50 = vrot.slane %v7109_v1, %v11147_v34  ;;  %v11264_v8 = vrot.slane %v8501_v51, %v11145_v53  ;;  %v11267_v7 = vrot.slane %v8503_v2, %v11145_v53  ;;  %v5693_v12 = vrot.slane %v5685_v47, %v11145_v53 }
 0x420   : > { %7835 = vrot.lane.b32.xlu1 %v7006_v44, %s9543_s6  ;;  %v5958_v24 = vcombine.high %v11176_v39, %v5350_v4  ;;  %v11273_v13 = vrot.slane %v8505_v27, %v11145_v53  ;;  %v5381_v3 = vpop.trf.xlu1  ;;  %v6942_v56 = vcombine.high %v6885_v45, %v6901_v20  ;;  %v7143_v23 = vcombine.low %v11244_v57, %v11258_v16 }
 0x421   : > { %12363 = vst [vmem:[#allocation10_spill] sm:$0xff] %v11261_v50  ;;  %v7142_v5 = vcombine.high %v11247_v14, %v11261_v50  ;;  %v7213_v9 = vcombine.low %v11254_v33, %v11264_v8  ;;  %v5701_v10 = vcombine.low %v11183_v26, %v5381_v3  ;;  %v11282_v17 = vpop.trf.xlu0  ;;  %v5700_v39 = vrot.slane %v5686_v35, %v11145_v53 }
 0x422   : > { %v5965_v59 = vrot.slane %v5957_v21, %v11145_v53  ;;  %v7245_v48 = vcombine.low %v11267_v7, %v11273_v13  ;;  %v5702_v28 = vcombine.high %v11183_v26, %v5381_v3  ;;  %7853 = vrot.lane.b32.xlu0 %v7143_v23, %s9544_s12  ;;  %v11295_v0 = vrot.slane %v6942_v56, %v11147_v34 }
 0x423   : > { %v11291_v30 = vrot.slane %v7213_v9, %v11147_v34  ;;  %v5709_v49 = vrot.slane %v5701_v10, %v11145_v53  ;;  %v6974_v15 = vcombine.high %v11216_v52, %v11219_v11  ;;  %v5972_v45 = vrot.slane %v5958_v24, %v11145_v53 }
 0x424   : > { %7837 = vrot.lane.b32.xlu1 %v7142_v5, %s9543_s6  ;;  %v11302_v20 = vrot.slane %v7245_v48, %v11147_v34  ;;  %v5716_v26 = vrot.slane %v5702_v28, %v11145_v53  ;;  %v6229_v51 = vcombine.low %v11191_v6, %v11282_v17  ;;  %v5382_v62 = vpop.trf.xlu1 }
 0x425   : > { %12364 = vst [vmem:[#allocation20_spill] sm:$0xff] %v11291_v30  ;;  %v5749_v25 = vcombine.low %v5693_v12, %v5709_v49  ;;  %v5750_v42 = vcombine.high %v5693_v12, %v5709_v49  ;;  %v11308_v22 = vrot.slane %v6974_v15, %v11147_v34  ;;  %v5973_v52 = vcombine.low %v11195_v36, %v5382_v62  ;;  %v5352_v11 = vpop.trf.xlu0 }
 0x426   : > { %12365 = vst [vmem:[#allocation5_spill] sm:$0xff] %v11302_v20  ;;  %v7278_v2 = vcombine.high %v11291_v30, %v11302_v20  ;;  %v5765_v27 = vcombine.low %v5700_v39, %v5716_v26  ;;  %v5766_v29 = vcombine.high %v5700_v39, %v5716_v26  ;;  %v5974_v60 = vcombine.high %v11195_v36, %v5382_v62 }
 0x427   : > { %v5757_v46 = vrot.slane %v5749_v25, %v11147_v34  ;;  %v5764_v61 = vrot.slane %v5750_v42, %v11147_v34  ;;  %v7007_v40 = vcombine.low %v11295_v0, %v11308_v22  ;;  %v5981_v55 = vrot.slane %v5973_v52, %v11145_v53 }
 0x428   : > { %7839 = vrot.lane.b32.xlu1 %v7278_v2, %s9543_s6  ;;  %v5773_v41 = vrot.slane %v5765_v27, %v11147_v34  ;;  %v5780_v47 = vrot.slane %v5766_v29, %v11147_v34  ;;  %v5988_v43 = vrot.slane %v5974_v60, %v11145_v53  ;;  %v6501_v1 = vcombine.low %v11197_v38, %v5352_v11  ;;  %v5383_v36 = vpop.trf.xlu1 }
 0x429   : > { %v8476_v4 = vcombine.low %v5757_v46, %v5764_v61  ;;  %v8478_v44 = vcombine.high %v5757_v46, %v5764_v61  ;;  %v6021_v35 = vcombine.low %v5965_v59, %v5981_v55  ;;  %v6022_v21 = vcombine.high %v5965_v59, %v5981_v55  ;;  %v11324_v12 = vpop.trf.xlu0 }
 0x42a   : > { %v8480_v24 = vcombine.low %v5773_v41, %v5780_v47  ;;  %v8482_v3 = vcombine.high %v5773_v41, %v5780_v47  ;;  %v6037_v56 = vcombine.low %v5972_v45, %v5988_v43  ;;  %v6038_v23 = vcombine.high %v5972_v45, %v5988_v43 }
 0x42b   : > { %v11327_v5 = vrot.slane %v6021_v35, %v11147_v34  ;;  %v11330_v9 = vrot.slane %v6022_v21, %v11147_v34  ;;  %v6237_v48 = vrot.slane %v6229_v51, %v11145_v53  ;;  %v6502_v15 = vcombine.high %v11197_v38, %v5352_v11 }
 0x42c   : > { %7851 = vrot.lane.b32.xlu1 %v7007_v40, %s9544_s12  ;;  %v11334_v10 = vrot.slane %v6037_v56, %v11147_v34  ;;  %v11337_v39 = vrot.slane %v6038_v23, %v11147_v34  ;;  %v5384_v59 = vpop.trf.xlu1  ;;  %v7214_v25 = vcombine.high %v11254_v33, %v11264_v8  ;;  %v7246_v51 = vcombine.high %v11267_v7, %v11273_v13 }
 0x42d   : > { %v8484_v28 = vcombine.low %v11327_v5, %v11330_v9  ;;  %v8486_v49 = vcombine.high %v11327_v5, %v11330_v9  ;;  %v11345_v45 = vpop.trf.xlu0  ;;  %v11356_v42 = vrot.slane %v8476_v4, %v11145_v53  ;;  %v11359_v52 = vrot.slane %v8478_v44, %v11145_v53 }
 0x42e   : > { %v8488_v26 = vcombine.low %v11334_v10, %v11337_v39  ;;  %v8490_v62 = vcombine.high %v11334_v10, %v11337_v39  ;;  %v11362_v38 = vrot.slane %v8480_v24, %v11145_v53  ;;  %v6245_v11 = vcombine.low %v11221_v19, %v5383_v36 }
 0x42f   : > { %v11366_v2 = vrot.slane %v8482_v3, %v11145_v53  ;;  %v6509_v27 = vrot.slane %v6501_v1, %v11145_v53  ;;  %v11370_v33 = vrot.slane %v7214_v25, %v11147_v34  ;;  %v11373_v8 = vrot.slane %v7246_v51, %v11147_v34 }
 0x430   : > { %v11375_v7 = vpop.trf.xlu1  ;;  %v6516_v13 = vrot.slane %v6502_v15, %v11145_v53  ;;  %v6253_v29 = vrot.slane %v6245_v11, %v11145_v53  ;;  %v6517_v60 = vcombine.low %v11241_v37, %v5384_v59  ;;  %v6518_v46 = vcombine.high %v11241_v37, %v5384_v59 }
 0x431   : > { %v11381_v61 = vpop.trf.xlu0  ;;  %v7279_v40 = vcombine.low %v11370_v33, %v11373_v8  ;;  %v6246_v43 = vcombine.high %v11221_v19, %v5383_v36  ;;  %v6821_v24 = vcombine.low %v11356_v42, %v11359_v52  ;;  %v6853_v3 = vcombine.low %v11362_v38, %v11366_v2 }
 0x432   : > { %v6293_v1 = vcombine.low %v6237_v48, %v6253_v29  ;;  %v6294_v4 = vcombine.high %v6237_v48, %v6253_v29  ;;  %v6525_v37 = vrot.slane %v6517_v60, %v11145_v53  ;;  %v6532_v44 = vrot.slane %v6518_v46, %v11145_v53 }
 0x433   : > { %7855 = vrot.lane.b32.xlu1 %v7279_v40, %s9544_s12  ;;  %v6230_v19 = vcombine.high %v11191_v6, %v11282_v17  ;;  %v6260_v10 = vrot.slane %v6246_v43, %v11145_v53  ;;  %v11422_v11 = vrot.slane %v8484_v28, %v11145_v53  ;;  %v11425_v40 = vrot.slane %v8486_v49, %v11145_v53 }
 0x434   : > { %v11395_v35 = vpop.trf.xlu1  ;;  %v6565_v56 = vcombine.low %v6509_v27, %v6525_v37  ;;  %v6566_v23 = vcombine.high %v6509_v27, %v6525_v37  ;;  %v6581_v5 = vcombine.low %v6516_v13, %v6532_v44  ;;  %v6582_v9 = vcombine.high %v6516_v13, %v6532_v44 }
 0x435   : > { %v11405_v36 = vpop.trf.xlu0  ;;  %v11409_v39 = vrot.slane %v6293_v1, %v11147_v34  ;;  %v11412_v59 = vrot.slane %v6294_v4, %v11147_v34  ;;  %v6244_v51 = vrot.slane %v6230_v19, %v11145_v53  ;;  %12366 = vst [vmem:[#allocation12_spill] sm:$0xff] %v11422_v11  ;;  %12367 = vst [vmem:[#allocation32_spill] sm:$0xff] %v11425_v40 }
 0x436   : > { %v6573_v48 = vrot.slane %v6565_v56, %v11147_v34  ;;  %v6580_v15 = vrot.slane %v6566_v23, %v11147_v34  ;;  %v6589_v6 = vrot.slane %v6581_v5, %v11147_v34  ;;  %v6596_v17 = vrot.slane %v6582_v9, %v11147_v34 }
 0x437   : > { %v11428_v43 = vrot.slane %v8488_v26, %v11145_v53  ;;  %v11431_v1 = vrot.slane %v8490_v62, %v11145_v53  ;;  %v6309_v4 = vcombine.low %v6244_v51, %v6260_v10  ;;  %v6310_v37 = vcombine.high %v6244_v51, %v6260_v10 }
 0x438   : > { %v11418_v25 = vpop.trf.xlu1  ;;  %v8500_v13 = vcombine.low %v6573_v48, %v6580_v15  ;;  %v8502_v29 = vcombine.high %v6573_v48, %v6580_v15  ;;  %v8504_v60 = vcombine.low %v6589_v6, %v6596_v17  ;;  %v8506_v46 = vcombine.high %v6589_v6, %v6596_v17 }
 0x439   : > { %v5477_v27 = vpop.trf.xlu0  ;;  %12368 = vst [vmem:[#allocation6_spill] sm:$0xff] %v11428_v43  ;;  %12369 = vst [vmem:[#allocation33_spill] sm:$0xff] %v11431_v1  ;;  %v8492_v28 = vcombine.low %v11409_v39, %v11412_v59  ;;  %v11445_v23 = vrot.slane %v6821_v24, %v11147_v34  ;;  %v11448_v62 = vrot.slane %v6853_v3, %v11147_v34 }
 0x43a   : > { %v11436_v44 = vrot.slane %v8500_v13, %v11145_v53  ;;  %v11439_v19 = vrot.slane %v8502_v29, %v11145_v53  ;;  %v5789_v49 = vcombine.low %v11324_v12, %v5477_v27  ;;  %v11451_v5 = vrot.slane %v8504_v60, %v11145_v53 }
 0x43b   : > { %v11454_v9 = vrot.slane %v8506_v46, %v11145_v53  ;;  %v5790_v10 = vcombine.high %v11324_v12, %v5477_v27  ;;  %v6957_v24 = vcombine.low %v11422_v11, %v11425_v40  ;;  %v6989_v3 = vcombine.low %v11428_v43, %v11431_v1 }
 0x43c   : > { %v11441_v56 = vpop.trf.xlu1  ;;  %v11467_v17 = vrot.slane %v6309_v4, %v11147_v34  ;;  %v11470_v51 = vrot.slane %v6310_v37, %v11147_v34  ;;  %v11473_v12 = vrot.slane %v8492_v28, %v11145_v53  ;;  %v5797_v37 = vrot.slane %v5789_v49, %v11145_v53 }
 0x43d   : > { %v5478_v26 = vpop.trf.xlu0  ;;  %v11480_v15 = vrot.slane %v6957_v24, %v11147_v34  ;;  %v11483_v4 = vrot.slane %v6989_v3, %v11147_v34  ;;  %v5804_v28 = vrot.slane %v5790_v10, %v11145_v53  ;;  %v12374_v11 = vcombine.high %v11409_v39, %v11412_v59 }
 0x43e   : > { %v6061_v48 = vcombine.low %v11345_v45, %v5478_v26  ;;  %12370 = vst [vmem:[#allocation7_spill] sm:$0xff] %v11473_v12  ;;  %v6062_v21 = vcombine.high %v11345_v45, %v5478_v26 }
 0x43f   : > { %v11622_v40 = vrot.slane %v12374_v11, %v11145_v53 }
 0x440   : > { %v5509_v13 = vpop.trf.xlu1  ;;  %v6069_v41 = vrot.slane %v6061_v48, %v11145_v53 }
 0x441   : > { %v5805_v29 = vcombine.low %v11375_v7, %v5509_v13  ;;  %v5806_v60 = vcombine.high %v11375_v7, %v5509_v13  ;;  %v5479_v46 = vpop.trf.xlu0  ;;  %12375 = vst [vmem:[#allocation18_spill] sm:$0xff] %v11622_v40 }
 0x442   : > { %v6333_v3 = vcombine.low %v11381_v61, %v5479_v46  ;;  %v6334_v49 = vcombine.high %v11381_v61, %v5479_v46 }
 0x443   : > { %v5813_v47 = vrot.slane %v5805_v29, %v11145_v53  ;;  %v5820_v55 = vrot.slane %v5806_v60, %v11145_v53 }
 0x444   : > { %v5510_v13 = vpop.trf.xlu1 }
 0x445   : > { %v5853_v10 = vcombine.low %v5797_v37, %v5813_v47  ;;  %v5854_v48 = vcombine.high %v5797_v37, %v5813_v47  ;;  %v5869_v29 = vcombine.low %v5804_v28, %v5820_v55  ;;  %v5870_v60 = vcombine.high %v5804_v28, %v5820_v55  ;;  %v5480_v6 = vpop.trf.xlu0 }
 0x446   : > { %v6077_v7 = vcombine.low %v11395_v35, %v5510_v13  ;;  %v6078_v24 = vcombine.high %v11395_v35, %v5510_v13  ;;  %v6605_v27 = vcombine.low %v11405_v36, %v5480_v6  ;;  %v6606_v61 = vcombine.high %v11405_v36, %v5480_v6 }
 0x447   : > { %v5861_v46 = vrot.slane %v5853_v10, %v11147_v34  ;;  %v5868_v45 = vrot.slane %v5854_v48, %v11147_v34  ;;  %v5877_v30 = vrot.slane %v5869_v29, %v11147_v34  ;;  %v5884_v26 = vrot.slane %v5870_v60, %v11147_v34 }
 0x448   : > { %v6076_v47 = vrot.slane %v6062_v21, %v11145_v53  ;;  %v6341_v55 = vrot.slane %v6333_v3, %v11145_v53  ;;  %v6085_v37 = vrot.slane %v6077_v7, %v11145_v53  ;;  %v6092_v35 = vrot.slane %v6078_v24, %v11145_v53  ;;  %v5511_v28 = vpop.trf.xlu1 }
 0x449   : > { %v8507_v13 = vcombine.low %v5861_v46, %v5868_v45  ;;  %v8509_v20 = vcombine.high %v5861_v46, %v5868_v45  ;;  %v8511_v36 = vcombine.low %v5877_v30, %v5884_v26  ;;  %v8513_v6 = vcombine.high %v5877_v30, %v5884_v26  ;;  %v11513_v10 = vpop.trf.xlu0 }
 0x44a   : > { %v6125_v48 = vcombine.low %v6069_v41, %v6085_v37  ;;  %v6126_v54 = vcombine.high %v6069_v41, %v6085_v37  ;;  %v6141_v29 = vcombine.low %v6076_v47, %v6092_v35  ;;  %v6142_v58 = vcombine.high %v6076_v47, %v6092_v35 }
 0x44b   : > { %v11516_v60 = vrot.slane %v8507_v13, %v11145_v53  ;;  %v6348_v21 = vrot.slane %v6334_v49, %v11145_v53  ;;  %v6613_v7 = vrot.slane %v6605_v27, %v11145_v53  ;;  %v6620_v24 = vrot.slane %v6606_v61, %v11145_v53 }
 0x44c   : > { %v6133_v3 = vrot.slane %v6125_v48, %v11147_v34  ;;  %v6140_v45 = vrot.slane %v6126_v54, %v11147_v34  ;;  %v6149_v30 = vrot.slane %v6141_v29, %v11147_v34  ;;  %v6156_v26 = vrot.slane %v6142_v58, %v11147_v34  ;;  %v5512_v41 = vpop.trf.xlu1 }
 0x44d   : > { %v6349_v46 = vcombine.low %v11418_v25, %v5511_v28  ;;  %v6350_v47 = vcombine.high %v11418_v25, %v5511_v28  ;;  %v6621_v37 = vcombine.low %v11441_v56, %v5512_v41  ;;  %v6622_v49 = vcombine.high %v11441_v56, %v5512_v41  ;;  %v11529_v27 = vpop.trf.xlu0 }
 0x44e   : > { %v11532_v61 = vrot.slane %v8509_v20, %v11145_v53  ;;  %v11535_v54 = vrot.slane %v8511_v36, %v11145_v53  ;;  %v11538_v35 = vrot.slane %v8513_v6, %v11145_v53  ;;  %v8515_v58 = vcombine.low %v6133_v3, %v6140_v45 }
 0x44f   : > { %v6357_v13 = vrot.slane %v6349_v46, %v11145_v53  ;;  %v6364_v25 = vrot.slane %v6350_v47, %v11145_v53  ;;  %v6629_v28 = vrot.slane %v6621_v37, %v11145_v53  ;;  %v6636_v56 = vrot.slane %v6622_v49, %v11145_v53 }
 0x450   : > { %v11545_v48 = vrot.slane %v8515_v58, %v11145_v53  ;;  %v8517_v20 = vcombine.high %v6133_v3, %v6140_v45  ;;  %v8519_v29 = vcombine.low %v6149_v30, %v6156_v26  ;;  %v8521_v41 = vcombine.high %v6149_v30, %v6156_v26  ;;  %v11547_v36 = vpop.trf.xlu1 }
 0x451   : > { %v6397_v14 = vcombine.low %v6341_v55, %v6357_v13  ;;  %v6398_v6 = vcombine.high %v6341_v55, %v6357_v13  ;;  %v6413_v50 = vcombine.low %v6348_v21, %v6364_v25  ;;  %v6414_v32 = vcombine.high %v6348_v21, %v6364_v25  ;;  %v11549_v31 = vpop.trf.xlu0 }
 0x452   : > { %v6669_v46 = vcombine.low %v6613_v7, %v6629_v28  ;;  %v6670_v47 = vcombine.high %v6613_v7, %v6629_v28  ;;  %v6685_v43 = vcombine.low %v6620_v24, %v6636_v56  ;;  %v6686_v37 = vcombine.high %v6620_v24, %v6636_v56 }
 0x453   : > { %v6405_v49 = vrot.slane %v6397_v14, %v11147_v34  ;;  %v6412_v58 = vrot.slane %v6398_v6, %v11147_v34  ;;  %v6421_v3 = vrot.slane %v6413_v50, %v11147_v34  ;;  %v6428_v45 = vrot.slane %v6414_v32, %v11147_v34 }
 0x454   : > { %v6677_v30 = vrot.slane %v6669_v46, %v11147_v34  ;;  %v6684_v55 = vrot.slane %v6670_v47, %v11147_v34  ;;  %v6693_v21 = vrot.slane %v6685_v43, %v11147_v34  ;;  %v6700_v26 = vrot.slane %v6686_v37, %v11147_v34  ;;  %v11559_v13 = vpop.trf.xlu1 }
 0x455   : > { %v7445_v7 = vrot.slane %v8517_v20, %v11145_v53  ;;  %v8523_v24 = vcombine.low %v6405_v49, %v6412_v58  ;;  %v8525_v14 = vcombine.high %v6405_v49, %v6412_v58  ;;  %v8527_v25 = vcombine.low %v6421_v3, %v6428_v45  ;;  %v11562_v28 = vpop.trf.xlu0 }
 0x456   : > { %v7461_v50 = vrot.slane %v8519_v29, %v11145_v53  ;;  %v7477_v32 = vrot.slane %v8521_v41, %v11145_v53  ;;  %v8529_v56 = vcombine.high %v6421_v3, %v6428_v45  ;;  %v8531_v6 = vcombine.low %v6677_v30, %v6684_v55 }
 0x457   : > { %v8496_v43 = vcombine.low %v11467_v17, %v11470_v51  ;;  %v8498_v46 = vcombine.high %v11467_v17, %v11470_v51  ;;  %v8533_v47 = vcombine.high %v6677_v30, %v6684_v55  ;;  %v8535_v37 = vcombine.low %v6693_v21, %v6700_v26 }
 0x458   : > { %v11571_v20 = vrot.slane %v8523_v24, %v11145_v53  ;;  %v7581_v49 = vrot.slane %v8525_v14, %v11145_v53  ;;  %v7597_v58 = vrot.slane %v8527_v25, %v11145_v53  ;;  %v8537_v29 = vcombine.high %v6693_v21, %v6700_v26  ;;  %v11575_v1 = vpop.trf.xlu1 }
 0x459   : > { %v7349_v41 = vcombine.low %v11516_v60, %v11532_v61  ;;  %v7381_v3 = vcombine.low %v11535_v54, %v11538_v35  ;;  %v7350_v17 = vcombine.high %v11516_v60, %v11532_v61  ;;  %v7382_v51 = vcombine.high %v11535_v54, %v11538_v35  ;;  %v5605_v45 = vpop.trf.xlu0 }
 0x45a   : > { %v7613_v30 = vrot.slane %v8529_v56, %v11145_v53  ;;  %v7701_v55 = vrot.slane %v8531_v6, %v11145_v53  ;;  %v7485_v21 = vcombine.low %v11545_v48, %v7445_v7  ;;  %v7517_v26 = vcombine.low %v7461_v50, %v7477_v32 }
 0x45b   : > { %v7717_v24 = vrot.slane %v8533_v47, %v11145_v53  ;;  %v7733_v14 = vrot.slane %v8535_v37, %v11145_v53  ;;  %v11591_v25 = vrot.slane %v7349_v41, %v11147_v34  ;;  %v11594_v60 = vrot.slane %v7381_v3, %v11147_v34 }
 0x45c   : > { %v7749_v61 = vrot.slane %v8537_v29, %v11145_v53  ;;  %v11598_v54 = vrot.slane %v7350_v17, %v11147_v34  ;;  %v11601_v35 = vrot.slane %v7485_v21, %v11147_v34  ;;  %v11604_v56 = vrot.slane %v7517_v26, %v11147_v34  ;;  %v11606_v6 = vpop.trf.xlu1 }
 0x45d   : > { %12371 = vst [vmem:[#allocation16_spill] sm:$0xff] %v11591_v25  ;;  %v7414_v47 = vcombine.high %v11591_v25, %v11594_v60  ;;  %v11611_v37 = vrot.slane %v7382_v51, %v11147_v34  ;;  %v7486_v41 = vcombine.high %v11545_v48, %v7445_v7  ;;  %v7518_v29 = vcombine.high %v7461_v50, %v7477_v32  ;;  %v11632_v50 = vpop.trf.xlu0 }
 0x45e   : > { %12372 = vst [vmem:[#allocation34_spill] sm:$0xff] %v11601_v35  ;;  %12373 = vst [vmem:[#allocation8_spill] sm:$0xff] %v11604_v56  ;;  %v7550_v3 = vcombine.high %v11601_v35, %v11604_v56  ;;  %v5821_v17 = vcombine.low %v11513_v10, %v5605_v45  ;;  %v7621_v21 = vcombine.low %v11571_v20, %v7581_v49 }
 0x45f   : > { %v7653_v26 = vcombine.low %v7597_v58, %v7613_v30  ;;  %7945 = vrot.lane.b32.xlu0 %v7414_v47, %s9543_s6  ;;  %v5822_v51 = vcombine.high %v11513_v10, %v5605_v45  ;;  %v11627_v48 = vrot.slane %v7486_v41, %v11147_v34  ;;  %v11630_v7 = vrot.slane %v7518_v29, %v11147_v34 }
 0x460   : > { %v11635_v32 = vrot.slane %v8496_v43, %v11145_v53  ;;  %v11638_v35 = vrot.slane %v8498_v46, %v11145_v53  ;;  %7947 = vrot.lane.b32.xlu1 %v7550_v3, %s9543_s6  ;;  %v11642_v39 = vrot.slane %v7621_v21, %v11147_v34  ;;  %v5637_v11 = vpop.trf.xlu1  ;;  %v7415_v10 = vcombine.low %v11598_v54, %v11611_v37 }
 0x461   : > { %v11645_v59 = vrot.slane %v7653_v26, %v11147_v34  ;;  %v7622_v45 = vcombine.high %v11571_v20, %v7581_v49  ;;  %v7654_v47 = vcombine.high %v7597_v58, %v7613_v30  ;;  %v7757_v43 = vcombine.low %v7701_v55, %v7717_v24 }
 0x462   : > { %12376 = vst [vmem:[#allocation17_spill] sm:$0xff] %v11635_v32  ;;  %12377 = vst [vmem:[#allocation36_spill] sm:$0xff] %v11638_v35  ;;  %v5829_v41 = vrot.slane %v5821_v17, %v11145_v53  ;;  %v7551_v46 = vcombine.low %v11627_v48, %v11630_v7  ;;  %v7789_v29 = vcombine.low %v7733_v14, %v7749_v61 }
 0x463   : > { %12378 = vst [vmem:[#allocation13_spill] sm:$0xff] %v11642_v39  ;;  %12379 = vst [vmem:[#allocation19_spill] sm:$0xff] %v11645_v59  ;;  %v5837_v3 = vcombine.low %v11547_v36, %v5637_v11  ;;  %7961 = vrot.lane.b32.xlu0 %v7415_v10, %s9544_s12  ;;  %v5836_v21 = vrot.slane %v5822_v51, %v11145_v53  ;;  %v7686_v26 = vcombine.high %v11642_v39, %v11645_v59 }
 0x464   : > { %v11659_v56 = vrot.slane %v7757_v43, %v11147_v34  ;;  %v5838_v20 = vcombine.high %v11547_v36, %v5637_v11  ;;  %7963 = vrot.lane.b32.xlu1 %v7551_v46, %s9544_s12  ;;  %v6093_v49 = vcombine.low %v11529_v27, %v11632_v50  ;;  %v11666_v58 = vrot.slane %v7789_v29, %v11147_v34  ;;  %v5638_v51 = vpop.trf.xlu1  ;;  %v5607_v11 = vpop.trf.xlu0 }
 0x465   : > { %v5845_v30 = vrot.slane %v5837_v3, %v11145_v53  ;;  %v7758_v17 = vcombine.high %v7701_v55, %v7717_v24  ;;  %v11670_v10 = vrot.slane %v7622_v45, %v11147_v34  ;;  %v11673_v43 = vrot.slane %v7654_v47, %v11147_v34 }
 0x466   : > { %v5852_v36 = vrot.slane %v5838_v20, %v11145_v53  ;;  %v7790_v46 = vcombine.high %v7733_v14, %v7749_v61  ;;  %v7822_v39 = vcombine.high %v11659_v56, %v11666_v58  ;;  %v6109_v47 = vcombine.low %v11559_v13, %v5638_v51 }
 0x467   : > { %v5885_v59 = vcombine.low %v5829_v41, %v5845_v30  ;;  %v5886_v29 = vcombine.high %v5829_v41, %v5845_v30  ;;  %v11679_v25 = vrot.slane %v7758_v17, %v11147_v34  ;;  %7949 = vrot.lane.b32.xlu0 %v7686_v26, %s9543_s6  ;;  %v6110_v14 = vcombine.high %v11559_v13, %v5638_v51 }
 0x468   : > { %v5901_v55 = vcombine.low %v5836_v21, %v5852_v36  ;;  %v5902_v24 = vcombine.high %v5836_v21, %v5852_v36  ;;  %v11683_v45 = vrot.slane %v7790_v46, %v11147_v34  ;;  %7951 = vrot.lane.b32.xlu1 %v7822_v39, %s9543_s6  ;;  %v5639_v61 = vpop.trf.xlu1  ;;  %v7093_v41 = vcombine.low %v11473_v12, %v11622_v40  ;;  %v5608_v46 = vpop.trf.xlu0 }
 0x469   : > { %v7125_v3 = vcombine.low %v11635_v32, %v11638_v35  ;;  %v6094_v26 = vcombine.high %v11529_v27, %v11632_v50  ;;  %v7687_v21 = vcombine.low %v11670_v10, %v11673_v43  ;;  %v6365_v20 = vcombine.low %v11549_v31, %v5607_v11 }
 0x46a   : > { %v6117_v30 = vrot.slane %v6109_v47, %v11145_v53  ;;  %v5893_v39 = vrot.slane %v5885_v59, %v11147_v34  ;;  %v5900_v13 = vrot.slane %v5886_v29, %v11147_v34  ;;  %v6366_v17 = vcombine.high %v11549_v31, %v5607_v11 }
 0x46b   : > { %v7823_v51 = vcombine.low %v11679_v25, %v11683_v45  ;;  %v6101_v36 = vrot.slane %v6093_v49, %v11145_v53  ;;  %7965 = vrot.lane.b32.xlu0 %v7687_v21, %s9544_s12  ;;  %v5909_v27 = vrot.slane %v5901_v55, %v11147_v34  ;;  %v5916_v50 = vrot.slane %v5902_v24, %v11147_v34 }
 0x46c   : > { %v6124_v59 = vrot.slane %v6110_v14, %v11145_v53  ;;  %v11710_v29 = vrot.slane %v7093_v41, %v11147_v34  ;;  %v11713_v31 = vrot.slane %v7125_v3, %v11147_v34  ;;  %v12380_v49 = vcombine.low %v11436_v44, %v11439_v19 }
 0x46d   : > { %7967 = vrot.lane.b32.xlu1 %v7823_v51, %s9544_s12  ;;  %v6108_v55 = vrot.slane %v6094_v26, %v11145_v53  ;;  %v6373_v24 = vrot.slane %v6365_v20, %v11145_v53  ;;  %v6157_v47 = vcombine.low %v6101_v36, %v6117_v30  ;;  %v6158_v21 = vcombine.high %v6101_v36, %v6117_v30  ;;  %v5640_v51 = vpop.trf.xlu1  ;;  %s9550_s12 = smov [#allocation2]  }
 0x46e   : > { %v11719_v11 = vrot.slane %v12380_v49, %v11147_v34  ;;  %v8508_v14 = vcombine.low %v5893_v39, %v5900_v13  ;;  %v6380_v41 = vrot.slane %v6366_v17, %v11145_v53  ;;  %v6637_v32 = vcombine.low %v11562_v28, %v5608_v46 }
 0x46f   : > { %v6638_v3 = vcombine.high %v11562_v28, %v5608_v46  ;;  %v8510_v35 = vcombine.high %v5893_v39, %v5900_v13  ;;  %v8512_v12 = vcombine.low %v5909_v27, %v5916_v50  ;;  %v12381_v49 = vcombine.high %v11208_v18, %v11211_v63 }
 0x470   : > { %v6381_v26 = vcombine.low %v11575_v1, %v5639_v61  ;;  %v6382_v20 = vcombine.high %v11575_v1, %v5639_v61  ;;  %v8514_v30 = vcombine.high %v5909_v27, %v5916_v50  ;;  %v6173_v36 = vcombine.low %v6108_v55, %v6124_v59 }
 0x471   : > { %7865 = vrot.lane.b32.xlu0 %v12381_v49, %s9545_s13  ;;  %v6174_v40 = vcombine.high %v6108_v55, %v6124_v59  ;;  %v12382_v17 = vcombine.high %v11295_v0, %v11308_v22  ;;  %v6653_v28 = vcombine.low %v11606_v6, %v5640_v51  ;;  %v6165_v39 = vrot.slane %v6157_v47, %v11147_v34 }
 0x472   : > { %v6172_v13 = vrot.slane %v6158_v21, %v11147_v34  ;;  %v6389_v18 = vrot.slane %v6381_v26, %v11145_v53  ;;  %v6396_v63 = vrot.slane %v6382_v20, %v11145_v53  ;;  %v6645_v1 = vrot.slane %v6637_v32, %v11145_v53 }
 0x473   : > { %7867 = vrot.lane.b32.xlu1 %v12382_v17, %s9545_s13  ;;  %v6652_v61 = vrot.slane %v6638_v3, %v11145_v53  ;;  %v6654_v27 = vcombine.high %v11606_v6, %v5640_v51  ;;  %v6661_v50 = vrot.slane %v6653_v28, %v11145_v53  ;;  %v12383_v0 = vcombine.high %v11244_v57, %v11258_v16 }
 0x474   : > { %v6429_v22 = vcombine.low %v6373_v24, %v6389_v18  ;;  %v6430_v46 = vcombine.high %v6373_v24, %v6389_v18  ;;  %v6445_v59 = vcombine.low %v6380_v41, %v6396_v63  ;;  %v6446_v55 = vcombine.high %v6380_v41, %v6396_v63 }
 0x475   : > { %7869 = vrot.lane.b32.xlu0 %v12383_v0, %s9545_s13  ;;  %v7416_v47 = vcombine.high %v11598_v54, %v11611_v37  ;;  %v12384_v32 = vcombine.high %v11370_v33, %v11373_v8  ;;  %v6668_v6 = vrot.slane %v6654_v27, %v11145_v53  ;;  %v6701_v21 = vcombine.low %v6645_v1, %v6661_v50 }
 0x476   : > { %v6702_v51 = vcombine.high %v6645_v1, %v6661_v50  ;;  %v6437_v3 = vrot.slane %v6429_v22, %v11147_v34  ;;  %v6444_v57 = vrot.slane %v6430_v46, %v11147_v34  ;;  %v6453_v16 = vrot.slane %v6445_v59, %v11147_v34 }
 0x477   : > { %7871 = vrot.lane.b32.xlu1 %v12384_v32, %s9545_s13  ;;  %v6460_v24 = vrot.slane %v6446_v55, %v11147_v34  ;;  %v11761_v41 = vrot.slane %v8508_v14, %v11145_v53  ;;  %v6181_v54 = vrot.slane %v6173_v36, %v11147_v34  ;;  %v6188_v33 = vrot.slane %v6174_v40, %v11147_v34 }
 0x478   : > { %v8516_v8 = vcombine.low %v6165_v39, %v6172_v13  ;;  %v11766_v37 = vrot.slane %v8510_v35, %v11145_v53  ;;  %v11769_v49 = vrot.slane %v8512_v12, %v11145_v53  ;;  %v6717_v26 = vcombine.low %v6652_v61, %v6668_v6 }
 0x479   : > { %7977 = vrot.lane.b32.xlu0 %v7416_v47, %s9545_s13  ;;  %v6718_v20 = vcombine.high %v6652_v61, %v6668_v6  ;;  %v11773_v17 = vrot.slane %v8514_v30, %v11145_v53  ;;  %v8524_v14 = vcombine.low %v6437_v3, %v6444_v57  ;;  %v8526_v28 = vcombine.high %v6437_v3, %v6444_v57 }
 0x47a   : > { %v7688_v36 = vcombine.high %v11670_v10, %v11673_v43  ;;  %v8528_v40 = vcombine.low %v6453_v16, %v6460_v24  ;;  %v8530_v18 = vcombine.high %v6453_v16, %v6460_v24  ;;  %v6709_v35 = vrot.slane %v6701_v21, %v11147_v34 }
 0x47b   : > { %v6716_v63 = vrot.slane %v6702_v51, %v11147_v34  ;;  %v11780_v12 = vrot.slane %v8516_v8, %v11145_v53  ;;  %v8518_v1 = vcombine.high %v6165_v39, %v6172_v13  ;;  %v8520_v27 = vcombine.low %v6181_v54, %v6188_v33 }
 0x47c   : > { %v8522_v61 = vcombine.high %v6181_v54, %v6188_v33  ;;  %v6725_v30 = vrot.slane %v6717_v26, %v11147_v34  ;;  %v6732_v50 = vrot.slane %v6718_v20, %v11147_v34  ;;  %v7552_v10 = vcombine.high %v11627_v48, %v11630_v7 }
 0x47d   : > { %7981 = vrot.lane.b32.xlu0 %v7688_v36, %s9545_s13  ;;  %v12385_v43 = vcombine.low %v11451_v5, %v11454_v9  ;;  %v11794_v22 = vrot.slane %v8524_v14, %v11145_v53  ;;  %v11797_v39 = vrot.slane %v8526_v28, %v11145_v53  ;;  %v7365_v13 = vcombine.low %v11761_v41, %v11766_v37 }
 0x47e   : > { %v7397_v46 = vcombine.low %v11769_v49, %v11773_v17  ;;  %v11804_v48 = vrot.slane %v8528_v40, %v11145_v53  ;;  %v11807_v7 = vrot.slane %v8530_v18, %v11145_v53  ;;  %v8532_v59 = vcombine.low %v6709_v35, %v6716_v63  ;;  %7979 = vrot.lane.b32.xlu1 %v7552_v10, %s9545_s13  ;;  %v12391_v10 = vld [vmem:[#allocation6_spill] sm:$0xff] }
 0x47f   : > { %v11791_v0 = vrot.slane %v12385_v43, %v11147_v34  ;;  %v11813_v47 = vrot.slane %v8518_v1, %v11145_v53  ;;  %v11816_v32 = vrot.slane %v8520_v27, %v11145_v53  ;;  %v11819_v6 = vrot.slane %v8522_v61, %v11145_v53 }
 0x480   : > { %v8534_v21 = vcombine.high %v6709_v35, %v6716_v63  ;;  %v8536_v51 = vcombine.low %v6725_v30, %v6732_v50  ;;  %v8538_v3 = vcombine.high %v6725_v30, %v6732_v50  ;;  %v12386_v57 = vcombine.low %v11445_v23, %v11448_v62  ;;  %v12388_v30 = vld [vmem:[#allocation32_spill] sm:$0xff]  ;;  %v12390_v50 = vld [vmem:[#allocation33_spill] sm:$0xff] }
 0x481   : > { %v7281_v55 = vcombine.low %v11719_v11, %v11791_v0  ;;  %v7824_v16 = vcombine.high %v11679_v25, %v11683_v45  ;;  %v11828_v24 = vrot.slane %v7365_v13, %v11147_v34  ;;  %v11831_v54 = vrot.slane %v7397_v46, %v11147_v34 }
 0x482   : > { %7881 = vrot.lane.b32.xlu0 %v12386_v57, %s9546_s14  ;;  %v7637_v33 = vcombine.low %v11794_v22, %v11797_v39  ;;  %v7010_v8 = vcombine.high %v11480_v15, %v11483_v4  ;;  %v11838_v26 = vrot.slane %v8532_v59, %v11145_v53  ;;  %v7145_v25 = vcombine.low %v11710_v29, %v11713_v31 }
 0x483   : > { %7983 = vrot.lane.b32.xlu1 %v7824_v16, %s9545_s13  ;;  %v7669_v45 = vcombine.low %v11804_v48, %v11807_v7  ;;  %v11846_v20 = vrot.slane %v8534_v21, %v11145_v53  ;;  %v7501_v14 = vcombine.low %v11780_v12, %v11813_v47  ;;  %v7533_v28 = vcombine.low %v11816_v32, %v11819_v6  ;;  %s9483_s13 = sshll.u32 %s9550_s12, 4  ;;  %s9484_s13 = int_to_ptr.vmem [resolvable:$false] %s9483_s13 }
 0x484   : > { %v7282_v36 = vcombine.high %v11719_v11, %v11791_v0  ;;  %v11855_v40 = vrot.slane %v8536_v51, %v11145_v53  ;;  %v11858_v18 = vrot.slane %v8538_v3, %v11145_v53  ;;  %v6822_v35 = vcombine.high %v11356_v42, %v11359_v52  ;;  %v12389_v42 = vld [vmem:[#allocation12_spill] sm:$0xff]  ;;  %p9486_p0 = scmp.lt.s32.totalorder %s12137_s7, %s9484_s13 }
 0x485   : > { %v7417_v63 = vcombine.low %v11828_v24, %v11831_v54  ;;  %v7645_v1 = vrot.slane %v7637_v33, %v11147_v34  ;;  %v6854_v27 = vcombine.high %v11362_v38, %v11366_v2  ;;  %v12387_v11 = vcombine.low %v11480_v15, %v11483_v4 }
 0x486   : > { %7885 = vrot.lane.b32.xlu0 %v7145_v25, %s9546_s14  ;;  %v7677_v53 = vrot.slane %v7669_v45, %v11147_v34  ;;  %v11874_v61 = vrot.slane %v6822_v35, %v11147_v34  ;;  %v6958_v52 = vcombine.high %v12389_v42, %v12388_v30  ;;  %v6990_v43 = vcombine.high %v12391_v10, %v12390_v50  ;;  %v12396_v42 = vld [vmem:[#allocation16_spill] sm:$0xff]  ;;  %v12398_v10 = vld [vmem:[#allocation34_spill] sm:$0xff] }
 0x487   : > { %7883 = vrot.lane.b32.xlu1 %v12387_v11, %s9546_s14  ;;  %v7509_v0 = vrot.slane %v7501_v14, %v11147_v34  ;;  %v7541_v38 = vrot.slane %v7533_v28, %v11147_v34  ;;  %v7773_v2 = vcombine.low %v11838_v26, %v11846_v20  ;;  %v11885_v15 = vrot.slane %v6854_v27, %v11147_v34  ;;  %v12392_v14 = vld [vmem:[#allocation9_spill] sm:$0xff]  ;;  %v12397_v50 = vld [vmem:[#allocation8_spill] sm:$0xff] }
 0x488   : > { %v7805_v4 = vcombine.low %v11855_v40, %v11858_v18  ;;  %v11891_v13 = vrot.slane %v6958_v52, %v11147_v34  ;;  %v11894_v46 = vrot.slane %v6990_v43, %v11147_v34  ;;  %v7230_v59 = vcombine.high %v11436_v44, %v11439_v19  ;;  %v12393_v28 = vld [vmem:[#allocation21_spill] sm:$0xff] }
 0x489   : > { %v6875_v21 = vcombine.low %v11874_v61, %v11885_v15  ;;  %v7262_v51 = vcombine.high %v11451_v5, %v11454_v9  ;;  %v7689_v3 = vcombine.low %v7645_v1, %v7677_v53  ;;  %v7553_v25 = vcombine.low %v7509_v0, %v7541_v38 }
 0x48a   : > { %7993 = vrot.lane.b32.xlu0 %v7417_v63, %s9546_s14  ;;  %v7011_v57 = vcombine.low %v11891_v13, %v11894_v46  ;;  %v11906_v16 = vrot.slane %v7230_v59, %v11147_v34  ;;  %v7781_v44 = vrot.slane %v7773_v2, %v11147_v34  ;;  %v7813_v19 = vrot.slane %v7805_v4, %v11147_v34  ;;  %v12399_v2 = vld [vmem:[#allocation19_spill] sm:$0xff]  ;;  %v12400_v4 = vld [vmem:[#allocation13_spill] sm:$0xff] }
 0x48b   : > { %7887 = vrot.lane.b32.xlu1 %v7281_v55, %s9546_s14  ;;  %v11909_v33 = vrot.slane %v7262_v51, %v11147_v34  ;;  %v6876_v5 = vcombine.high %v11874_v61, %v11885_v15  ;;  %v7012_v45 = vcombine.high %v11891_v13, %v11894_v46  ;;  %v12394_v35 = vcombine.low %v12392_v14, %v12393_v28  ;;  %v12401_v14 = vld [vmem:[#allocation10_spill] sm:$0xff]  ;;  %v12402_v28 = vld [vmem:[#allocation11_spill] sm:$0xff] }
 0x48c   : > { %v7834_v55 = vpop.permute.xlu0 %7833  ;;  %v12395_v27 = vcombine.high %v11445_v23, %v11448_v62  ;;  %v7825_v11 = vcombine.low %v7781_v44, %v7813_v19  ;;  %v7413_v52 = vcombine.low %v12396_v42, %v11594_v60  ;;  %v7146_v51 = vcombine.high %v11710_v29, %v11713_v31  ;;  %v12405_v62 = vld [vmem:[#allocation36_spill] sm:$0xff] }
 0x48d   : > { %v7283_v9 = vcombine.low %v11906_v16, %v11909_v33  ;;  %v8053_v63 = vsel %vm627_vm0, %v12394_v35, %v7834_v55  ;;  %v7284_v30 = vcombine.high %v11906_v16, %v11909_v33  ;;  %v7418_v55 = vcombine.high %v11828_v24, %v11831_v54  ;;  %v12406_v24 = vld [vmem:[#allocation17_spill] sm:$0xff] }
 0x48e   : > { %7997 = vrot.lane.b32.xlu0 %v7689_v3, %s9546_s14  ;;  %v7141_v35 = vcombine.low %v12402_v28, %v12401_v14  ;;  %v7126_v54 = vcombine.high %v12406_v24, %v12405_v62  ;;  %v7554_v14 = vcombine.high %v7509_v0, %v7541_v38  ;;  %v12407_v28 = vld [vmem:[#allocation35_spill] sm:$0xff]  ;;  %v7826_v0 = vcombine.high %v7781_v44, %v7813_v19  ;;  %v12409_v19 = vld [vmem:[#allocation5_spill] sm:$0xff] }
 0x48f   : > { %7995 = vrot.lane.b32.xlu1 %v7553_v25, %s9546_s14  ;;  %v7534_v44 = vcombine.high %v11816_v32, %v11819_v6  ;;  %v12411_v46 = vcombine.low %v12398_v10, %v12397_v50  ;;  %v12412_v60 = vcombine.low %v12400_v4, %v12399_v2  ;;  %v12413_v50 = vcombine.low %v11659_v56, %v11666_v58 }
 0x490   : > { %v7850_v23 = vpop.permute.xlu0 %7849 }
 0x491   : > { %v11943_v25 = vsel %vm2372_vm1, %v8053_v63, %v7850_v23  ;;  %v7690_v63 = vcombine.high %v7645_v1, %v7677_v53  ;;  %v7140_v1 = vrot.slane %v7126_v54, %v11147_v34  ;;  %v7398_v53 = vcombine.high %v11769_v49, %v11773_v17 }
 0x492   : > { %7897 = vrot.lane.b32.xlu0 %v12395_v27, %s9547_s15  ;;  %v7836_v3 = vpop.permute.xlu1 %7835  ;;  %v7638_v49 = vcombine.high %v11794_v22, %v11797_v39  ;;  %v7670_v17 = vcombine.high %v11804_v48, %v11807_v7  ;;  %v7548_v6 = vrot.slane %v7534_v44, %v11147_v34 }
 0x493   : > { %7999 = vrot.lane.b32.xlu1 %v7825_v11, %s9546_s14  ;;  %s9485_s14 = scalar_lea.vmem %s9484_s13, 2048 }
 0x494   : > { %v7854_v27 = vpop.permute.xlu0 %7853  ;;  %v7652_v39 = vrot.slane %v7638_v49, %v11147_v34  ;;  %v7684_v48 = vrot.slane %v7670_v17, %v11147_v34  ;;  %p9487_p1 = scmp.lt.s32.totalorder %s9485_s14, %s9479_s11 }
 0x496   : > { %7901 = vrot.lane.b32.xlu0 %v7146_v51, %s9547_s15  ;;  %v7838_v29 = vpop.permute.xlu1 %7837  ;;  %v12403_v51 = vld [vmem:[#allocation18_spill] sm:$0xff]  ;;  %p9488_p2 = por %p9487_p1, %p9486_p0 }
 0x497   : > { %7899 = vrot.lane.b32.xlu1 %v7010_v8, %s9547_s15  ;;  %v8055_v31 = vsel %vm627_vm0, %v7141_v35, %v7838_v29  ;;  %v12404_v8 = vld [vmem:[#allocation7_spill] sm:$0xff]  ;;  %v7366_v35 = vcombine.high %v11761_v41, %v11766_v37  ;;  %v7412_v29 = vrot.slane %v7398_v53, %v11147_v34 }
 0x498   : > { %v11954_v11 = vsel %vm2372_vm1, %v8055_v31, %v7854_v27  ;;  %v7094_v23 = vcombine.high %v12404_v8, %v12403_v51  ;;  %p9489_p3 = pnand %p9488_p2, %p9482_p13 }
 0x499   : > { %v7380_v41 = vrot.slane %v7366_v35, %v11147_v34 }
 0x49a   : > { %8009 = vrot.lane.b32.xlu0 %v7418_v55, %s9547_s15  ;;  %v7840_v59 = vpop.permute.xlu1 %7839  ;;  %v12408_v55 = vld [vmem:[#allocation22_spill] sm:$0xff] }
 0x49b   : > { %7903 = vrot.lane.b32.xlu1 %v7282_v36, %s9547_s15  ;;  %v7005_v43 = vcombine.low %v12408_v55, %v12407_v28  ;;  %v7108_v36 = vrot.slane %v7094_v23, %v11147_v34  ;;  %v7419_v22 = vcombine.low %v7380_v41, %v7412_v29 }
 0x49d   : > { %v8054_v62 = vsel %vm627_vm0, %v7005_v43, %v7836_v3  ;;  %v7147_v37 = vcombine.low %v7108_v36, %v7140_v1  ;;  %v12410_v43 = vld [vmem:[#allocation20_spill] sm:$0xff] }
 0x49e   : > { %8013 = vrot.lane.b32.xlu0 %v7690_v63, %s9547_s15  ;;  %v7852_v27 = vpop.permute.xlu1 %7851  ;;  %v7277_v3 = vcombine.low %v12410_v43, %v12409_v19 }
 0x49f   : > { %8011 = vrot.lane.b32.xlu1 %v7554_v14, %s9547_s15  ;;  %v11974_v38 = vsel %vm2372_vm1, %v8054_v62, %v7852_v27 }
 0x4a0   : > { %v8056_v7 = vsel %vm627_vm0, %v7277_v3, %v7840_v59  ;;  %v7691_v59 = vcombine.low %v7652_v39, %v7684_v48 }
 0x4a2   : > { %7913 = vrot.lane.b32.xlu0 %v6875_v21, %s9548_s16  ;;  %v7502_v21 = vcombine.high %v11780_v12, %v11813_v47  ;;  %v7774_v12 = vcombine.high %v11838_v26, %v11846_v20 }
 0x4a3   : > { %8015 = vrot.lane.b32.xlu1 %v7826_v0, %s9547_s15 }
 0x4a4   : > { %v7516_v32 = vrot.slane %v7502_v21, %v11147_v34  ;;  %v7788_v20 = vrot.slane %v7774_v12, %v11147_v34 }
 0x4a5   : > { %v7856_v31 = vpop.permute.xlu1 %7855 }
 0x4a6   : > { %7917 = vrot.lane.b32.xlu0 %v7147_v37, %s9548_s16  ;;  %v12000_v47 = vsel %vm2372_vm1, %v8056_v7, %v7856_v31  ;;  %v7555_v26 = vcombine.low %v7516_v32, %v7548_v6  ;;  %v7556_v51 = vcombine.high %v7516_v32, %v7548_v6 }
 0x4a7   : > { %7915 = vrot.lane.b32.xlu1 %v7011_v57, %s9548_s16  ;;  %v7806_v57 = vcombine.high %v11855_v40, %v11858_v18  ;;  %v7148_v18 = vcombine.high %v7108_v36, %v7140_v1 }
 0x4a9   : > { %v7820_v63 = vrot.slane %v7806_v57, %v11147_v34  ;;  %v7692_v34 = vcombine.high %v7652_v39, %v7684_v48 }
 0x4aa   : > { %8025 = vrot.lane.b32.xlu0 %v7419_v22, %s9548_s16 }
 0x4ab   : > { %7919 = vrot.lane.b32.xlu1 %v7283_v9, %s9548_s16  ;;  %v7827_v40 = vcombine.low %v7788_v20, %v7820_v63  ;;  %v7420_v9 = vcombine.high %v7380_v41, %v7412_v29  ;;  %v7828_v61 = vcombine.high %v7788_v20, %v7820_v63 }
 0x4ae   : > { %8029 = vrot.lane.b32.xlu0 %v7691_v59, %s9548_s16 }
 0x4af   : > { %8027 = vrot.lane.b32.xlu1 %v7555_v26, %s9548_s16 }
 0x4b2   : > { %7929 = vrot.lane.b32.xlu0 %v6876_v5, %s9549_s17 }
 0x4b3   : > { %8031 = vrot.lane.b32.xlu1 %v7827_v40, %s9548_s16 }
 0x4b6   : > { %7933 = vrot.lane.b32.xlu0 %v7148_v18, %s9549_s17 }
 0x4b7   : > { %7931 = vrot.lane.b32.xlu1 %v7012_v45, %s9549_s17 }
 0x4ba   : > { %8041 = vrot.lane.b32.xlu0 %v7420_v9, %s9549_s17 }
 0x4bb   : > { %7935 = vrot.lane.b32.xlu1 %v7284_v30, %s9549_s17 }
 0x4be   : > { %8045 = vrot.lane.b32.xlu0 %v7692_v34, %s9549_s17 }
 0x4bf   : > { %8043 = vrot.lane.b32.xlu1 %v7556_v51, %s9549_s17 }
 0x4c3   : > { %8047 = vrot.lane.b32.xlu1 %v7828_v61, %s9549_s17 }
 0x4d1   : > { %v7946_v15 = vpop.permute.xlu0 %7945 }
 0x4d2   : > { %v8086_v5 = vsel %vm627_vm0, %v7413_v52, %v7946_v15  ;;  %v7948_v13 = vpop.permute.xlu1 %7947 }
 0x4d3   : > { %v8087_v45 = vsel %vm627_vm0, %v12411_v46, %v7948_v13 }
 0x4d5   : > { %v7962_v16 = vpop.permute.xlu0 %7961 }
 0x4d6   : > { %v12034_v33 = vsel %vm2372_vm1, %v8086_v5, %v7962_v16  ;;  %v7964_v30 = vpop.permute.xlu1 %7963 }
 0x4d7   : > { %v12037_v8 = vsel %vm2372_vm1, %v8087_v45, %v7964_v30 }
 0x4d9   : > { %v7950_v23 = vpop.permute.xlu0 %7949 }
 0x4da   : > { %v8088_v42 = vsel %vm627_vm0, %v12412_v60, %v7950_v23  ;;  %v7952_v52 = vpop.permute.xlu1 %7951 }
 0x4db   : > { %v8089_v10 = vsel %vm627_vm0, %v12413_v50, %v7952_v52 }
 0x4dd   : > { %v7966_v24 = vpop.permute.xlu0 %7965 }
 0x4de   : > { %v12048_v54 = vsel %vm2372_vm1, %v8088_v42, %v7966_v24 }
 0x4df   : > { %v7968_v14 = vpop.permute.xlu1 %7967 }
 0x4e0   : > { %v12051_v28 = vsel %vm2372_vm1, %v8089_v10, %v7968_v14 }
 0x4e3   : > { %v7866_v55 = vpop.permute.xlu0 %7865 }
 0x4e4   : > { %v8062_v57 = vsel %vm8061_vm2, %v11943_v25, %v7866_v55 }
 0x4e5   : > { %v7868_v35 = vpop.permute.xlu1 %7867 }
 0x4e6   : > { %v8063_v25 = vsel %vm8061_vm2, %v11974_v38, %v7868_v35 }
 0x4e7   : > { %v7870_v36 = vpop.permute.xlu0 %7869 }
 0x4e8   : > { %v8064_v18 = vsel %vm8061_vm2, %v11954_v11, %v7870_v36 }
 0x4e9   : > { %v7872_v2 = vpop.permute.xlu1 %7871 }
 0x4ea   : > { %v8065_v23 = vsel %vm8061_vm2, %v12000_v47, %v7872_v2 }
 0x4eb   : > { %v7978_v4 = vpop.permute.xlu0 %7977 }
 0x4ec   : > { %v8094_v13 = vsel %vm8061_vm2, %v12034_v33, %v7978_v4 }
 0x4ef   : > { %v12053_v1 = vpop.permute.xlu0 %7981 }
 0x4f0   : > { %v12055_v53 = vpop.permute.xlu1 %7979  ;;  %v8096_v10 = vsel %vm8061_vm2, %v12048_v54, %v12053_v1 }
 0x4f1   : > { %v8095_v36 = vsel %vm8061_vm2, %v12037_v8, %v12055_v53 }
 0x4f4   : > { %v7882_v56 = vpop.permute.xlu0 %7881 }
 0x4f5   : > { %v12057_v58 = vpop.permute.xlu1 %7983  ;;  %v8067_v59 = vsel %vm8066_vm3, %v8062_v57, %v7882_v56 }
 0x4f6   : > { %v8097_v53 = vsel %vm8061_vm2, %v12051_v28, %v12057_v58 }
 0x4f8   : > { %v7886_v62 = vpop.permute.xlu0 %7885 }
 0x4f9   : > { %v7884_v27 = vpop.permute.xlu1 %7883  ;;  %v8069_v34 = vsel %vm8066_vm3, %v8064_v18, %v7886_v62 }
 0x4fa   : > { %v8068_v15 = vsel %vm8066_vm3, %v8063_v25, %v7884_v27 }
 0x4fc   : > { %v7994_v0 = vpop.permute.xlu0 %7993 }
 0x4fd   : > { %v7888_v41 = vpop.permute.xlu1 %7887  ;;  %v8098_v16 = vsel %vm8066_vm3, %v8094_v13, %v7994_v0 }
 0x4fe   : > { %v8070_v33 = vsel %vm8066_vm3, %v8065_v23, %v7888_v41 }
 0x500   : > { %v7998_v37 = vpop.permute.xlu0 %7997 }
 0x501   : > { %v12059_v29 = vpop.permute.xlu1 %7995  ;;  %v8100_v47 = vsel %vm8066_vm3, %v8096_v10, %v7998_v37 }
 0x502   : > { %v8099_v4 = vsel %vm8066_vm3, %v8095_v36, %v12059_v29 }
 0x504   : > { %v7898_v49 = vpop.permute.xlu0 %7897 }
 0x505   : > { %v12061_v17 = vpop.permute.xlu1 %7999  ;;  %v8072_v20 = vsel %vm8071_vm4, %v8067_v59, %v7898_v49 }
 0x506   : > { %v8101_v37 = vsel %vm8066_vm3, %v8097_v53, %v12061_v17 }
 0x508   : > { %v7902_v21 = vpop.permute.xlu0 %7901 }
 0x509   : > { %v7900_v44 = vpop.permute.xlu1 %7899  ;;  %v8074_v61 = vsel %vm8071_vm4, %v8069_v34, %v7902_v21 }
 0x50a   : > { %v8073_v46 = vsel %vm8071_vm4, %v8068_v15, %v7900_v44 }
 0x50c   : > { %v8010_v19 = vpop.permute.xlu0 %8009 }
 0x50d   : > { %v7904_v43 = vpop.permute.xlu1 %7903  ;;  %v8102_v60 = vsel %vm8071_vm4, %v8098_v16, %v8010_v19 }
 0x50e   : > { %v8075_v24 = vsel %vm8071_vm4, %v8070_v33, %v7904_v43 }
 0x510   : > { %v8014_v3 = vpop.permute.xlu0 %8013 }
 0x511   : > { %v8012_v22 = vpop.permute.xlu1 %8011  ;;  %v8104_v2 = vsel %vm8071_vm4, %v8100_v47, %v8014_v3 }
 0x512   : > { %v8103_v62 = vsel %vm8071_vm4, %v8099_v4, %v8012_v22 }
 0x514   : > { %v7914_v39 = vpop.permute.xlu0 %7913 }
 0x515   : > { %v12063_v48 = vpop.permute.xlu1 %8015  ;;  %v8077_v63 = vsel %vm8076_vm5, %v8072_v20, %v7914_v39 }
 0x516   : > { %v8105_v29 = vsel %vm8071_vm4, %v8101_v37, %v12063_v48 }
 0x518   : > { %v7918_v7 = vpop.permute.xlu0 %7917 }
 0x519   : > { %v7916_v31 = vpop.permute.xlu1 %7915  ;;  %v8079_v11 = vsel %vm8076_vm5, %v8074_v61, %v7918_v7 }
 0x51a   : > { %v8078_v30 = vsel %vm8076_vm5, %v8073_v46, %v7916_v31 }
 0x51c   : > { %v8026_v12 = vpop.permute.xlu0 %8025 }
 0x51d   : > { %v7920_v32 = vpop.permute.xlu1 %7919  ;;  %v8106_v52 = vsel %vm8076_vm5, %v8102_v60, %v8026_v12 }
 0x51e   : > { %v8080_v55 = vsel %vm8076_vm5, %v8075_v24, %v7920_v32 }
 0x520   : > { %v8030_v6 = vpop.permute.xlu0 %8029 }
 0x521   : > { %v8028_v26 = vpop.permute.xlu1 %8027  ;;  %v8108_v1 = vsel %vm8076_vm5, %v8104_v2, %v8030_v6 }
 0x522   : > { %v8107_v0 = vsel %vm8076_vm5, %v8103_v62, %v8028_v26 }
 0x524   : > { %v7930_v40 = vpop.permute.xlu0 %7929 }
 0x525   : > { %v8082_v9 = vsel %vm8081_vm6, %v8077_v63, %v7930_v40  ;;  %v8032_v51 = vpop.permute.xlu1 %8031 }
 0x526   : > { %8114 = vst [vmem:[%s12077_s26] sm:$0xff] %v8082_v9  ;;  %v8109_v49 = vsel %vm8076_vm5, %v8105_v29, %v8032_v51 }
 0x528   : > { %v7934_v5 = vpop.permute.xlu0 %7933 }
 0x529   : > { %v8084_v45 = vsel %vm8081_vm6, %v8079_v11, %v7934_v5  ;;  %v7932_v38 = vpop.permute.xlu1 %7931 }
 0x52a   : > { %8118 = vst [vmem:[%s12077_s26 + $0x20] sm:$0xff] %v8084_v45  ;;  %v8083_v42 = vsel %vm8081_vm6, %v8078_v30, %v7932_v38 }
 0x52b   : > { %8116 = vst [vmem:[%s12077_s26 + $0x10] sm:$0xff] %v8083_v42 }
 0x52c   : > { %v8042_v50 = vpop.permute.xlu0 %8041 }
 0x52d   : > { %v8110_v14 = vsel %vm8081_vm6, %v8106_v52, %v8042_v50  ;;  %v7936_v35 = vpop.permute.xlu1 %7935 }
 0x52e   : > { %8115 = vst [vmem:[%s12077_s26 + $0x8] sm:$0xff] %v8110_v14  ;;  %v8085_v54 = vsel %vm8081_vm6, %v8080_v55, %v7936_v35 }
 0x52f   : > { %8120 = vst [vmem:[%s12077_s26 + $0x30] sm:$0xff] %v8085_v54 }
 0x530   : > { %v8046_v56 = vpop.permute.xlu0 %8045 }
 0x531   : > { %v8112_v27 = vsel %vm8081_vm6, %v8108_v1, %v8046_v56  ;;  %v8044_v8 = vpop.permute.xlu1 %8043 }
 0x532   : > { %8119 = vst [vmem:[%s12077_s26 + $0x28] sm:$0xff] %v8112_v27  ;;  %v8111_v41 = vsel %vm8081_vm6, %v8107_v0, %v8044_v8 }
 0x533   : > { %8117 = vst [vmem:[%s12077_s26 + $0x18] sm:$0xff] %v8111_v41 }
 0x535   : > { %v8048_v21 = vpop.permute.xlu1 %8047 }
 0x536   : > { %v8113_v28 = vsel %vm8081_vm6, %v8109_v49, %v8048_v21 }
 0x537   : > { %8121 = vst [vmem:[%s12077_s26 + $0x38] sm:$0xff] %v8113_v28 }
 0x538   : > { %9492 = shalt.err (!%p9489_p3)
}
 0x539   : > { %s9493_s15 = scalar_lea.hbm %s12134_s10, 1024  ;;  %s9497_s23 = scalar_lea.hbm %s12189_s5, 4096 }
 0x53a   : > { %p9494_p4 = scmp.ne.s32.totalorder %s12134_s10, %s9493_s15  ;;  %p9498_p9 = scmp.lt.s32.totalorder %s12134_s10, %s12189_s5 }
 0x53b   : > { %p9499_p10 = scmp.lt.s32.totalorder %s9497_s23, %s9493_s15 }
 0x53c   : > { %p9495_p7 = pnand %p9494_p4, %p9620_p5 }
 0x53d   : > { %p9500_p11 = por %p9499_p10, %p9498_p9 }
 0x53e   : > { %p9496_p8 = pneg %p9495_p7 }
 0x540   : > { %p9501_p12 = pnand %p9500_p11, %p9496_p8 }
 0x542   : > { %9504 = shalt.err (!%p9501_p12)
}
 0x543   : > { %s9551_s30 = smov 256  }
 0x544   : > { %9173 = dma.vmem_to_hbm [thread:$0]  (%p9620_p5), %s12137_s7, 1024, %s12134_s10, %s12143_s22, %s9551_s30, %s9551_s30, %s9543_s6  }
 0x545 PF: > { %p9179_p13 = scmp.ge.s32.totalorder %s9539_s21, 2  ;;  %s8151_s8 = sand.u32 1, %s9527_s18  }
 0x546   : > { %s8152_s9 = scalar_lea.sflag [#allocation3], %s8151_s8 }
 0x547   : > { %p9176_p0 = pnand %p9179_p13, %p9624_p6 }
 0x549   : > { %p9177_p1 = pneg %p9176_p0 }
 0x54b   : > { %9522 = dma.done.wait (%p9177_p1), %s8152_s9, 1024  }
 0x54c   : > { %9524 = vsyncadd (%p9177_p1), %s8152_s9, 4294966272  ;;  %p15_p2 = scmp.ge.s32.totalorder %s9607_s24, 6   ;;  %s12414_s18 = smov %s9531_s19 }
 0x54d   : > { %s12415_s19 = smov %s9535_s20  ;;  %s12416_s20 = smov %s9618_s27 }
 0x54e   : > { %s12417_s21 = smov %s9607_s24  ;;  %17 = sbr.rel (!%p15_p2) target bundleno = 3 (0x3), region = 84 }
 0x553   :  { %8157 = vsyncpa [#allocation3], 1 }
 0x554   :  { %8159 = vsyncpa [#allocation3 + $0x1], 1 }

</bundles_post_ra>
